<compile_context>
chip_gen: v6e
topology: v6e:2x2x1
jax: 0.10.0
libtpu: 0.0.40
codegen_flags: <defaults>
</compile_context>

<pallas_src>
import math

import jax
import jax.numpy as jnp
from jax.experimental import pallas as pl
from jax.experimental.pallas import tpu as pltpu  # noqa: F401  (TPU backend assumed)

LEAKY_SLOPE = 0.2
MBSTD_EPS = 1e-8


# ----------------------------------------------------------------------------
# Weight preparation (host/XLA side, one-time): fold equalized-LR scale in and
# lay the weights out the way the kernel consumes them.
# ----------------------------------------------------------------------------
def _prep_tap_conv(c):
    """torch-layout (C_out, C_in, K) -> (K, C_out, C_in), scaled; bias -> (C_out, 1)."""
    w, b = c["w"], c["b"]
    c_out, c_in, k = w.shape
    scale = math.sqrt(2.0 / (c_in * k))
    w_t = (jnp.transpose(w, (2, 0, 1)) * scale).astype(jnp.float32)
    return [w_t, b.reshape(c_out, 1).astype(jnp.float32)]


def _prep_full_conv(c):
    """Full-length conv (L_out == 1): keep (C_out, C_in, K), scaled."""
    w, b = c["w"], c["b"]
    c_out, c_in, k = w.shape
    scale = math.sqrt(2.0 / (c_in * k))
    return [(w * scale).astype(jnp.float32), b.reshape(c_out, 1).astype(jnp.float32)]


# ----------------------------------------------------------------------------
# Fused score_validity kernel (structure fixed at trace time by top_blocks)
# ----------------------------------------------------------------------------
def _make_score_kernel(*, batch, top0, two_res, blend_ratio):
    def kernel(img_ref, *refs):
        out_ref = refs[-1]
        prefs = refs[:-1]
        pos = [0]

        def nxt():
            w = prefs[pos[0]][...]
            b = prefs[pos[0] + 1][...]
            pos[0] += 2
            return w, b

        # Trace-time caches: each iota-built matrix is materialized exactly once.
        sel_cache = {}

        def dsel(length):  # (L, L//2): picks every other column (stride-2 subsample)
            if length not in sel_cache:
                r = jax.lax.broadcasted_iota(jnp.int32, (length, length // 2), 0)
                c = jax.lax.broadcasted_iota(jnp.int32, (length, length // 2), 1)
                sel_cache[length] = (r == 2 * c).astype(jnp.float32)
            return sel_cache[length]

        pool_cache = {}

        def pmat(length):  # (L, L//2): AvgPool1d(2) as a matmul
            if length not in pool_cache:
                r = jax.lax.broadcasted_iota(jnp.int32, (length, length // 2), 0)
                c = jax.lax.broadcasted_iota(jnp.int32, (length, length // 2), 1)
                hit = jnp.logical_or(r == 2 * c, r == 2 * c + 1)
                pool_cache[length] = jnp.where(hit, 0.5, 0.0).astype(jnp.float32)
            return pool_cache[length]

        def leaky(a):
            return jnp.maximum(a, LEAKY_SLOPE * a)

        def conv_taps(xs, w, b, *, pad, stride, act):
            """xs: list of per-sample (C_in, L); w: (K, C_out, C_in); b: (C_out, 1)."""
            k_taps = w.shape[0]
            outs = []
            for x in xs:
                c_in, _ = x.shape
                if pad:
                    z = jnp.zeros((c_in, pad), jnp.float32)
                    xp = jnp.concatenate([z, x, z], axis=1)
                else:
                    xp = x
                l_full = xp.shape[1] - k_taps + 1
                acc = None
                for k in range(k_taps):
                    xk = xp[:, k:k + l_full]
                    if c_in == 1:
                        t = w[k] * xk  # degenerate contraction -> VPU broadcast
                    else:
                        t = jnp.dot(w[k], xk, preferred_element_type=jnp.float32)
                    acc = t if acc is None else acc + t
                if stride == 2:
                    # contiguous conv + selection matmul: no strided lane access
                    acc = jnp.dot(acc, dsel(l_full), preferred_element_type=jnp.float32)
                acc = acc + b
                if act:
                    acc = leaky(acc)
                outs.append(acc)
            return outs

        def mbstd(xs):
            n = float(len(xs))
            m = xs[0]
            for x in xs[1:]:
                m = m + x
            mean = m / n
            v = (xs[0] - mean) ** 2
            for x in xs[1:]:
                v = v + (x - mean) ** 2
            std = jnp.sqrt(v / n + MBSTD_EPS)
            s = jnp.mean(std, axis=0, keepdims=True)
            s = jnp.mean(s, axis=1, keepdims=True)           # (1, 1) scalar feature
            chan = jnp.broadcast_to(s, (1, xs[0].shape[1]))
            return [jnp.concatenate([x, chan], axis=0) for x in xs]

        imgs = [img_ref[b] for b in range(batch)]            # each (1, L)

        if two_res:
            wf, bf = nxt()                                   # big fromECG (k=1)
            feats = conv_taps(imgs, wf, bf, pad=0, stride=1, act=False)
            w1, b1 = nxt()                                   # big block conv1
            feats = conv_taps(feats, w1, b1, pad=1, stride=1, act=True)
            w2, b2 = nxt()                                   # big block conv2 (downscale)
            feats = conv_taps(feats, w2, b2, pad=1, stride=2, act=True)
            wl, bl = nxt()                                   # lil fromECG (k=1)
            l_img = imgs[0].shape[1]
            pooled = [jnp.dot(x, pmat(l_img), preferred_element_type=jnp.float32)
                      for x in imgs]                         # AvgPool1d(2)
            trained = conv_taps(pooled, wl, bl, pad=0, stride=1, act=False)
            feats = [blend_ratio * f + (1.0 - blend_ratio) * t
                     for f, t in zip(feats, trained)]
        else:
            wl, bl = nxt()
            feats = conv_taps(imgs, wl, bl, pad=0, stride=1, act=False)

        for _ in range(top0, 0, -1):                         # intermediate blocks
            w1, b1 = nxt()
            feats = conv_taps(feats, w1, b1, pad=1, stride=1, act=True)
            w2, b2 = nxt()
            feats = conv_taps(feats, w2, b2, pad=1, stride=2, act=True)

        # ---------------- block 0 ----------------
        feats = mbstd(feats)
        w1, b1 = nxt()
        feats = conv_taps(feats, w1, b1, pad=1, stride=1, act=True)

        w2, b2 = nxt()      # full-length conv (kernel_size == feature length, L_out == 1)
        cols = []
        for x in feats:     # x: (C_in, K)
            prod = w2 * x[None, :, :]                        # (C_out, C_in, K)
            t = jnp.sum(prod, axis=2)                        # lane reduce
            cols.append(jnp.sum(t, axis=1, keepdims=True))   # (C_out, 1)
        y = jnp.concatenate(cols, axis=1) + b2               # (C_out, B): batch in lanes
        y = leaky(y)

        w3, b3 = nxt()      # 1x1 "fully-connected" conv -> score
        out_ref[...] = jnp.dot(w3[0], y, preferred_element_type=jnp.float32) + b3

    return kernel


# ----------------------------------------------------------------------------
# Wrapper: pack weights, build the fused kernel, one pallas_call per score.
# ----------------------------------------------------------------------------
def score_validity(params, img, top_blocks, blend_ratio):
    img = img.astype(jnp.float32)
    batch = img.shape[0]
    two_res = len(top_blocks) == 2

    arrays = []
    if two_res:
        arrays += _prep_tap_conv(params["fromECGs"][top_blocks[1]])
        arrays += _prep_tap_conv(params["blocks"][top_blocks[1]]["conv1"])
        arrays += _prep_tap_conv(params["blocks"][top_blocks[1]]["conv2"])
    arrays += _prep_tap_conv(params["fromECGs"][top_blocks[0]])
    for bi in range(top_blocks[0], 0, -1):
        arrays += _prep_tap_conv(params["blocks"][bi]["conv1"])
        arrays += _prep_tap_conv(params["blocks"][bi]["conv2"])
    arrays += _prep_tap_conv(params["blocks"][0]["conv1"])
    arrays += _prep_full_conv(params["blocks"][0]["conv2"])
    arrays += _prep_tap_conv(params["blocks"][0]["conv3"])

    kernel = _make_score_kernel(batch=batch, top0=top_blocks[0],
                                two_res=two_res, blend_ratio=float(blend_ratio))
    out = pl.pallas_call(
        kernel,
        out_shape=jax.ShapeDtypeStruct((1, batch), jnp.float32),
    )(img, *arrays)
    return out.reshape(-1)


def discriminator_forward(params, fake_img, real_imgs, top_blocks, blend_ratio):
    if real_imgs is None:
        return -jnp.mean(score_validity(params, fake_img, top_blocks, blend_ratio))
    fake_v = score_validity(params, fake_img, top_blocks, blend_ratio)
    real_v = score_validity(params, real_imgs, top_blocks, blend_ratio)
    wgan_loss = jnp.mean(fake_v) - jnp.mean(real_v)
    drift_penalty = 0.001 * jnp.mean(real_v ** 2.0)
    # TODO(synk): WGAN-GP gradient_penalty omitted (needs autodiff through pallas_call).
    return wgan_loss + drift_penalty


# ----------------------------------------------------------------------------
# Pure-JAX reference (for a correctness spot-check)
# ----------------------------------------------------------------------------
def _ref_conv(x, w, b, *, stride=1, padding=0):
    c_out, c_in, k = w.shape
    scale = math.sqrt(2.0 / (c_in * k))
    y = jax.lax.conv_general_dilated(
        x, w * scale, window_strides=(stride,), padding=[(padding, padding)],
        dimension_numbers=("NCH", "OIH", "NCH"))
    return y + b.reshape(1, c_out, 1)


def _ref_score_validity(params, img, top_blocks, blend_ratio):
    def lrelu(x):
        return jnp.maximum(x, LEAKY_SLOPE * x)

    def block(p, x):
        x = lrelu(_ref_conv(x, p["conv1"]["w"], p["conv1"]["b"], padding=1))
        x = lrelu(_ref_conv(x, p["conv2"]["w"], p["conv2"]["b"], padding=1, stride=2))
        return x

    def block0(p, x):
        bsz = x.shape[0]
        mean = jnp.mean(x, axis=0, keepdims=True)
        var = jnp.mean((x - mean) ** 2, axis=0, keepdims=True)
        s = jnp.mean(jnp.sqrt(var + MBSTD_EPS))
        x = jnp.concatenate([x, jnp.full((bsz, 1, x.shape[2]), s, x.dtype)], axis=1)
        x = lrelu(_ref_conv(x, p["conv1"]["w"], p["conv1"]["b"], padding=1))
        x = lrelu(_ref_conv(x, p["conv2"]["w"], p["conv2"]["b"]))
        x = _ref_conv(x, p["conv3"]["w"], p["conv3"]["b"])
        return x

    lil = params["fromECGs"][top_blocks[0]]
    if len(top_blocks) == 2:
        big = params["fromECGs"][top_blocks[1]]
        f = _ref_conv(img, big["w"], big["b"])
        f = block(params["blocks"][top_blocks[1]], f)
        bsz, ch, length = img.shape
        pooled = img.reshape(bsz, ch, length // 2, 2).mean(axis=-1)
        t = _ref_conv(pooled, lil["w"], lil["b"])
        f = blend_ratio * f + (1.0 - blend_ratio) * t
    else:
        f = _ref_conv(img, lil["w"], lil["b"])
    for bi in range(top_blocks[0], 0, -1):
        f = block(params["blocks"][bi], f)
    f = block0(params["blocks"][0], f)
    return f.reshape(-1)


# ----------------------------------------------------------------------------
# Parameter construction (deterministic, synthetic EqualizedConv1d params)
# ----------------------------------------------------------------------------
def init_params(key, blocks_cfg):
    keys = iter(jax.random.split(key, 64))

    def conv(c_out, c_in, k):
        return {"w": jax.random.normal(next(keys), (c_out, c_in, k), jnp.float32),
                "b": jnp.zeros((c_out,), jnp.float32)}

    n = len(blocks_cfg)
    from_ecgs = [conv(blocks_cfg[i], 1, 1) for i in range(n)]
    # block 0: mbstd -> conv3(pad1) -> lrelu -> conv k=32 -> lrelu -> conv k=1
    disc_blocks = [{
        "conv1": conv(blocks_cfg[0], blocks_cfg[0] + 1, 3),
        "conv2": conv(blocks_cfg[0], blocks_cfg[0], 32),
        "conv3": conv(1, blocks_cfg[0], 1),
    }]
    # new_block(i): conv3(pad1) blocks[i]->blocks[i-1], lrelu, conv3(pad1,stride2), lrelu
    for bi in range(1, n):
        disc_blocks.append({
            "conv1": conv(blocks_cfg[bi - 1], blocks_cfg[bi], 3),
            "conv2": conv(blocks_cfg[bi - 1], blocks_cfg[bi - 1], 3),
        })
    return {"fromECGs": from_ecgs, "blocks": disc_blocks}


# ----------------------------------------------------------------------------
if __name__ == "__main__":
    blocks_cfg = (32, 16, 8)           # channel counts per block (small config)
    top_blocks = (1, 2)                # blending block 2 into block 1
    blend_ratio = 0.7
    batch = 2
    length = 32 * (2 ** top_blocks[1])  # 128 (block-0 feature length is 32)

    root = jax.random.PRNGKey(0)
    pkey, ikey = jax.random.split(root)
    params = init_params(pkey, blocks_cfg)
    fake_img = jax.random.normal(ikey, (batch, 1, length), jnp.float32)

    scores = score_validity(params, fake_img, top_blocks, blend_ratio)
    ref = _ref_score_validity(params, fake_img, top_blocks, blend_ratio)
    jax.block_until_ready((scores, ref))
    assert scores.shape == (batch,)
    if not bool(jnp.allclose(scores, ref, rtol=3e-2, atol=3e-2)):
        raise AssertionError(f"pallas vs reference mismatch: {scores} vs {ref}")

    loss = jax.jit(discriminator_forward, static_argnums=(3, 4))(
        params, fake_img, None, top_blocks, blend_ratio)
    jax.block_until_ready(loss)
    assert loss.shape == ()
    print("KERNEL_OK")
</pallas_src>

<mosaic_0001>
module attributes {stable_mosaic.version = 11 : i64} {
  func.func @kernel(%arg0: memref<2x1x128xf32, #tpu.memory_space<vmem>>, %arg1: memref<1x8x1xf32, #tpu.memory_space<vmem>>, %arg2: memref<8x1xf32, #tpu.memory_space<vmem>>, %arg3: memref<3x16x8xf32, #tpu.memory_space<vmem>>, %arg4: memref<16x1xf32, #tpu.memory_space<vmem>>, %arg5: memref<3x16x16xf32, #tpu.memory_space<vmem>>, %arg6: memref<16x1xf32, #tpu.memory_space<vmem>>, %arg7: memref<1x16x1xf32, #tpu.memory_space<vmem>>, %arg8: memref<16x1xf32, #tpu.memory_space<vmem>>, %arg9: memref<3x32x16xf32, #tpu.memory_space<vmem>>, %arg10: memref<32x1xf32, #tpu.memory_space<vmem>>, %arg11: memref<3x32x32xf32, #tpu.memory_space<vmem>>, %arg12: memref<32x1xf32, #tpu.memory_space<vmem>>, %arg13: memref<3x32x33xf32, #tpu.memory_space<vmem>>, %arg14: memref<32x1xf32, #tpu.memory_space<vmem>>, %arg15: memref<32x32x32xf32, #tpu.memory_space<vmem>>, %arg16: memref<32x1xf32, #tpu.memory_space<vmem>>, %arg17: memref<1x1x32xf32, #tpu.memory_space<vmem>>, %arg18: memref<1x1xf32, #tpu.memory_space<vmem>>, %arg19: memref<1x2xf32, #tpu.memory_space<vmem>>) attributes {dimension_semantics = [], scalar_prefetch = 0 : i64, scratch_operands = 0 : i64, tpu.core_type = #tpu.core_type<tc>} {
    %c0 = arith.constant 0 : index
    %c0_0 = arith.constant 0 : index
    %c0_1 = arith.constant 0 : index
    %0 = vector.load %arg0[%c0, %c0_0, %c0_1] : memref<2x1x128xf32, #tpu.memory_space<vmem>>, vector<1x1x128xf32>
    %1 = vector.shape_cast %0 : vector<1x1x128xf32> to vector<1x128xf32>
    %c1 = arith.constant 1 : index
    %c0_2 = arith.constant 0 : index
    %c0_3 = arith.constant 0 : index
    %2 = vector.load %arg0[%c1, %c0_2, %c0_3] : memref<2x1x128xf32, #tpu.memory_space<vmem>>, vector<1x1x128xf32>
    %3 = vector.shape_cast %2 : vector<1x1x128xf32> to vector<1x128xf32>
    %c0_4 = arith.constant 0 : index
    %c0_5 = arith.constant 0 : index
    %c0_6 = arith.constant 0 : index
    %4 = vector.load %arg1[%c0_4, %c0_5, %c0_6] : memref<1x8x1xf32, #tpu.memory_space<vmem>>, vector<1x8x1xf32>
    %c0_7 = arith.constant 0 : index
    %c0_8 = arith.constant 0 : index
    %5 = vector.load %arg2[%c0_7, %c0_8] : memref<8x1xf32, #tpu.memory_space<vmem>>, vector<8x1xf32>
    %6 = vector.shape_cast %4 : vector<1x8x1xf32> to vector<8x1xf32>
    %7 = vector.broadcast %6 : vector<8x1xf32> to vector<8x128xf32>
    %8 = vector.broadcast %1 : vector<1x128xf32> to vector<8x128xf32>
    %9 = arith.mulf %7, %8 : vector<8x128xf32>
    %10 = vector.broadcast %5 : vector<8x1xf32> to vector<8x128xf32>
    %11 = arith.addf %9, %10 : vector<8x128xf32>
    %12 = vector.shape_cast %4 : vector<1x8x1xf32> to vector<8x1xf32>
    %13 = vector.broadcast %12 : vector<8x1xf32> to vector<8x128xf32>
    %14 = vector.broadcast %3 : vector<1x128xf32> to vector<8x128xf32>
    %15 = arith.mulf %13, %14 : vector<8x128xf32>
    %16 = vector.broadcast %5 : vector<8x1xf32> to vector<8x128xf32>
    %17 = arith.addf %15, %16 : vector<8x128xf32>
    %c0_9 = arith.constant 0 : index
    %c0_10 = arith.constant 0 : index
    %c0_11 = arith.constant 0 : index
    %18 = vector.load %arg3[%c0_9, %c0_10, %c0_11] : memref<3x16x8xf32, #tpu.memory_space<vmem>>, vector<3x16x8xf32>
    %c0_12 = arith.constant 0 : index
    %c0_13 = arith.constant 0 : index
    %19 = vector.load %arg4[%c0_12, %c0_13] : memref<16x1xf32, #tpu.memory_space<vmem>>, vector<16x1xf32>
    %cst = arith.constant 0.000000e+00 : f32
    %20 = vector.broadcast %cst : f32 to vector<8x1xf32>
    %21 = tpu.concatenate %20, %11, %20 in 1 : vector<8x1xf32>, vector<8x128xf32>, vector<8x1xf32> -> vector<8x130xf32>
    %22 = vector.extract_strided_slice %21 {offsets = [0, 0], sizes = [8, 128], strides = [1, 1]} : vector<8x130xf32> to vector<8x128xf32>
    %23 = vector.extract_strided_slice %18 {offsets = [0, 0, 0], sizes = [1, 16, 8], strides = [1, 1, 1]} : vector<3x16x8xf32> to vector<1x16x8xf32>
    %24 = vector.shape_cast %23 : vector<1x16x8xf32> to vector<16x8xf32>
    %cst_14 = arith.constant dense<0.000000e+00> : vector<16x128xf32>
    %25 = tpu.matmul %24, %22, %cst_14 {dimension_numbers = #tpu.dot_dimension_numbers<[1], [0], [0], [1], [0, 0, 1, 1], [], []>} : vector<16x8xf32>, vector<8x128xf32>, vector<16x128xf32> -> vector<16x128xf32>
    %26 = vector.extract_strided_slice %21 {offsets = [0, 1], sizes = [8, 128], strides = [1, 1]} : vector<8x130xf32> to vector<8x128xf32>
    %27 = vector.extract_strided_slice %18 {offsets = [1, 0, 0], sizes = [1, 16, 8], strides = [1, 1, 1]} : vector<3x16x8xf32> to vector<1x16x8xf32>
    %28 = vector.shape_cast %27 : vector<1x16x8xf32> to vector<16x8xf32>
    %cst_15 = arith.constant dense<0.000000e+00> : vector<16x128xf32>
    %29 = tpu.matmul %28, %26, %cst_15 {dimension_numbers = #tpu.dot_dimension_numbers<[1], [0], [0], [1], [0, 0, 1, 1], [], []>} : vector<16x8xf32>, vector<8x128xf32>, vector<16x128xf32> -> vector<16x128xf32>
    %30 = arith.addf %25, %29 : vector<16x128xf32>
    %31 = vector.extract_strided_slice %21 {offsets = [0, 2], sizes = [8, 128], strides = [1, 1]} : vector<8x130xf32> to vector<8x128xf32>
    %32 = vector.extract_strided_slice %18 {offsets = [2, 0, 0], sizes = [1, 16, 8], strides = [1, 1, 1]} : vector<3x16x8xf32> to vector<1x16x8xf32>
    %33 = vector.shape_cast %32 : vector<1x16x8xf32> to vector<16x8xf32>
    %cst_16 = arith.constant dense<0.000000e+00> : vector<16x128xf32>
    %34 = tpu.matmul %33, %31, %cst_16 {dimension_numbers = #tpu.dot_dimension_numbers<[1], [0], [0], [1], [0, 0, 1, 1], [], []>} : vector<16x8xf32>, vector<8x128xf32>, vector<16x128xf32> -> vector<16x128xf32>
    %35 = arith.addf %30, %34 : vector<16x128xf32>
    %36 = vector.broadcast %19 : vector<16x1xf32> to vector<16x128xf32>
    %37 = arith.addf %35, %36 : vector<16x128xf32>
    %cst_17 = arith.constant 2.000000e-01 : f32
    %38 = vector.broadcast %cst_17 : f32 to vector<16x128xf32>
    %39 = arith.mulf %38, %37 : vector<16x128xf32>
    %40 = arith.maximumf %37, %39 : vector<16x128xf32>
    %cst_18 = arith.constant 0.000000e+00 : f32
    %41 = vector.broadcast %cst_18 : f32 to vector<8x1xf32>
    %42 = tpu.concatenate %41, %17, %41 in 1 : vector<8x1xf32>, vector<8x128xf32>, vector<8x1xf32> -> vector<8x130xf32>
    %43 = vector.extract_strided_slice %42 {offsets = [0, 0], sizes = [8, 128], strides = [1, 1]} : vector<8x130xf32> to vector<8x128xf32>
    %44 = vector.extract_strided_slice %18 {offsets = [0, 0, 0], sizes = [1, 16, 8], strides = [1, 1, 1]} : vector<3x16x8xf32> to vector<1x16x8xf32>
    %45 = vector.shape_cast %44 : vector<1x16x8xf32> to vector<16x8xf32>
    %cst_19 = arith.constant dense<0.000000e+00> : vector<16x128xf32>
    %46 = tpu.matmul %45, %43, %cst_19 {dimension_numbers = #tpu.dot_dimension_numbers<[1], [0], [0], [1], [0, 0, 1, 1], [], []>} : vector<16x8xf32>, vector<8x128xf32>, vector<16x128xf32> -> vector<16x128xf32>
    %47 = vector.extract_strided_slice %42 {offsets = [0, 1], sizes = [8, 128], strides = [1, 1]} : vector<8x130xf32> to vector<8x128xf32>
    %48 = vector.extract_strided_slice %18 {offsets = [1, 0, 0], sizes = [1, 16, 8], strides = [1, 1, 1]} : vector<3x16x8xf32> to vector<1x16x8xf32>
    %49 = vector.shape_cast %48 : vector<1x16x8xf32> to vector<16x8xf32>
    %cst_20 = arith.constant dense<0.000000e+00> : vector<16x128xf32>
    %50 = tpu.matmul %49, %47, %cst_20 {dimension_numbers = #tpu.dot_dimension_numbers<[1], [0], [0], [1], [0, 0, 1, 1], [], []>} : vector<16x8xf32>, vector<8x128xf32>, vector<16x128xf32> -> vector<16x128xf32>
    %51 = arith.addf %46, %50 : vector<16x128xf32>
    %52 = vector.extract_strided_slice %42 {offsets = [0, 2], sizes = [8, 128], strides = [1, 1]} : vector<8x130xf32> to vector<8x128xf32>
    %53 = vector.extract_strided_slice %18 {offsets = [2, 0, 0], sizes = [1, 16, 8], strides = [1, 1, 1]} : vector<3x16x8xf32> to vector<1x16x8xf32>
    %54 = vector.shape_cast %53 : vector<1x16x8xf32> to vector<16x8xf32>
    %cst_21 = arith.constant dense<0.000000e+00> : vector<16x128xf32>
    %55 = tpu.matmul %54, %52, %cst_21 {dimension_numbers = #tpu.dot_dimension_numbers<[1], [0], [0], [1], [0, 0, 1, 1], [], []>} : vector<16x8xf32>, vector<8x128xf32>, vector<16x128xf32> -> vector<16x128xf32>
    %56 = arith.addf %51, %55 : vector<16x128xf32>
    %57 = vector.broadcast %19 : vector<16x1xf32> to vector<16x128xf32>
    %58 = arith.addf %56, %57 : vector<16x128xf32>
    %cst_22 = arith.constant 2.000000e-01 : f32
    %59 = vector.broadcast %cst_22 : f32 to vector<16x128xf32>
    %60 = arith.mulf %59, %58 : vector<16x128xf32>
    %61 = arith.maximumf %58, %60 : vector<16x128xf32>
    %c0_23 = arith.constant 0 : index
    %c0_24 = arith.constant 0 : index
    %c0_25 = arith.constant 0 : index
    %62 = vector.load %arg5[%c0_23, %c0_24, %c0_25] : memref<3x16x16xf32, #tpu.memory_space<vmem>>, vector<3x16x16xf32>
    %c0_26 = arith.constant 0 : index
    %c0_27 = arith.constant 0 : index
    %63 = vector.load %arg6[%c0_26, %c0_27] : memref<16x1xf32, #tpu.memory_space<vmem>>, vector<16x1xf32>
    %cst_28 = arith.constant 0.000000e+00 : f32
    %64 = vector.broadcast %cst_28 : f32 to vector<16x1xf32>
    %65 = tpu.concatenate %64, %40, %64 in 1 : vector<16x1xf32>, vector<16x128xf32>, vector<16x1xf32> -> vector<16x130xf32>
    %66 = vector.extract_strided_slice %65 {offsets = [0, 0], sizes = [16, 128], strides = [1, 1]} : vector<16x130xf32> to vector<16x128xf32>
    %67 = vector.extract_strided_slice %62 {offsets = [0, 0, 0], sizes = [1, 16, 16], strides = [1, 1, 1]} : vector<3x16x16xf32> to vector<1x16x16xf32>
    %68 = vector.shape_cast %67 : vector<1x16x16xf32> to vector<16x16xf32>
    %cst_29 = arith.constant dense<0.000000e+00> : vector<16x128xf32>
    %69 = tpu.matmul %68, %66, %cst_29 {dimension_numbers = #tpu.dot_dimension_numbers<[1], [0], [0], [1], [0, 0, 1, 1], [], []>} : vector<16x16xf32>, vector<16x128xf32>, vector<16x128xf32> -> vector<16x128xf32>
    %70 = vector.extract_strided_slice %65 {offsets = [0, 1], sizes = [16, 128], strides = [1, 1]} : vector<16x130xf32> to vector<16x128xf32>
    %71 = vector.extract_strided_slice %62 {offsets = [1, 0, 0], sizes = [1, 16, 16], strides = [1, 1, 1]} : vector<3x16x16xf32> to vector<1x16x16xf32>
    %72 = vector.shape_cast %71 : vector<1x16x16xf32> to vector<16x16xf32>
    %cst_30 = arith.constant dense<0.000000e+00> : vector<16x128xf32>
    %73 = tpu.matmul %72, %70, %cst_30 {dimension_numbers = #tpu.dot_dimension_numbers<[1], [0], [0], [1], [0, 0, 1, 1], [], []>} : vector<16x16xf32>, vector<16x128xf32>, vector<16x128xf32> -> vector<16x128xf32>
    %74 = arith.addf %69, %73 : vector<16x128xf32>
    %75 = vector.extract_strided_slice %65 {offsets = [0, 2], sizes = [16, 128], strides = [1, 1]} : vector<16x130xf32> to vector<16x128xf32>
    %76 = vector.extract_strided_slice %62 {offsets = [2, 0, 0], sizes = [1, 16, 16], strides = [1, 1, 1]} : vector<3x16x16xf32> to vector<1x16x16xf32>
    %77 = vector.shape_cast %76 : vector<1x16x16xf32> to vector<16x16xf32>
    %cst_31 = arith.constant dense<0.000000e+00> : vector<16x128xf32>
    %78 = tpu.matmul %77, %75, %cst_31 {dimension_numbers = #tpu.dot_dimension_numbers<[1], [0], [0], [1], [0, 0, 1, 1], [], []>} : vector<16x16xf32>, vector<16x128xf32>, vector<16x128xf32> -> vector<16x128xf32>
    %79 = arith.addf %74, %78 : vector<16x128xf32>
    %80 = tpu.iota {dimensions = array<i32: 0>} : vector<128x64xi32>
    %81 = tpu.iota {dimensions = array<i32: 1>} : vector<128x64xi32>
    %c2_i32 = arith.constant 2 : i32
    %82 = vector.broadcast %c2_i32 : i32 to vector<128x64xi32>
    %83 = arith.muli %82, %81 : vector<128x64xi32>
    %84 = arith.cmpi eq, %80, %83 : vector<128x64xi32>
    %85 = arith.extui %84 : vector<128x64xi1> to vector<128x64xi32>
    %86 = arith.sitofp %85 : vector<128x64xi32> to vector<128x64xf32>
    %cst_32 = arith.constant dense<0.000000e+00> : vector<16x64xf32>
    %87 = tpu.matmul %79, %86, %cst_32 {dimension_numbers = #tpu.dot_dimension_numbers<[1], [0], [0], [1], [0, 0, 1, 1], [], []>} : vector<16x128xf32>, vector<128x64xf32>, vector<16x64xf32> -> vector<16x64xf32>
    %88 = vector.broadcast %63 : vector<16x1xf32> to vector<16x64xf32>
    %89 = arith.addf %87, %88 : vector<16x64xf32>
    %cst_33 = arith.constant 2.000000e-01 : f32
    %90 = vector.broadcast %cst_33 : f32 to vector<16x64xf32>
    %91 = arith.mulf %90, %89 : vector<16x64xf32>
    %92 = arith.maximumf %89, %91 : vector<16x64xf32>
    %cst_34 = arith.constant 0.000000e+00 : f32
    %93 = vector.broadcast %cst_34 : f32 to vector<16x1xf32>
    %94 = tpu.concatenate %93, %61, %93 in 1 : vector<16x1xf32>, vector<16x128xf32>, vector<16x1xf32> -> vector<16x130xf32>
    %95 = vector.extract_strided_slice %94 {offsets = [0, 0], sizes = [16, 128], strides = [1, 1]} : vector<16x130xf32> to vector<16x128xf32>
    %96 = vector.extract_strided_slice %62 {offsets = [0, 0, 0], sizes = [1, 16, 16], strides = [1, 1, 1]} : vector<3x16x16xf32> to vector<1x16x16xf32>
    %97 = vector.shape_cast %96 : vector<1x16x16xf32> to vector<16x16xf32>
    %cst_35 = arith.constant dense<0.000000e+00> : vector<16x128xf32>
    %98 = tpu.matmul %97, %95, %cst_35 {dimension_numbers = #tpu.dot_dimension_numbers<[1], [0], [0], [1], [0, 0, 1, 1], [], []>} : vector<16x16xf32>, vector<16x128xf32>, vector<16x128xf32> -> vector<16x128xf32>
    %99 = vector.extract_strided_slice %94 {offsets = [0, 1], sizes = [16, 128], strides = [1, 1]} : vector<16x130xf32> to vector<16x128xf32>
    %100 = vector.extract_strided_slice %62 {offsets = [1, 0, 0], sizes = [1, 16, 16], strides = [1, 1, 1]} : vector<3x16x16xf32> to vector<1x16x16xf32>
    %101 = vector.shape_cast %100 : vector<1x16x16xf32> to vector<16x16xf32>
    %cst_36 = arith.constant dense<0.000000e+00> : vector<16x128xf32>
    %102 = tpu.matmul %101, %99, %cst_36 {dimension_numbers = #tpu.dot_dimension_numbers<[1], [0], [0], [1], [0, 0, 1, 1], [], []>} : vector<16x16xf32>, vector<16x128xf32>, vector<16x128xf32> -> vector<16x128xf32>
    %103 = arith.addf %98, %102 : vector<16x128xf32>
    %104 = vector.extract_strided_slice %94 {offsets = [0, 2], sizes = [16, 128], strides = [1, 1]} : vector<16x130xf32> to vector<16x128xf32>
    %105 = vector.extract_strided_slice %62 {offsets = [2, 0, 0], sizes = [1, 16, 16], strides = [1, 1, 1]} : vector<3x16x16xf32> to vector<1x16x16xf32>
    %106 = vector.shape_cast %105 : vector<1x16x16xf32> to vector<16x16xf32>
    %cst_37 = arith.constant dense<0.000000e+00> : vector<16x128xf32>
    %107 = tpu.matmul %106, %104, %cst_37 {dimension_numbers = #tpu.dot_dimension_numbers<[1], [0], [0], [1], [0, 0, 1, 1], [], []>} : vector<16x16xf32>, vector<16x128xf32>, vector<16x128xf32> -> vector<16x128xf32>
    %108 = arith.addf %103, %107 : vector<16x128xf32>
    %cst_38 = arith.constant dense<0.000000e+00> : vector<16x64xf32>
    %109 = tpu.matmul %108, %86, %cst_38 {dimension_numbers = #tpu.dot_dimension_numbers<[1], [0], [0], [1], [0, 0, 1, 1], [], []>} : vector<16x128xf32>, vector<128x64xf32>, vector<16x64xf32> -> vector<16x64xf32>
    %110 = vector.broadcast %63 : vector<16x1xf32> to vector<16x64xf32>
    %111 = arith.addf %109, %110 : vector<16x64xf32>
    %cst_39 = arith.constant 2.000000e-01 : f32
    %112 = vector.broadcast %cst_39 : f32 to vector<16x64xf32>
    %113 = arith.mulf %112, %111 : vector<16x64xf32>
    %114 = arith.maximumf %111, %113 : vector<16x64xf32>
    %c0_40 = arith.constant 0 : index
    %c0_41 = arith.constant 0 : index
    %c0_42 = arith.constant 0 : index
    %115 = vector.load %arg7[%c0_40, %c0_41, %c0_42] : memref<1x16x1xf32, #tpu.memory_space<vmem>>, vector<1x16x1xf32>
    %c0_43 = arith.constant 0 : index
    %c0_44 = arith.constant 0 : index
    %116 = vector.load %arg8[%c0_43, %c0_44] : memref<16x1xf32, #tpu.memory_space<vmem>>, vector<16x1xf32>
    %117 = tpu.iota {dimensions = array<i32: 0>} : vector<128x64xi32>
    %118 = tpu.iota {dimensions = array<i32: 1>} : vector<128x64xi32>
    %c2_i32_45 = arith.constant 2 : i32
    %119 = vector.broadcast %c2_i32_45 : i32 to vector<128x64xi32>
    %120 = arith.muli %119, %118 : vector<128x64xi32>
    %121 = arith.cmpi eq, %117, %120 : vector<128x64xi32>
    %c2_i32_46 = arith.constant 2 : i32
    %122 = vector.broadcast %c2_i32_46 : i32 to vector<128x64xi32>
    %123 = arith.muli %122, %118 : vector<128x64xi32>
    %c1_i32 = arith.constant 1 : i32
    %124 = vector.broadcast %c1_i32 : i32 to vector<128x64xi32>
    %125 = arith.addi %123, %124 : vector<128x64xi32>
    %126 = arith.cmpi eq, %117, %125 : vector<128x64xi32>
    %127 = arith.ori %121, %126 : vector<128x64xi1>
    %cst_47 = arith.constant 5.000000e-01 : f32
    %cst_48 = arith.constant 0.000000e+00 : f32
    %128 = vector.broadcast %cst_47 : f32 to vector<128x64xf32>
    %129 = vector.broadcast %cst_48 : f32 to vector<128x64xf32>
    %130 = arith.select %127, %128, %129 : vector<128x64xi1>, vector<128x64xf32>
    %cst_49 = arith.constant dense<0.000000e+00> : vector<1x64xf32>
    %131 = tpu.matmul %1, %130, %cst_49 {dimension_numbers = #tpu.dot_dimension_numbers<[1], [0], [0], [1], [0, 0, 1, 1], [], []>} : vector<1x128xf32>, vector<128x64xf32>, vector<1x64xf32> -> vector<1x64xf32>
    %cst_50 = arith.constant dense<0.000000e+00> : vector<1x64xf32>
    %132 = tpu.matmul %3, %130, %cst_50 {dimension_numbers = #tpu.dot_dimension_numbers<[1], [0], [0], [1], [0, 0, 1, 1], [], []>} : vector<1x128xf32>, vector<128x64xf32>, vector<1x64xf32> -> vector<1x64xf32>
    %133 = vector.shape_cast %115 : vector<1x16x1xf32> to vector<16x1xf32>
    %134 = vector.broadcast %133 : vector<16x1xf32> to vector<16x64xf32>
    %135 = vector.broadcast %131 : vector<1x64xf32> to vector<16x64xf32>
    %136 = arith.mulf %134, %135 : vector<16x64xf32>
    %137 = vector.broadcast %116 : vector<16x1xf32> to vector<16x64xf32>
    %138 = arith.addf %136, %137 : vector<16x64xf32>
    %139 = vector.shape_cast %115 : vector<1x16x1xf32> to vector<16x1xf32>
    %140 = vector.broadcast %139 : vector<16x1xf32> to vector<16x64xf32>
    %141 = vector.broadcast %132 : vector<1x64xf32> to vector<16x64xf32>
    %142 = arith.mulf %140, %141 : vector<16x64xf32>
    %143 = vector.broadcast %116 : vector<16x1xf32> to vector<16x64xf32>
    %144 = arith.addf %142, %143 : vector<16x64xf32>
    %cst_51 = arith.constant 0.699999988 : f32
    %145 = vector.broadcast %cst_51 : f32 to vector<16x64xf32>
    %146 = arith.mulf %145, %92 : vector<16x64xf32>
    %cst_52 = arith.constant 3.000000e-01 : f32
    %147 = vector.broadcast %cst_52 : f32 to vector<16x64xf32>
    %148 = arith.mulf %147, %138 : vector<16x64xf32>
    %149 = arith.addf %146, %148 : vector<16x64xf32>
    %cst_53 = arith.constant 0.699999988 : f32
    %150 = vector.broadcast %cst_53 : f32 to vector<16x64xf32>
    %151 = arith.mulf %150, %114 : vector<16x64xf32>
    %cst_54 = arith.constant 3.000000e-01 : f32
    %152 = vector.broadcast %cst_54 : f32 to vector<16x64xf32>
    %153 = arith.mulf %152, %144 : vector<16x64xf32>
    %154 = arith.addf %151, %153 : vector<16x64xf32>
    %c0_55 = arith.constant 0 : index
    %c0_56 = arith.constant 0 : index
    %c0_57 = arith.constant 0 : index
    %155 = vector.load %arg9[%c0_55, %c0_56, %c0_57] : memref<3x32x16xf32, #tpu.memory_space<vmem>>, vector<3x32x16xf32>
    %c0_58 = arith.constant 0 : index
    %c0_59 = arith.constant 0 : index
    %156 = vector.load %arg10[%c0_58, %c0_59] : memref<32x1xf32, #tpu.memory_space<vmem>>, vector<32x1xf32>
    %cst_60 = arith.constant 0.000000e+00 : f32
    %157 = vector.broadcast %cst_60 : f32 to vector<16x1xf32>
    %158 = tpu.concatenate %157, %149, %157 in 1 : vector<16x1xf32>, vector<16x64xf32>, vector<16x1xf32> -> vector<16x66xf32>
    %159 = vector.extract_strided_slice %158 {offsets = [0, 0], sizes = [16, 64], strides = [1, 1]} : vector<16x66xf32> to vector<16x64xf32>
    %160 = vector.extract_strided_slice %155 {offsets = [0, 0, 0], sizes = [1, 32, 16], strides = [1, 1, 1]} : vector<3x32x16xf32> to vector<1x32x16xf32>
    %161 = vector.shape_cast %160 : vector<1x32x16xf32> to vector<32x16xf32>
    %cst_61 = arith.constant dense<0.000000e+00> : vector<32x64xf32>
    %162 = tpu.matmul %161, %159, %cst_61 {dimension_numbers = #tpu.dot_dimension_numbers<[1], [0], [0], [1], [0, 0, 1, 1], [], []>} : vector<32x16xf32>, vector<16x64xf32>, vector<32x64xf32> -> vector<32x64xf32>
    %163 = vector.extract_strided_slice %158 {offsets = [0, 1], sizes = [16, 64], strides = [1, 1]} : vector<16x66xf32> to vector<16x64xf32>
    %164 = vector.extract_strided_slice %155 {offsets = [1, 0, 0], sizes = [1, 32, 16], strides = [1, 1, 1]} : vector<3x32x16xf32> to vector<1x32x16xf32>
    %165 = vector.shape_cast %164 : vector<1x32x16xf32> to vector<32x16xf32>
    %cst_62 = arith.constant dense<0.000000e+00> : vector<32x64xf32>
    %166 = tpu.matmul %165, %163, %cst_62 {dimension_numbers = #tpu.dot_dimension_numbers<[1], [0], [0], [1], [0, 0, 1, 1], [], []>} : vector<32x16xf32>, vector<16x64xf32>, vector<32x64xf32> -> vector<32x64xf32>
    %167 = arith.addf %162, %166 : vector<32x64xf32>
    %168 = vector.extract_strided_slice %158 {offsets = [0, 2], sizes = [16, 64], strides = [1, 1]} : vector<16x66xf32> to vector<16x64xf32>
    %169 = vector.extract_strided_slice %155 {offsets = [2, 0, 0], sizes = [1, 32, 16], strides = [1, 1, 1]} : vector<3x32x16xf32> to vector<1x32x16xf32>
    %170 = vector.shape_cast %169 : vector<1x32x16xf32> to vector<32x16xf32>
    %cst_63 = arith.constant dense<0.000000e+00> : vector<32x64xf32>
    %171 = tpu.matmul %170, %168, %cst_63 {dimension_numbers = #tpu.dot_dimension_numbers<[1], [0], [0], [1], [0, 0, 1, 1], [], []>} : vector<32x16xf32>, vector<16x64xf32>, vector<32x64xf32> -> vector<32x64xf32>
    %172 = arith.addf %167, %171 : vector<32x64xf32>
    %173 = vector.broadcast %156 : vector<32x1xf32> to vector<32x64xf32>
    %174 = arith.addf %172, %173 : vector<32x64xf32>
    %cst_64 = arith.constant 2.000000e-01 : f32
    %175 = vector.broadcast %cst_64 : f32 to vector<32x64xf32>
    %176 = arith.mulf %175, %174 : vector<32x64xf32>
    %177 = arith.maximumf %174, %176 : vector<32x64xf32>
    %cst_65 = arith.constant 0.000000e+00 : f32
    %178 = vector.broadcast %cst_65 : f32 to vector<16x1xf32>
    %179 = tpu.concatenate %178, %154, %178 in 1 : vector<16x1xf32>, vector<16x64xf32>, vector<16x1xf32> -> vector<16x66xf32>
    %180 = vector.extract_strided_slice %179 {offsets = [0, 0], sizes = [16, 64], strides = [1, 1]} : vector<16x66xf32> to vector<16x64xf32>
    %181 = vector.extract_strided_slice %155 {offsets = [0, 0, 0], sizes = [1, 32, 16], strides = [1, 1, 1]} : vector<3x32x16xf32> to vector<1x32x16xf32>
    %182 = vector.shape_cast %181 : vector<1x32x16xf32> to vector<32x16xf32>
    %cst_66 = arith.constant dense<0.000000e+00> : vector<32x64xf32>
    %183 = tpu.matmul %182, %180, %cst_66 {dimension_numbers = #tpu.dot_dimension_numbers<[1], [0], [0], [1], [0, 0, 1, 1], [], []>} : vector<32x16xf32>, vector<16x64xf32>, vector<32x64xf32> -> vector<32x64xf32>
    %184 = vector.extract_strided_slice %179 {offsets = [0, 1], sizes = [16, 64], strides = [1, 1]} : vector<16x66xf32> to vector<16x64xf32>
    %185 = vector.extract_strided_slice %155 {offsets = [1, 0, 0], sizes = [1, 32, 16], strides = [1, 1, 1]} : vector<3x32x16xf32> to vector<1x32x16xf32>
    %186 = vector.shape_cast %185 : vector<1x32x16xf32> to vector<32x16xf32>
    %cst_67 = arith.constant dense<0.000000e+00> : vector<32x64xf32>
    %187 = tpu.matmul %186, %184, %cst_67 {dimension_numbers = #tpu.dot_dimension_numbers<[1], [0], [0], [1], [0, 0, 1, 1], [], []>} : vector<32x16xf32>, vector<16x64xf32>, vector<32x64xf32> -> vector<32x64xf32>
    %188 = arith.addf %183, %187 : vector<32x64xf32>
    %189 = vector.extract_strided_slice %179 {offsets = [0, 2], sizes = [16, 64], strides = [1, 1]} : vector<16x66xf32> to vector<16x64xf32>
    %190 = vector.extract_strided_slice %155 {offsets = [2, 0, 0], sizes = [1, 32, 16], strides = [1, 1, 1]} : vector<3x32x16xf32> to vector<1x32x16xf32>
    %191 = vector.shape_cast %190 : vector<1x32x16xf32> to vector<32x16xf32>
    %cst_68 = arith.constant dense<0.000000e+00> : vector<32x64xf32>
    %192 = tpu.matmul %191, %189, %cst_68 {dimension_numbers = #tpu.dot_dimension_numbers<[1], [0], [0], [1], [0, 0, 1, 1], [], []>} : vector<32x16xf32>, vector<16x64xf32>, vector<32x64xf32> -> vector<32x64xf32>
    %193 = arith.addf %188, %192 : vector<32x64xf32>
    %194 = vector.broadcast %156 : vector<32x1xf32> to vector<32x64xf32>
    %195 = arith.addf %193, %194 : vector<32x64xf32>
    %cst_69 = arith.constant 2.000000e-01 : f32
    %196 = vector.broadcast %cst_69 : f32 to vector<32x64xf32>
    %197 = arith.mulf %196, %195 : vector<32x64xf32>
    %198 = arith.maximumf %195, %197 : vector<32x64xf32>
    %c0_70 = arith.constant 0 : index
    %c0_71 = arith.constant 0 : index
    %c0_72 = arith.constant 0 : index
    %199 = vector.load %arg11[%c0_70, %c0_71, %c0_72] : memref<3x32x32xf32, #tpu.memory_space<vmem>>, vector<3x32x32xf32>
    %c0_73 = arith.constant 0 : index
    %c0_74 = arith.constant 0 : index
    %200 = vector.load %arg12[%c0_73, %c0_74] : memref<32x1xf32, #tpu.memory_space<vmem>>, vector<32x1xf32>
    %cst_75 = arith.constant 0.000000e+00 : f32
    %201 = vector.broadcast %cst_75 : f32 to vector<32x1xf32>
    %202 = tpu.concatenate %201, %177, %201 in 1 : vector<32x1xf32>, vector<32x64xf32>, vector<32x1xf32> -> vector<32x66xf32>
    %203 = vector.extract_strided_slice %202 {offsets = [0, 0], sizes = [32, 64], strides = [1, 1]} : vector<32x66xf32> to vector<32x64xf32>
    %204 = vector.extract_strided_slice %199 {offsets = [0, 0, 0], sizes = [1, 32, 32], strides = [1, 1, 1]} : vector<3x32x32xf32> to vector<1x32x32xf32>
    %205 = vector.shape_cast %204 : vector<1x32x32xf32> to vector<32x32xf32>
    %cst_76 = arith.constant dense<0.000000e+00> : vector<32x64xf32>
    %206 = tpu.matmul %205, %203, %cst_76 {dimension_numbers = #tpu.dot_dimension_numbers<[1], [0], [0], [1], [0, 0, 1, 1], [], []>} : vector<32x32xf32>, vector<32x64xf32>, vector<32x64xf32> -> vector<32x64xf32>
    %207 = vector.extract_strided_slice %202 {offsets = [0, 1], sizes = [32, 64], strides = [1, 1]} : vector<32x66xf32> to vector<32x64xf32>
    %208 = vector.extract_strided_slice %199 {offsets = [1, 0, 0], sizes = [1, 32, 32], strides = [1, 1, 1]} : vector<3x32x32xf32> to vector<1x32x32xf32>
    %209 = vector.shape_cast %208 : vector<1x32x32xf32> to vector<32x32xf32>
    %cst_77 = arith.constant dense<0.000000e+00> : vector<32x64xf32>
    %210 = tpu.matmul %209, %207, %cst_77 {dimension_numbers = #tpu.dot_dimension_numbers<[1], [0], [0], [1], [0, 0, 1, 1], [], []>} : vector<32x32xf32>, vector<32x64xf32>, vector<32x64xf32> -> vector<32x64xf32>
    %211 = arith.addf %206, %210 : vector<32x64xf32>
    %212 = vector.extract_strided_slice %202 {offsets = [0, 2], sizes = [32, 64], strides = [1, 1]} : vector<32x66xf32> to vector<32x64xf32>
    %213 = vector.extract_strided_slice %199 {offsets = [2, 0, 0], sizes = [1, 32, 32], strides = [1, 1, 1]} : vector<3x32x32xf32> to vector<1x32x32xf32>
    %214 = vector.shape_cast %213 : vector<1x32x32xf32> to vector<32x32xf32>
    %cst_78 = arith.constant dense<0.000000e+00> : vector<32x64xf32>
    %215 = tpu.matmul %214, %212, %cst_78 {dimension_numbers = #tpu.dot_dimension_numbers<[1], [0], [0], [1], [0, 0, 1, 1], [], []>} : vector<32x32xf32>, vector<32x64xf32>, vector<32x64xf32> -> vector<32x64xf32>
    %216 = arith.addf %211, %215 : vector<32x64xf32>
    %217 = tpu.iota {dimensions = array<i32: 0>} : vector<64x32xi32>
    %218 = tpu.iota {dimensions = array<i32: 1>} : vector<64x32xi32>
    %c2_i32_79 = arith.constant 2 : i32
    %219 = vector.broadcast %c2_i32_79 : i32 to vector<64x32xi32>
    %220 = arith.muli %219, %218 : vector<64x32xi32>
    %221 = arith.cmpi eq, %217, %220 : vector<64x32xi32>
    %222 = arith.extui %221 : vector<64x32xi1> to vector<64x32xi32>
    %223 = arith.sitofp %222 : vector<64x32xi32> to vector<64x32xf32>
    %cst_80 = arith.constant dense<0.000000e+00> : vector<32x32xf32>
    %224 = tpu.matmul %216, %223, %cst_80 {dimension_numbers = #tpu.dot_dimension_numbers<[1], [0], [0], [1], [0, 0, 1, 1], [], []>} : vector<32x64xf32>, vector<64x32xf32>, vector<32x32xf32> -> vector<32x32xf32>
    %225 = vector.broadcast %200 : vector<32x1xf32> to vector<32x32xf32>
    %226 = arith.addf %224, %225 : vector<32x32xf32>
    %cst_81 = arith.constant 2.000000e-01 : f32
    %227 = vector.broadcast %cst_81 : f32 to vector<32x32xf32>
    %228 = arith.mulf %227, %226 : vector<32x32xf32>
    %229 = arith.maximumf %226, %228 : vector<32x32xf32>
    %cst_82 = arith.constant 0.000000e+00 : f32
    %230 = vector.broadcast %cst_82 : f32 to vector<32x1xf32>
    %231 = tpu.concatenate %230, %198, %230 in 1 : vector<32x1xf32>, vector<32x64xf32>, vector<32x1xf32> -> vector<32x66xf32>
    %232 = vector.extract_strided_slice %231 {offsets = [0, 0], sizes = [32, 64], strides = [1, 1]} : vector<32x66xf32> to vector<32x64xf32>
    %233 = vector.extract_strided_slice %199 {offsets = [0, 0, 0], sizes = [1, 32, 32], strides = [1, 1, 1]} : vector<3x32x32xf32> to vector<1x32x32xf32>
    %234 = vector.shape_cast %233 : vector<1x32x32xf32> to vector<32x32xf32>
    %cst_83 = arith.constant dense<0.000000e+00> : vector<32x64xf32>
    %235 = tpu.matmul %234, %232, %cst_83 {dimension_numbers = #tpu.dot_dimension_numbers<[1], [0], [0], [1], [0, 0, 1, 1], [], []>} : vector<32x32xf32>, vector<32x64xf32>, vector<32x64xf32> -> vector<32x64xf32>
    %236 = vector.extract_strided_slice %231 {offsets = [0, 1], sizes = [32, 64], strides = [1, 1]} : vector<32x66xf32> to vector<32x64xf32>
    %237 = vector.extract_strided_slice %199 {offsets = [1, 0, 0], sizes = [1, 32, 32], strides = [1, 1, 1]} : vector<3x32x32xf32> to vector<1x32x32xf32>
    %238 = vector.shape_cast %237 : vector<1x32x32xf32> to vector<32x32xf32>
    %cst_84 = arith.constant dense<0.000000e+00> : vector<32x64xf32>
    %239 = tpu.matmul %238, %236, %cst_84 {dimension_numbers = #tpu.dot_dimension_numbers<[1], [0], [0], [1], [0, 0, 1, 1], [], []>} : vector<32x32xf32>, vector<32x64xf32>, vector<32x64xf32> -> vector<32x64xf32>
    %240 = arith.addf %235, %239 : vector<32x64xf32>
    %241 = vector.extract_strided_slice %231 {offsets = [0, 2], sizes = [32, 64], strides = [1, 1]} : vector<32x66xf32> to vector<32x64xf32>
    %242 = vector.extract_strided_slice %199 {offsets = [2, 0, 0], sizes = [1, 32, 32], strides = [1, 1, 1]} : vector<3x32x32xf32> to vector<1x32x32xf32>
    %243 = vector.shape_cast %242 : vector<1x32x32xf32> to vector<32x32xf32>
    %cst_85 = arith.constant dense<0.000000e+00> : vector<32x64xf32>
    %244 = tpu.matmul %243, %241, %cst_85 {dimension_numbers = #tpu.dot_dimension_numbers<[1], [0], [0], [1], [0, 0, 1, 1], [], []>} : vector<32x32xf32>, vector<32x64xf32>, vector<32x64xf32> -> vector<32x64xf32>
    %245 = arith.addf %240, %244 : vector<32x64xf32>
    %cst_86 = arith.constant dense<0.000000e+00> : vector<32x32xf32>
    %246 = tpu.matmul %245, %223, %cst_86 {dimension_numbers = #tpu.dot_dimension_numbers<[1], [0], [0], [1], [0, 0, 1, 1], [], []>} : vector<32x64xf32>, vector<64x32xf32>, vector<32x32xf32> -> vector<32x32xf32>
    %247 = vector.broadcast %200 : vector<32x1xf32> to vector<32x32xf32>
    %248 = arith.addf %246, %247 : vector<32x32xf32>
    %cst_87 = arith.constant 2.000000e-01 : f32
    %249 = vector.broadcast %cst_87 : f32 to vector<32x32xf32>
    %250 = arith.mulf %249, %248 : vector<32x32xf32>
    %251 = arith.maximumf %248, %250 : vector<32x32xf32>
    %252 = arith.addf %229, %251 : vector<32x32xf32>
    %cst_88 = arith.constant 2.000000e+00 : f32
    %253 = vector.broadcast %cst_88 : f32 to vector<32x32xf32>
    %254 = arith.divf %252, %253 : vector<32x32xf32>
    %255 = arith.subf %229, %254 : vector<32x32xf32>
    %256 = arith.mulf %255, %255 : vector<32x32xf32>
    %257 = arith.subf %251, %254 : vector<32x32xf32>
    %258 = arith.mulf %257, %257 : vector<32x32xf32>
    %259 = arith.addf %256, %258 : vector<32x32xf32>
    %cst_89 = arith.constant 2.000000e+00 : f32
    %260 = vector.broadcast %cst_89 : f32 to vector<32x32xf32>
    %261 = arith.divf %259, %260 : vector<32x32xf32>
    %cst_90 = arith.constant 9.99999993E-9 : f32
    %262 = vector.broadcast %cst_90 : f32 to vector<32x32xf32>
    %263 = arith.addf %261, %262 : vector<32x32xf32>
    %264 = math.sqrt %263 : vector<32x32xf32>
    %cst_91 = arith.constant dense<0.000000e+00> : vector<32xf32>
    %265 = vector.multi_reduction <add>, %264, %cst_91 [0] : vector<32x32xf32> to vector<32xf32>
    %266 = vector.shape_cast %265 : vector<32xf32> to vector<1x32xf32>
    %cst_92 = arith.constant 3.200000e+01 : f32
    %267 = vector.broadcast %cst_92 : f32 to vector<1x32xf32>
    %268 = arith.divf %266, %267 : vector<1x32xf32>
    %cst_93 = arith.constant dense<0.000000e+00> : vector<1xf32>
    %269 = vector.multi_reduction <add>, %268, %cst_93 [1] : vector<1x32xf32> to vector<1xf32>
    %270 = vector.shape_cast %269 : vector<1xf32> to vector<1x1xf32>
    %cst_94 = arith.constant 3.200000e+01 : f32
    %271 = vector.broadcast %cst_94 : f32 to vector<1x1xf32>
    %272 = arith.divf %270, %271 : vector<1x1xf32>
    %273 = vector.shape_cast %272 : vector<1x1xf32> to vector<1x1xf32>
    %274 = vector.broadcast %273 : vector<1x1xf32> to vector<1x32xf32>
    %275 = tpu.concatenate %229, %274 in 0 : vector<32x32xf32>, vector<1x32xf32> -> vector<33x32xf32>
    %276 = tpu.concatenate %251, %274 in 0 : vector<32x32xf32>, vector<1x32xf32> -> vector<33x32xf32>
    %c0_95 = arith.constant 0 : index
    %c0_96 = arith.constant 0 : index
    %c0_97 = arith.constant 0 : index
    %277 = vector.load %arg13[%c0_95, %c0_96, %c0_97] : memref<3x32x33xf32, #tpu.memory_space<vmem>>, vector<3x32x33xf32>
    %c0_98 = arith.constant 0 : index
    %c0_99 = arith.constant 0 : index
    %278 = vector.load %arg14[%c0_98, %c0_99] : memref<32x1xf32, #tpu.memory_space<vmem>>, vector<32x1xf32>
    %cst_100 = arith.constant 0.000000e+00 : f32
    %279 = vector.broadcast %cst_100 : f32 to vector<33x1xf32>
    %280 = tpu.concatenate %279, %275, %279 in 1 : vector<33x1xf32>, vector<33x32xf32>, vector<33x1xf32> -> vector<33x34xf32>
    %281 = vector.extract_strided_slice %280 {offsets = [0, 0], sizes = [33, 32], strides = [1, 1]} : vector<33x34xf32> to vector<33x32xf32>
    %282 = vector.extract_strided_slice %277 {offsets = [0, 0, 0], sizes = [1, 32, 33], strides = [1, 1, 1]} : vector<3x32x33xf32> to vector<1x32x33xf32>
    %283 = vector.shape_cast %282 : vector<1x32x33xf32> to vector<32x33xf32>
    %cst_101 = arith.constant dense<0.000000e+00> : vector<32x32xf32>
    %284 = tpu.matmul %283, %281, %cst_101 {dimension_numbers = #tpu.dot_dimension_numbers<[1], [0], [0], [1], [0, 0, 1, 1], [], []>} : vector<32x33xf32>, vector<33x32xf32>, vector<32x32xf32> -> vector<32x32xf32>
    %285 = vector.extract_strided_slice %280 {offsets = [0, 1], sizes = [33, 32], strides = [1, 1]} : vector<33x34xf32> to vector<33x32xf32>
    %286 = vector.extract_strided_slice %277 {offsets = [1, 0, 0], sizes = [1, 32, 33], strides = [1, 1, 1]} : vector<3x32x33xf32> to vector<1x32x33xf32>
    %287 = vector.shape_cast %286 : vector<1x32x33xf32> to vector<32x33xf32>
    %cst_102 = arith.constant dense<0.000000e+00> : vector<32x32xf32>
    %288 = tpu.matmul %287, %285, %cst_102 {dimension_numbers = #tpu.dot_dimension_numbers<[1], [0], [0], [1], [0, 0, 1, 1], [], []>} : vector<32x33xf32>, vector<33x32xf32>, vector<32x32xf32> -> vector<32x32xf32>
    %289 = arith.addf %284, %288 : vector<32x32xf32>
    %290 = vector.extract_strided_slice %280 {offsets = [0, 2], sizes = [33, 32], strides = [1, 1]} : vector<33x34xf32> to vector<33x32xf32>
    %291 = vector.extract_strided_slice %277 {offsets = [2, 0, 0], sizes = [1, 32, 33], strides = [1, 1, 1]} : vector<3x32x33xf32> to vector<1x32x33xf32>
    %292 = vector.shape_cast %291 : vector<1x32x33xf32> to vector<32x33xf32>
    %cst_103 = arith.constant dense<0.000000e+00> : vector<32x32xf32>
    %293 = tpu.matmul %292, %290, %cst_103 {dimension_numbers = #tpu.dot_dimension_numbers<[1], [0], [0], [1], [0, 0, 1, 1], [], []>} : vector<32x33xf32>, vector<33x32xf32>, vector<32x32xf32> -> vector<32x32xf32>
    %294 = arith.addf %289, %293 : vector<32x32xf32>
    %295 = vector.broadcast %278 : vector<32x1xf32> to vector<32x32xf32>
    %296 = arith.addf %294, %295 : vector<32x32xf32>
    %cst_104 = arith.constant 2.000000e-01 : f32
    %297 = vector.broadcast %cst_104 : f32 to vector<32x32xf32>
    %298 = arith.mulf %297, %296 : vector<32x32xf32>
    %299 = arith.maximumf %296, %298 : vector<32x32xf32>
    %cst_105 = arith.constant 0.000000e+00 : f32
    %300 = vector.broadcast %cst_105 : f32 to vector<33x1xf32>
    %301 = tpu.concatenate %300, %276, %300 in 1 : vector<33x1xf32>, vector<33x32xf32>, vector<33x1xf32> -> vector<33x34xf32>
    %302 = vector.extract_strided_slice %301 {offsets = [0, 0], sizes = [33, 32], strides = [1, 1]} : vector<33x34xf32> to vector<33x32xf32>
    %303 = vector.extract_strided_slice %277 {offsets = [0, 0, 0], sizes = [1, 32, 33], strides = [1, 1, 1]} : vector<3x32x33xf32> to vector<1x32x33xf32>
    %304 = vector.shape_cast %303 : vector<1x32x33xf32> to vector<32x33xf32>
    %cst_106 = arith.constant dense<0.000000e+00> : vector<32x32xf32>
    %305 = tpu.matmul %304, %302, %cst_106 {dimension_numbers = #tpu.dot_dimension_numbers<[1], [0], [0], [1], [0, 0, 1, 1], [], []>} : vector<32x33xf32>, vector<33x32xf32>, vector<32x32xf32> -> vector<32x32xf32>
    %306 = vector.extract_strided_slice %301 {offsets = [0, 1], sizes = [33, 32], strides = [1, 1]} : vector<33x34xf32> to vector<33x32xf32>
    %307 = vector.extract_strided_slice %277 {offsets = [1, 0, 0], sizes = [1, 32, 33], strides = [1, 1, 1]} : vector<3x32x33xf32> to vector<1x32x33xf32>
    %308 = vector.shape_cast %307 : vector<1x32x33xf32> to vector<32x33xf32>
    %cst_107 = arith.constant dense<0.000000e+00> : vector<32x32xf32>
    %309 = tpu.matmul %308, %306, %cst_107 {dimension_numbers = #tpu.dot_dimension_numbers<[1], [0], [0], [1], [0, 0, 1, 1], [], []>} : vector<32x33xf32>, vector<33x32xf32>, vector<32x32xf32> -> vector<32x32xf32>
    %310 = arith.addf %305, %309 : vector<32x32xf32>
    %311 = vector.extract_strided_slice %301 {offsets = [0, 2], sizes = [33, 32], strides = [1, 1]} : vector<33x34xf32> to vector<33x32xf32>
    %312 = vector.extract_strided_slice %277 {offsets = [2, 0, 0], sizes = [1, 32, 33], strides = [1, 1, 1]} : vector<3x32x33xf32> to vector<1x32x33xf32>
    %313 = vector.shape_cast %312 : vector<1x32x33xf32> to vector<32x33xf32>
    %cst_108 = arith.constant dense<0.000000e+00> : vector<32x32xf32>
    %314 = tpu.matmul %313, %311, %cst_108 {dimension_numbers = #tpu.dot_dimension_numbers<[1], [0], [0], [1], [0, 0, 1, 1], [], []>} : vector<32x33xf32>, vector<33x32xf32>, vector<32x32xf32> -> vector<32x32xf32>
    %315 = arith.addf %310, %314 : vector<32x32xf32>
    %316 = vector.broadcast %278 : vector<32x1xf32> to vector<32x32xf32>
    %317 = arith.addf %315, %316 : vector<32x32xf32>
    %cst_109 = arith.constant 2.000000e-01 : f32
    %318 = vector.broadcast %cst_109 : f32 to vector<32x32xf32>
    %319 = arith.mulf %318, %317 : vector<32x32xf32>
    %320 = arith.maximumf %317, %319 : vector<32x32xf32>
    %c0_110 = arith.constant 0 : index
    %c0_111 = arith.constant 0 : index
    %c0_112 = arith.constant 0 : index
    %321 = vector.load %arg15[%c0_110, %c0_111, %c0_112] : memref<32x32x32xf32, #tpu.memory_space<vmem>>, vector<32x32x32xf32>
    %c0_113 = arith.constant 0 : index
    %c0_114 = arith.constant 0 : index
    %322 = vector.load %arg16[%c0_113, %c0_114] : memref<32x1xf32, #tpu.memory_space<vmem>>, vector<32x1xf32>
    %323 = vector.shape_cast %299 : vector<32x32xf32> to vector<1x32x32xf32>
    %324 = vector.broadcast %323 : vector<1x32x32xf32> to vector<32x32x32xf32>
    %325 = arith.mulf %321, %324 : vector<32x32x32xf32>
    %cst_115 = arith.constant dense<0.000000e+00> : vector<32x32xf32>
    %326 = vector.multi_reduction <add>, %325, %cst_115 [2] : vector<32x32x32xf32> to vector<32x32xf32>
    %cst_116 = arith.constant dense<0.000000e+00> : vector<32xf32>
    %327 = vector.multi_reduction <add>, %326, %cst_116 [1] : vector<32x32xf32> to vector<32xf32>
    %328 = vector.shape_cast %327 : vector<32xf32> to vector<32x1xf32>
    %329 = vector.shape_cast %320 : vector<32x32xf32> to vector<1x32x32xf32>
    %330 = vector.broadcast %329 : vector<1x32x32xf32> to vector<32x32x32xf32>
    %331 = arith.mulf %321, %330 : vector<32x32x32xf32>
    %cst_117 = arith.constant dense<0.000000e+00> : vector<32x32xf32>
    %332 = vector.multi_reduction <add>, %331, %cst_117 [2] : vector<32x32x32xf32> to vector<32x32xf32>
    %cst_118 = arith.constant dense<0.000000e+00> : vector<32xf32>
    %333 = vector.multi_reduction <add>, %332, %cst_118 [1] : vector<32x32xf32> to vector<32xf32>
    %334 = vector.shape_cast %333 : vector<32xf32> to vector<32x1xf32>
    %335 = tpu.concatenate %328, %334 in 1 : vector<32x1xf32>, vector<32x1xf32> -> vector<32x2xf32>
    %336 = vector.broadcast %322 : vector<32x1xf32> to vector<32x2xf32>
    %337 = arith.addf %335, %336 : vector<32x2xf32>
    %cst_119 = arith.constant 2.000000e-01 : f32
    %338 = vector.broadcast %cst_119 : f32 to vector<32x2xf32>
    %339 = arith.mulf %338, %337 : vector<32x2xf32>
    %340 = arith.maximumf %337, %339 : vector<32x2xf32>
    %c0_120 = arith.constant 0 : index
    %c0_121 = arith.constant 0 : index
    %c0_122 = arith.constant 0 : index
    %341 = vector.load %arg17[%c0_120, %c0_121, %c0_122] : memref<1x1x32xf32, #tpu.memory_space<vmem>>, vector<1x1x32xf32>
    %c0_123 = arith.constant 0 : index
    %c0_124 = arith.constant 0 : index
    %342 = vector.load %arg18[%c0_123, %c0_124] : memref<1x1xf32, #tpu.memory_space<vmem>>, vector<1x1xf32>
    %343 = vector.shape_cast %341 : vector<1x1x32xf32> to vector<1x32xf32>
    %cst_125 = arith.constant dense<0.000000e+00> : vector<1x2xf32>
    %344 = tpu.matmul %343, %340, %cst_125 {dimension_numbers = #tpu.dot_dimension_numbers<[1], [0], [0], [1], [0, 0, 1, 1], [], []>} : vector<1x32xf32>, vector<32x2xf32>, vector<1x2xf32> -> vector<1x2xf32>
    %345 = vector.broadcast %342 : vector<1x1xf32> to vector<1x2xf32>
    %346 = arith.addf %344, %345 : vector<1x2xf32>
    %c0_126 = arith.constant 0 : index
    %c0_127 = arith.constant 0 : index
    %347 = vector.load %arg19[%c0_126, %c0_127] : memref<1x2xf32, #tpu.memory_space<vmem>>, vector<1x2xf32>
    tpu.vector_store %arg19[%c0_126, %c0_127], %346 {strides = array<i32>} : memref<1x2xf32, #tpu.memory_space<vmem>>, vector<1x2xf32>,
    return
  }
}

</mosaic_0001>

<bundles_post_ra>
// kernel: tpu_custom_call.1
= control target key start
LH: loop header
LB: loop body
LE: loop exit
PB: predicated region body
PF: predicated region fallthrough
CT: control target
= control target key end

     0   :  { %s11746_s0 = inlined_call_operand.vmem [shape: f32[2,1,128], index: 0, kind: input, shape index: {}]   ;;  %s11747_s1 = inlined_call_operand.vmem [shape: f32[1,8,1], index: 1, kind: input, shape index: {}]   ;;  %s11748_s2 = inlined_call_operand.vmem [shape: f32[8,1], index: 2, kind: input, shape index: {}]   ;;  %s11749_s3 = inlined_call_operand.vmem [shape: f32[3,16,8], index: 3, kind: input, shape index: {}]   ;;  %s11750_s4 = inlined_call_operand.vmem [shape: f32[16,1], index: 4, kind: input, shape index: {}]   ;;  %s11751_s5 = inlined_call_operand.vmem [shape: f32[3,16,16], index: 5, kind: input, shape index: {}]   ;;  %s11752_s6 = inlined_call_operand.vmem [shape: f32[16,1], index: 6, kind: input, shape index: {}]   ;;  %s11753_s7 = inlined_call_operand.vmem [shape: f32[1,16,1], index: 7, kind: input, shape index: {}]   ;;  %s11754_s8 = inlined_call_operand.vmem [shape: f32[16,1], index: 8, kind: input, shape index: {}]   ;;  %s11755_s9 = inlined_call_operand.vmem [shape: f32[3,32,16], index: 9, kind: input, shape index: {}]   ;;  %s11756_s10 = inlined_call_operand.vmem [shape: f32[32,1], index: 10, kind: input, shape index: {}]   ;;  %s11757_s11 = inlined_call_operand.vmem [shape: f32[3,32,32], index: 11, kind: input, shape index: {}]   ;;  %s11758_s12 = inlined_call_operand.vmem [shape: f32[32,1], index: 12, kind: input, shape index: {}]   ;;  %s11759_s13 = inlined_call_operand.vmem [shape: f32[3,32,33], index: 13, kind: input, shape index: {}]   ;;  %s11760_s14 = inlined_call_operand.vmem [shape: f32[32,1], index: 14, kind: input, shape index: {}]   ;;  %s11761_s15 = inlined_call_operand.hbm [shape: f32[32,32,32], index: 15, kind: input, shape index: {}]   ;;  %s11762_s16 = inlined_call_operand.vmem [shape: f32[32,1], index: 16, kind: input, shape index: {}]   ;;  %s11763_s17 = inlined_call_operand.vmem [shape: f32[1,1,32], index: 17, kind: input, shape index: {}]   ;;  %s11764_s18 = inlined_call_operand.<no memory space> [shape: f32[1,1], index: 18, kind: input, shape index: {}]   ;;  %s11765_s19 = inlined_call_operand.hbm [shape: f32[1,2], index: 19, kind: output, shape index: {}]  }
   0x1   :  { %11815 = sst [smem:[#allocation65_spill]] %s11746_s0  ;;  %v24_v0 = vstv %s11764_s18 }
   0x2   :  { %11816 = sst [smem:[#allocation66_spill]] %s11747_s1  ;;  %25 = vst [vmem:[#allocation2] sm:$0x1] %v24_v0 }
   0x3   :  { %11817 = sst [smem:[#allocation67_spill]] %s11748_s2 }
   0x4   :  { %11818 = sst [smem:[#allocation68_spill]] %s11749_s3 }
   0x5   :  { %26 = vsyncpa [#allocation4], 0 }
   0x6   :  { %27 = vsyncpa [#allocation5], 0  ;;  %s8125_s20 = smov [#allocation3]  }
   0x7   :  { %s63_s21 = sshll.u32 %s8125_s20, 4  ;;  %s64_s21 = int_to_ptr.vmem [resolvable:$true] %s63_s21 }
   0x8   :  { %s8089_s1 = scalar_lea.vmem %s64_s21, 16384  ;;  %p8094_p1 = scmp.lt.s32.totalorder %s64_s21, %s64_s21 }
   0x9   :  { %p8090_p0 = scmp.ne.s32.totalorder %s64_s21, %s8089_s1  ;;  %p8095_p2 = scmp.lt.s32.totalorder %s8089_s1, %s8089_s1 }
   0xb   :  { %p8096_p3 = por %p8095_p2, %p8094_p1 }
   0xd   :  { %p8097_p4 = pnand %p8096_p3, %p8090_p0 }
   0xf   :  { %8100 = shalt.err (!%p8097_p4)
}
  0x10   :  { %s8126_s22 = smov 128   ;;  %s8127_s2 = smov 8  }
  0x11   :  { %69 = dma.hbm_to_vmem [thread:$0]  %s11761_s15, 16384, %s64_s21, [#allocation4], %s8126_s22, %s8126_s22, %s8127_s2  }
  0x12   :  { %8121 = dma.done.wait [#allocation4], 16384  }
  0x13   :  { %8122 = vsyncadd [#allocation4], 4294950912  ;;  %v8128_v1 = vmov 0   ;;  %s11819_s3 = sld [smem:[#allocation66_spill]]  ;;  %v90_v4 = vlaneseq  ;;  %s8129_s30 = smov 1   ;;  %vm134_vm0 = vcmask 64512  }
  0x14   :  { %7992 = vset.pattern.permute.xlu0 %v8128_v1  ;;  %7993 = vset.pattern.permute.xlu1 %v8128_v1  ;;  %s11820_s28 = sld [smem:[#allocation67_spill]]  ;;  %vm11768_vm1 = vcmask 7168   ;;  %s8131_s26 = smov 126   ;;  %v117_v23 = vld [vmem:[%s11750_s4 + $0x8] sm:$0xff]  ;;  %v116_v25 = vld [vmem:[%s11750_s4] sm:$0xff]  ;;  %vm11771_vm3 = vcmask 1039360  }
  0x15   :  { %v8250_v5 = vshrl.u32 %v90_v4, 7  ;;  %s11823_s0 = sld [smem:[#allocation65_spill]]  ;;  %vm8272_vm2 = vmneg %vm11768_vm1  ;;  %vm11769_vm4 = vcmask 1031168   ;;  %v8344_v1 = vld [vmem:[%s11751_s5 + $0x10] sm:$0xff]  ;;  %vm11770_vm5 = vcmask 130048  }
  0x16   :  { %s11824_s1 = sld [smem:[#allocation68_spill]] }
  0x17   :  { %11821 = vst [vmem:[#allocation9_spill] sm:$0xff] %v8250_v5  ;;  %v8253_v6 = vsub.s32 0, %v8250_v5 }
  0x19   :  { %v82_v2 = vld [vmem:[%s11819_s3] sm:$0xff]  ;;  %11822 = vst [vmem:[#allocation10_spill] sm:$0xff] %v8253_v6  ;;  %s8130_s3 = smov 127  }
  0x1a   :  { %86 = vperm.xlu0 %7992, %v82_v2   ;;  %v83_v3 = vld [vmem:[%s11820_s28] sm:$0xff] }
  0x1b   :  { %v8258_v7 = vld [vmem:[%s11823_s0] sm:$0x1]  ;;  %v8279_v16 = vld [vmem:[%s11823_s0 + $0x1] sm:$0x1] }
  0x1c   :  { %v93_v8 = vrot.slane %v8258_v7, %v8253_v6  ;;  %v112_v13 = vld [vmem:[%s11824_s1 + $0x10] sm:$0xff]  ;;  %v110_v14 = vld [vmem:[%s11824_s1] sm:$0xff]  ;;  %v111_v18 = vld [vmem:[%s11824_s1 + $0x8] sm:$0xff]  ;;  %v106_v21 = vrot.slane %v8279_v16, %v8253_v6 }
  0x1d   :  { %7475 = vmatprep.mubr.msk.f32.mxu0 %vm134_vm0, %v112_v13  ;;  %7480 = vmatprep.mubr.msk.f32.mxu1 %vm134_vm0, %v110_v14  ;;  %v113_v29 = vld [vmem:[%s11824_s1 + $0x18] sm:$0xff]  ;;  %v114_v30 = vld [vmem:[%s11824_s1 + $0x20] sm:$0xff]  ;;  %v115_v34 = vld [vmem:[%s11824_s1 + $0x28] sm:$0xff] }
  0x1e   :  { %98 = vperm.xlu0 %7992, %v83_v3   ;;  %v8349_v2 = vld [vmem:[%s11751_s5] sm:$0xff] }
  0x95   :  { %v87_v9 = vpop.permute.xlu0 %86 }
  0x96   :  { %v95_v10 = vmul.f32 %v93_v8, %v87_v9  ;;  %v108_v22 = vmul.f32 %v106_v21, %v87_v9 }
  0x99   :  { %v99_v11 = vpop.permute.xlu0 %98 }
  0x9a   :  { %v101_v12 = vadd.f32 %v99_v11, %v95_v10  ;;  %v109_v24 = vadd.f32 %v108_v22, %v99_v11 }
  0x9c   :  { %119 = vrot.lane.b32.xlu1 %v101_v12, %s8129_s30 }
 0x10e   :  { %v120_v17 = vpop.permute.xlu1 %119 }
 0x10f   :  { %7478 = vmatprep.subr.msk.mxu1 %vm8272_vm2, %v120_v17  ;;  %v124_v19 = vsel %vm11768_vm1, %v120_v17, 0.0  ;;  %v123_v20 = vsel %vm11768_vm1, 0.0, %v120_v17 }
 0x110   :  { %7479 = vmatpush3.msk.msra.mxu1 %vm8272_vm2, %v120_v17  ;;  %129 = vrot.lane.b32.xlu0 %v124_v19, %s8130_s3 }
 0x111   :  { %127 = vrot.lane.b32.xlu1 %v123_v20, %s8130_s3  ;;  %7481 = vmatmul.mubr.msk.f32.vlgmr.msra.gmra.mxu1 %vm134_vm0, %v111_v18 }
 0x112   :  { %7490 = vmatprep.mubr.msk.f32.mxu1 %vm134_vm0, %v112_v13 }
 0x114   :  { %299 = vrot.lane.b32.xlu0 %v124_v19, %s8131_s26  ;;  %v8368_v19 = vld [vmem:[%s11751_s5 + $0x8] sm:$0xff] }
 0x115   :  { %297 = vrot.lane.b32.xlu1 %v123_v20, %s8131_s26 }
 0x118   :  { %394 = vperm.xlu0 %7992, %v117_v23  }
 0x119   :  { %404 = vrot.lane.b32.xlu1 %v109_v24, %s8129_s30 }
 0x11d   :  { %389 = vperm.xlu1 %7993, %v116_v25  }
 0x182   :  { %v130_v26 = vpop.permute.xlu0 %129 }
 0x183   :  { %v128_v27 = vpop.permute.xlu1 %127 }
 0x184   :  { %v132_v28 = vsel %vm11771_vm3, %v128_v27, %v130_v26 }
 0x185   :  { %7473 = vmatprep.subr.mxu0 %v132_v28 }
 0x186   :  { %7474 = vmatpush3.msra.mxu0 %v132_v28  ;;  %v300_v31 = vpop.permute.xlu0 %299 }
 0x187   :  { %7476 = vmatmul.mubr.msk.f32.vlgmr.msra.gmra.mxu0 %vm134_vm0, %v113_v29  ;;  %v298_v32 = vpop.permute.xlu1 %297 }
 0x188   :  { %v302_v33 = vsel %vm11769_vm4, %v298_v32, %v300_v31  ;;  %7485 = vmatprep.mubr.msk.f32.mxu0 %vm134_vm0, %v114_v30 }
 0x189   :  { %7483 = vmatprep.subr.mxu0 %v302_v33 }
 0x18a   :  { %7484 = vmatpush3.msra.mxu0 %v302_v33 }
 0x18b   :  { %7486 = vmatmul.mubr.msk.f32.vlgmr.msra.gmra.mxu0 %vm134_vm0, %v115_v34  ;;  %v405_v35 = vpop.permute.xlu1 %404 }
 0x18c   :  { %7493 = vmatprep.subr.msk.mxu0 %vm8272_vm2, %v405_v35  ;;  %v408_v36 = vsel %vm11768_vm1, %v405_v35, 0.0  ;;  %v407_v37 = vsel %vm11768_vm1, 0.0, %v405_v35  ;;  %7495 = vmatprep.mubr.msk.f32.mxu0 %vm134_vm0, %v110_v14 }
 0x18d   :  { %7494 = vmatpush3.msk.msra.mxu0 %vm8272_vm2, %v405_v35  ;;  %413 = vrot.lane.b32.xlu1 %v408_v36, %s8130_s3 }
 0x18e   :  { %411 = vrot.lane.b32.xlu0 %v407_v37, %s8130_s3 }
 0x18f   :  { %7496 = vmatmul.mubr.msk.f32.vlgmr.msra.gmra.mxu0 %vm134_vm0, %v111_v18 }
 0x190   :  { %7507 = vmatprep.mubr.msk.f32.mxu0 %vm11770_vm5, %v8344_v1 }
 0x191   :  { %569 = vrot.lane.b32.xlu1 %v408_v36, %s8131_s26 }
 0x192   :  { %567 = vrot.lane.b32.xlu0 %v407_v37, %s8131_s26  ;;  %v8390_v37 = vld [vmem:[%s11751_s5 + $0x18] sm:$0xff] }
 0x193   :  { %v395_v39 = vpop.permute.xlu0 %394 }
 0x198   :  { %v8331_v38 = vpop.permute.xlu1 %389 }
 0x1d1   :  { %v7482_v46 = vpop.f32.mrf.mxu1 }
 0x1d3   :  { %v288_v49 = vpop.f32.mrf.mxu1 }
 0x1ff   :  { %v414_v40 = vpop.permute.xlu1 %413 }
 0x200   :  { %v412_v41 = vpop.permute.xlu0 %411 }
 0x201   :  { %v415_v42 = vsel %vm11771_vm3, %v412_v41, %v414_v40 }
 0x202   :  { %7488 = vmatprep.subr.mxu1 %v415_v42 }
 0x203   :  { %7489 = vmatpush3.msra.mxu1 %v415_v42  ;;  %v570_v43 = vpop.permute.xlu1 %569 }
 0x204   :  { %v568_v44 = vpop.permute.xlu0 %567  ;;  %7491 = vmatmul.mubr.msk.f32.vlgmr.msra.gmra.mxu1 %vm134_vm0, %v113_v29 }
 0x205   :  { %v571_v45 = vsel %vm11769_vm4, %v568_v44, %v570_v43  ;;  %7500 = vmatprep.mubr.msk.f32.mxu1 %vm134_vm0, %v114_v30  ;;  %v8406_v43 = vld [vmem:[%s11751_s5 + $0x28] sm:$0xff] }
 0x206   :  { %7498 = vmatprep.subr.mxu1 %v571_v45 }
 0x207   :  { %7499 = vmatpush3.msra.mxu1 %v571_v45 }
 0x208   :  { %7501 = vmatmul.mubr.msk.f32.vlgmr.msra.gmra.mxu1 %vm134_vm0, %v115_v34 }
 0x209   :  { %7514 = vmatprep.mubr.msk.f32.mxu1 %vm11770_vm5, %v8349_v2 }
 0x247   :  { %v7477_v47 = vpop.f32.mrf.mxu0 }
 0x248   :  { %v294_v50 = vadd.f32 %v7482_v46, %v7477_v47 }
 0x249   :  { %v207_v48 = vpop.f32.mrf.mxu0 }
 0x24a   :  { %v289_v52 = vadd.f32 %v288_v49, %v207_v48 }
 0x24b   :  { %v7487_v51 = vpop.f32.mrf.mxu0 }
 0x24c   :  { %v386_v53 = vadd.f32 %v7487_v51, %v294_v50  ;;  %v662_v50 = vld [vmem:[%s11752_s6] sm:$0xff]  ;;  %v663_v51 = vld [vmem:[%s11752_s6 + $0x8] sm:$0xff] }
 0x24d   :  { %v376_v54 = vpop.f32.mrf.mxu0 }
 0x24e   :  { %v398_v55 = vadd.f32 %v395_v39, %v386_v53  ;;  %v385_v56 = vadd.f32 %v376_v54, %v289_v52  ;;  %v1453_v52 = vld [vmem:[%s11753_s7] sm:$0xff]  ;;  %v1454_v53 = vld [vmem:[%s11753_s7 + $0x8] sm:$0xff]  ;;  %v8445_v54 = vadd.s32 120, %v8250_v5 }
 0x24f   :  { %v7497_v62 = vpop.f32.mrf.mxu0 }
 0x250   :  { %v400_v57 = vmul.f32 0.2, %v398_v55  ;;  %v397_v58 = vadd.f32 %v8331_v38, %v385_v56  ;;  %v8451_v56 = vadd.s32 112, %v8250_v5 }
 0x251   :  { %v558_v0 = vpop.f32.mrf.mxu0 }
 0x252   :  { %v399_v59 = vmul.f32 0.2, %v397_v58  ;;  %v402_v60 = vmax.f32 %v398_v55, %v400_v57  ;;  %v8448_v55 = vand.u32 127, %v90_v4  ;;  %v1455_v57 = vld [vmem:[%s11754_s8] sm:$0xff] }
 0x254   :  { %668 = vrot.lane.b32.xlu0 %v402_v60, %s8129_s30  ;;  %v401_v61 = vmax.f32 %v397_v58, %v399_v59  ;;  %11827 = vst [vmem:[#allocation11_spill] sm:$0xff] %v8448_v55  ;;  %v1456_v58 = vld [vmem:[%s11754_s8 + $0x8] sm:$0xff]  ;;  %v969_v59 = vmul.u32 2, %v8448_v55  ;;  %v8461_v60 = vadd.s32 104, %v8250_v5 }
 0x256   :  { %666 = vrot.lane.b32.xlu1 %v401_v61, %s8129_s30  ;;  %vm8464_vm6 = vcmp.eq.s32.totalorder %v8445_v54, %v969_v59  ;;  %vm8469_vm7 = vcmp.eq.s32.totalorder %v8451_v56, %v969_v59  ;;  %vm8483_vm8 = vcmp.eq.s32.totalorder %v8461_v60, %v969_v59 }
 0x2c4   :  { %v7492_v63 = vpop.f32.mrf.mxu1 }
 0x2c5   :  { %v564_v8 = vadd.f32 %v7497_v62, %v7492_v63  ;;  %v8474_v62 = vadd.s32 96, %v8250_v5  ;;  %v8132_v63 = vmov 1.0  }
 0x2c6   :  { %v483_v3 = vpop.f32.mrf.mxu1  ;;  %v669_v9 = vpop.permute.xlu0 %668 }
 0x2c7   :  { %v559_v10 = vadd.f32 %v558_v0, %v483_v3  ;;  %7510 = vmatprep.subr.msk.mxu1 %vm8272_vm2, %v669_v9  ;;  %v673_v11 = vsel %vm11768_vm1, 0.0, %v669_v9  ;;  %v675_v12 = vsel %vm11768_vm1, %v669_v9, 0.0  ;;  %vm8497_vm9 = vcmp.eq.s32.totalorder %v8474_v62, %v969_v59 }
 0x2c8   :  { %v7502_v13 = vpop.f32.mrf.mxu1  ;;  %684 = vrot.lane.b32.xlu0 %v673_v11, %s8130_s3  ;;  %686 = vrot.lane.b32.xlu1 %v675_v12, %s8130_s3  ;;  %v667_v14 = vpop.permute.xlu1 %666  ;;  %v11902_v0 = vmov 0  ;;  %v11908_v3 = vmov 0 }
 0x2c9   :  { %7511 = vmatpush3.msk.msra.mxu1 %vm8272_vm2, %v669_v9  ;;  %v649_v17 = vadd.f32 %v7502_v13, %v564_v8  ;;  %v674_v23 = vsel %vm11768_vm1, %v667_v14, 0.0  ;;  %v672_v24 = vsel %vm11768_vm1, 0.0, %v667_v14  ;;  %v8502_v8 = vadd.s32 80, %v8250_v5 }
 0x2ca   :  { %v639_v18 = vpop.f32.mrf.mxu1  ;;  %7512 = vmatprep.subr.msk.mxu1 %vm8272_vm2, %v667_v14 }
 0x2cb   :  { %v648_v20 = vadd.f32 %v639_v18, %v559_v10  ;;  %7513 = vmatpush3.msk.msra.mxu1 %vm8272_vm2, %v667_v14  ;;  %v651_v21 = vadd.f32 %v649_v17, %v395_v39  ;;  %v8516_v10 = vadd.s32 72, %v8250_v5  ;;  %vm8525_vm11 = vcmp.eq.s32.totalorder %v8502_v8, %v969_v59 }
 0x2cc   :  { %859 = vrot.lane.b32.xlu0 %v673_v11, %s8131_s26  ;;  %861 = vrot.lane.b32.xlu1 %v675_v12, %s8131_s26  ;;  %v8530_v12 = vadd.s32 64, %v8250_v5  ;;  %v8544_v14 = vadd.s32 56, %v8250_v5  ;;  %v8558_v18 = vadd.s32 48, %v8250_v5 }
 0x2cd   :  { %7515 = vmatmul.mubr.msk.f32.vlgmr.msra.gmra.mxu1 %vm11770_vm5, %v8368_v19  ;;  %v650_v22 = vadd.f32 %v648_v20, %v8331_v38  ;;  %v653_v25 = vmul.f32 0.2, %v651_v21  ;;  %v8395_v38 = vld [vmem:[%s11751_s5 + $0x20] sm:$0xff]  ;;  %7524 = vmatprep.subr.msk.mxu1 %vm8464_vm6, %v8132_v63  ;;  %vm8539_vm12 = vcmp.eq.s32.totalorder %v8516_v10, %v969_v59  ;;  %v11844_v20 = vmov 0 }
 0x2ce   :  { %7525 = vmatpush3.msk.msra.mxu1 %vm8464_vm6, %v8132_v63  ;;  %vm8553_vm13 = vcmp.eq.s32.totalorder %v8530_v12, %v969_v59  ;;  %vm8567_vm14 = vcmp.eq.s32.totalorder %v8544_v14, %v969_v59  ;;  %vm8581_vm15 = vcmp.eq.s32.totalorder %v8558_v18, %v969_v59 }
 0x2cf   :  { %v652_v26 = vmul.f32 0.2, %v650_v22  ;;  %v655_v28 = vmax.f32 %v651_v21, %v653_v25  ;;  %7526 = vmatprep.subr.msk.mxu1 %vm8469_vm7, %v8132_v63  ;;  %v11845_v20 = vsel %vm8567_vm14, 4294967295, %v11844_v20  ;;  %v8572_v21 = vadd.s32 40, %v8250_v5 }
 0x2d0   :  { %682 = vrot.lane.b32.xlu1 %v674_v23, %s8130_s3  ;;  %680 = vrot.lane.b32.xlu0 %v672_v24, %s8130_s3  ;;  %v11850_v25 = vmov 0 }
 0x2d1   :  { %v654_v27 = vmax.f32 %v650_v22, %v652_v26  ;;  %7527 = vmatpush3.msk.msra.mxu1 %vm8469_vm7, %v8132_v63  ;;  %v11846_v22 = vmov 0  ;;  %vm8595_vm0 = vcmp.eq.s32.totalorder %v8572_v21, %v969_v59  ;;  %v8623_v26 = vadd.s32 24, %v8250_v5 }
 0x2d2   :  { %7528 = vmatprep.subr.msk.mxu1 %vm8483_vm8, %v8132_v63  ;;  %v11847_v22 = vsel %vm8581_vm15, 4294967295, %v11846_v22 }
 0x2d3   :  { %7529 = vmatpush3.msk.msra.mxu1 %vm8483_vm8, %v8132_v63 }
 0x2d4   :  { %857 = vrot.lane.b32.xlu1 %v674_v23, %s8131_s26  ;;  %855 = vrot.lane.b32.xlu0 %v672_v24, %s8131_s26  ;;  %v8586_v23 = vadd.s32 32, %v8250_v5  ;;  %v11848_v24 = vmov 0 }
 0x2d5   :  { %7530 = vmatprep.subr.msk.mxu1 %vm8497_vm9, %v8132_v63  ;;  %v11849_v24 = vsel %vm8595_vm0, 4294967295, %v11848_v24 }
 0x2d6   :  { %7531 = vmatpush3.msk.msra.mxu1 %vm8497_vm9, %v8132_v63 }
 0x2d8   :  { %1109 = vrot.lane.b32.xlu1 %v654_v27, %s8129_s30  ;;  %1111 = vrot.lane.b32.xlu0 %v655_v28, %s8129_s30  ;;  %v11852_v27 = vmov 0  ;;  %v8631_v28 = vadd.s32 16, %v8250_v5 }
 0x33a   :  { %v685_v29 = vpop.permute.xlu0 %684  ;;  %v687_v30 = vpop.permute.xlu1 %686 }
 0x33b   :  { %v689_v31 = vsel %vm11771_vm3, %v685_v29, %v687_v30  ;;  %v11854_v29 = vmov 0  ;;  %v8645_v30 = vadd.s32 8, %v8250_v5 }
 0x33c   :  { %7503 = vmatprep.subr.mxu0 %v689_v31 }
 0x33d   :  { %7504 = vmatpush3.msra.mxu0 %v689_v31  ;;  %v11856_v31 = vmov 0 }
 0x33e   :  { %v860_v32 = vpop.permute.xlu0 %859  ;;  %v862_v33 = vpop.permute.xlu1 %861 }
 0x33f   :  { %v864_v39 = vsel %vm11769_vm4, %v860_v32, %v862_v33  ;;  %v11858_v32 = vmov 0  ;;  %v8669_v33 = vadd.s32 1, %v969_v59 }
 0x342   :  { %v681_v34 = vpop.permute.xlu0 %680  ;;  %v683_v35 = vpop.permute.xlu1 %682 }
 0x343   :  { %v688_v36 = vsel %vm11771_vm3, %v681_v34, %v683_v35  ;;  %vm8654_vm3 = vcmp.eq.s32.totalorder %v8645_v30, %v969_v59  ;;  %v11802_v34 = vmov 0.0  }
 0x344   :  { %7505 = vmatprep.subr.mxu0 %v688_v36  ;;  %v11857_v31 = vsel %vm8654_vm3, 4294967295, %v11856_v31 }
 0x345   :  { %7506 = vmatpush3.msra.mxu0 %v688_v36 }
 0x346   :  { %v856_v40 = vpop.permute.xlu0 %855  ;;  %7508 = vmatmul.mubr.msk.f32.vlgmr.msra.gmra.mxu0 %vm11770_vm5, %v8390_v37  ;;  %7517 = vmatprep.subr.mxu0 %v864_v39  ;;  %v858_v41 = vpop.permute.xlu1 %857 }
 0x347   :  { %7518 = vmatpush3.msra.mxu0 %v864_v39  ;;  %v863_v42 = vsel %vm11769_vm4, %v856_v40, %v858_v41  ;;  %7521 = vmatprep.mubr.msk.f32.mxu0 %vm11770_vm5, %v8395_v38  ;;  %vm8626_vm4 = vcmp.eq.s32.totalorder %v8623_v26, %v969_v59 }
 0x348   :  { %7519 = vmatprep.subr.mxu0 %v863_v42  ;;  %v11853_v27 = vsel %vm8626_vm4, 4294967295, %v11852_v27 }
 0x349   :  { %7520 = vmatpush3.msra.mxu0 %v863_v42 }
 0x34a   :  { %v8408_v44 = vpop.permute.xlu0 %1111  ;;  %7522 = vmatmul.mubr.msk.f32.vlgmr.msra.gmra.mxu0 %vm11770_vm5, %v8406_v43  ;;  %v8418_v47 = vpop.permute.xlu1 %1109 }
 0x34b   :  { %v1118_v45 = vsel %vm11768_vm1, %v8408_v44, 0.0  ;;  %v1116_v46 = vsel %vm11768_vm1, 0.0, %v8408_v44  ;;  %7563 = vmatprep.mubr.msk.f32.mxu0 %vm11770_vm5, %v8344_v1  ;;  %v1117_v48 = vsel %vm11768_vm1, %v8418_v47, 0.0  ;;  %v1115_v49 = vsel %vm11768_vm1, 0.0, %v8418_v47 }
 0x34c   :  { %1129 = vrot.lane.b32.xlu1 %v1118_v45, %s8130_s3  ;;  %1127 = vrot.lane.b32.xlu0 %v1116_v46, %s8130_s3  ;;  %v8488_v1 = vadd.s32 88, %v8250_v5  ;;  %vm8606_vm1 = vcmp.eq.s32.totalorder %v8586_v23, %v969_v59  ;;  %vm8640_vm5 = vcmp.eq.s32.totalorder %v8631_v28, %v969_v59 }
 0x34d   :  { %v11851_v25 = vsel %vm8606_vm1, 4294967295, %v11850_v25  ;;  %v11855_v29 = vsel %vm8640_vm5, 4294967295, %v11854_v29 }
 0x34e   :  { %vm8511_vm10 = vcmp.eq.s32.totalorder %v8488_v1, %v969_v59 }
 0x34f   :  { %7532 = vmatprep.subr.msk.mxu1 %vm8511_vm10, %v8132_v63 }
 0x350   :  { %1125 = vrot.lane.b32.xlu1 %v1117_v48, %s8130_s3  ;;  %1123 = vrot.lane.b32.xlu0 %v1115_v49, %s8130_s3 }
 0x351   :  { %7533 = vmatpush3.msk.msra.mxu1 %vm8511_vm10, %v8132_v63 }
 0x352   :  { %7534 = vmatprep.subr.msk.mxu1 %vm8525_vm11, %v8132_v63 }
 0x353   :  { %7535 = vmatpush3.msk.msra.mxu1 %vm8525_vm11, %v8132_v63 }
 0x354   :  { %1291 = vrot.lane.b32.xlu1 %v1118_v45, %s8131_s26  ;;  %1289 = vrot.lane.b32.xlu0 %v1116_v46, %s8131_s26 }
 0x355   :  { %7536 = vmatprep.subr.msk.mxu1 %vm8539_vm12, %v8132_v63 }
 0x356   :  { %7537 = vmatpush3.msk.msra.mxu1 %vm8539_vm12, %v8132_v63 }
 0x357   :  { %7538 = vmatprep.subr.msk.mxu1 %vm8553_vm13, %v8132_v63 }
 0x358   :  { %1287 = vrot.lane.b32.xlu1 %v1117_v48, %s8131_s26  ;;  %1285 = vrot.lane.b32.xlu0 %v1115_v49, %s8131_s26 }
 0x359   :  { %7539 = vmatpush3.msk.msra.mxu1 %vm8553_vm13, %v8132_v63 }
 0x35a   :  { %7540 = vmatprep.subr.msk.mxu1 %vm8567_vm14, %v8132_v63 }
 0x35b   :  { %7541 = vmatpush3.msk.msra.mxu1 %vm8567_vm14, %v8132_v63 }
 0x35c   :  { %1020 = vperm.xlu1 %7993, %v662_v50   ;;  %1025 = vperm.xlu0 %7992, %v663_v51  }
 0x35d   :  { %7542 = vmatprep.subr.msk.mxu1 %vm8581_vm15, %v8132_v63 }
 0x35e   :  { %7543 = vmatpush3.msk.msra.mxu1 %vm8581_vm15, %v8132_v63 }
 0x35f   :  { %7544 = vmatprep.subr.msk.mxu1 %vm8595_vm0, %v8132_v63 }
 0x360   :  { %1648 = vperm.xlu1 %7993, %v1453_v52   ;;  %1653 = vperm.xlu0 %7992, %v1454_v53  }
 0x361   :  { %7545 = vmatpush3.msk.msra.mxu1 %vm8595_vm0, %v8132_v63 }
 0x362   :  { %7546 = vmatprep.subr.msk.mxu1 %vm8606_vm1, %v8132_v63 }
 0x363   :  { %7547 = vmatpush3.msk.msra.mxu1 %vm8606_vm1, %v8132_v63 }
 0x364   :  { %1664 = vperm.xlu1 %7993, %v1455_v57   ;;  %1669 = vperm.xlu0 %7992, %v1456_v58  }
 0x365   :  { %7548 = vmatprep.subr.msk.mxu1 %vm8626_vm4, %v8132_v63 }
 0x366   :  { %7549 = vmatpush3.msk.msra.mxu1 %vm8626_vm4, %v8132_v63  ;;  %vm8665_vm4 = vcmp.eq.s32.totalorder %v8250_v5, %v969_v59  ;;  %v8134_v59 = vmov 0.5  }
 0x367   :  { %7550 = vmatprep.subr.msk.mxu1 %vm8640_vm5, %v8132_v63  ;;  %v11859_v32 = vsel %vm8665_vm4, 4294967295, %v11858_v32 }
 0x368   :  { %7551 = vmatpush3.msk.msra.mxu1 %vm8640_vm5, %v8132_v63 }
 0x369   :  { %7552 = vmatprep.subr.msk.mxu1 %vm8654_vm3, %v8132_v63 }
 0x36a   :  { %7553 = vmatpush3.msk.msra.mxu1 %vm8654_vm3, %v8132_v63  ;;  %vm11860_vm3 = vcmask 1039360  }
 0x36b   :  { %7554 = vmatprep.subr.msk.mxu1 %vm8665_vm4, %v8132_v63  ;;  %vm11861_vm0 = vmmov %vm11860_vm3 }
 0x36c   :  { %7555 = vmatpush3.msk.msra.mxu1 %vm8665_vm4, %v8132_v63  ;;  %vm11862_vm4 = vcmask 130048  }
 0x36d   :  { %7615 = vmatprep.subr.mxu1 %v11802_v34 }
 0x38d   :  { %v7516_v15 = vpop.f32.mrf.mxu1 }
 0x3be   :  { %v1128_v35 = vpop.permute.xlu0 %1127  ;;  %v1130_v36 = vpop.permute.xlu1 %1129 }
 0x3bf   :  { %v1132_v39 = vsel %vm11860_vm3, %v1128_v35, %v1130_v36  ;;  %vm11863_vm3 = vmmov %vm11862_vm4 }
 0x3c0   :  { %7559 = vmatprep.subr.mxu0 %v1132_v39 }
 0x3c1   :  { %7560 = vmatpush3.msra.mxu0 %v1132_v39 }
 0x3c2   :  { %v1124_v40 = vpop.permute.xlu0 %1123  ;;  %v1126_v41 = vpop.permute.xlu1 %1125 }
 0x3c3   :  { %v1131_v42 = vsel %vm11861_vm0, %v1124_v40, %v1126_v41  ;;  %vm11865_vm0 = vmmov %vm11863_vm3 }
 0x3c4   :  { %7561 = vmatprep.subr.mxu0 %v1131_v42  ;;  %vm11868_vm5 = vmmov %vm11865_vm0 }
 0x3c5   :  { %7562 = vmatpush3.msra.mxu0 %v1131_v42 }
 0x3c6   :  { %v1290_v45 = vpop.permute.xlu0 %1289  ;;  %7564 = vmatmul.mubr.msk.f32.vlgmr.msra.gmra.mxu0 %vm11862_vm4, %v8390_v37  ;;  %7566 = vmatprep.subr.msk.mxu0 %vm8272_vm2, %v8408_v44  ;;  %v1292_v46 = vpop.permute.xlu1 %1291  ;;  %vm11864_vm4 = vcmask 1031168  }
 0x3c7   :  { %7567 = vmatpush3.msk.msra.mxu0 %vm8272_vm2, %v8408_v44  ;;  %7570 = vmatprep.mubr.msk.f32.mxu0 %vm11863_vm3, %v8349_v2  ;;  %v1294_v37 = vsel %vm11864_vm4, %v1290_v45, %v1292_v46  ;;  %vm11866_vm14 = vmmov %vm11864_vm4 }
 0x3c8   :  { %7568 = vmatprep.subr.msk.mxu0 %vm8272_vm2, %v8418_v47  ;;  %vm11867_vm3 = vmmov %vm11865_vm0 }
 0x3c9   :  { %7569 = vmatpush3.msk.msra.mxu0 %vm8272_vm2, %v8418_v47  ;;  %vm11869_vm2 = vnez %v11845_v20  ;;  %vm11872_vm4 = vmmov %vm8606_vm1  ;;  %vm11876_vm1 = vnez %v11859_v32 }
 0x3ca   :  { %v1286_v48 = vpop.permute.xlu0 %1285  ;;  %7571 = vmatmul.mubr.msk.f32.vlgmr.msra.gmra.mxu0 %vm11865_vm0, %v8368_v19  ;;  %7573 = vmatprep.subr.mxu0 %v1294_v37  ;;  %v1288_v49 = vpop.permute.xlu1 %1287  ;;  %vm11873_vm0 = vnez %v11853_v27 }
 0x3cb   :  { %7574 = vmatpush3.msra.mxu0 %v1294_v37  ;;  %v1293_v44 = vsel %vm11866_vm14, %v1286_v48, %v1288_v49  ;;  %7577 = vmatprep.mubr.msk.f32.mxu0 %vm11867_vm3, %v8395_v38  ;;  %vm11871_vm14 = vnez %v11849_v24  ;;  %vm11874_vm3 = vnez %v11855_v29  ;;  %v846_v38 = vpop.f32.mrf.mxu1 }
 0x3cc   :  { %7575 = vmatprep.subr.mxu0 %v1293_v44 }
 0x3cd   :  { %7576 = vmatpush3.msra.mxu0 %v1293_v44 }
 0x3ce   :  { %7578 = vmatmul.mubr.msk.f32.vlgmr.msra.gmra.mxu0 %vm11868_vm5, %v8406_v43  ;;  %7580 = vmatprep.subr.msk.mxu0 %vm8464_vm6, %v8132_v63  ;;  %vm11870_vm5 = vmmov %vm8581_vm15  ;;  %vm11875_vm15 = vnez %v11857_v31 }
 0x3cf   :  { %7581 = vmatpush3.msk.msra.mxu0 %vm8464_vm6, %v8132_v63 }
 0x3d0   :  { %7582 = vmatprep.subr.msk.mxu0 %vm8469_vm7, %v8132_v63 }
 0x3d1   :  { %7583 = vmatpush3.msk.msra.mxu0 %vm8469_vm7, %v8132_v63 }
 0x3d2   :  { %7584 = vmatprep.subr.msk.mxu0 %vm8483_vm8, %v8132_v63 }
 0x3d3   :  { %7585 = vmatpush3.msk.msra.mxu0 %vm8483_vm8, %v8132_v63 }
 0x3d4   :  { %7586 = vmatprep.subr.msk.mxu0 %vm8497_vm9, %v8132_v63 }
 0x3d5   :  { %7587 = vmatpush3.msk.msra.mxu0 %vm8497_vm9, %v8132_v63 }
 0x3d6   :  { %7588 = vmatprep.subr.msk.mxu0 %vm8511_vm10, %v8132_v63 }
 0x3d7   :  { %7589 = vmatpush3.msk.msra.mxu0 %vm8511_vm10, %v8132_v63  ;;  %v1026_v35 = vpop.permute.xlu0 %1025  ;;  %v1021_v36 = vpop.permute.xlu1 %1020 }
 0x3d8   :  { %7590 = vmatprep.subr.msk.mxu0 %vm8525_vm11, %v8132_v63 }
 0x3d9   :  { %7591 = vmatpush3.msk.msra.mxu0 %vm8525_vm11, %v8132_v63 }
 0x3da   :  { %7592 = vmatprep.subr.msk.mxu0 %vm8539_vm12, %v8132_v63 }
 0x3db   :  { %7593 = vmatpush3.msk.msra.mxu0 %vm8539_vm12, %v8132_v63  ;;  %v1654_v42 = vpop.permute.xlu0 %1653  ;;  %v1649_v45 = vpop.permute.xlu1 %1648 }
 0x3dc   :  { %7594 = vmatprep.subr.msk.mxu0 %vm8553_vm13, %v8132_v63 }
 0x3dd   :  { %7595 = vmatpush3.msk.msra.mxu0 %vm8553_vm13, %v8132_v63 }
 0x3de   :  { %7596 = vmatprep.subr.msk.mxu0 %vm11869_vm2, %v8132_v63 }
 0x3df   :  { %7597 = vmatpush3.msk.msra.mxu0 %vm11869_vm2, %v8132_v63 }
 0x3e0   :  { %7598 = vmatprep.subr.msk.mxu0 %vm11870_vm5, %v8132_v63 }
 0x3e1   :  { %7599 = vmatpush3.msk.msra.mxu0 %vm11870_vm5, %v8132_v63 }
 0x3e2   :  { %7600 = vmatprep.subr.msk.mxu0 %vm11871_vm14, %v8132_v63 }
 0x3e3   :  { %7601 = vmatpush3.msk.msra.mxu0 %vm11871_vm14, %v8132_v63 }
 0x3e4   :  { %7602 = vmatprep.subr.msk.mxu0 %vm11872_vm4, %v8132_v63 }
 0x3e5   :  { %7603 = vmatpush3.msk.msra.mxu0 %vm11872_vm4, %v8132_v63 }
 0x3e6   :  { %7604 = vmatprep.subr.msk.mxu0 %vm11873_vm0, %v8132_v63 }
 0x3e7   :  { %7605 = vmatpush3.msk.msra.mxu0 %vm11873_vm0, %v8132_v63 }
 0x3e8   :  { %7606 = vmatprep.subr.msk.mxu0 %vm11874_vm3, %v8132_v63 }
 0x3e9   :  { %7607 = vmatpush3.msk.msra.mxu0 %vm11874_vm3, %v8132_v63 }
 0x3ea   :  { %7608 = vmatprep.subr.msk.mxu0 %vm11875_vm15, %v8132_v63 }
 0x3eb   :  { %7609 = vmatpush3.msk.msra.mxu0 %vm11875_vm15, %v8132_v63  ;;  %vm11877_vm15 = vcmp.eq.s32.totalorder %v8445_v54, %v8669_v33  ;;  %v9112_v54 = vld [vmem:[%s11755_s9 + $0x20] sm:$0xff] }
 0x3ec   :  { %7610 = vmatprep.subr.msk.mxu0 %vm11876_vm1, %v8132_v63  ;;  %vm8836_vm3 = vmor %vm8464_vm6, %vm11877_vm15  ;;  %vm11792_vm6 = vmmov 0   ;;  %vm11883_vm15 = vcmp.eq.s32.totalorder %v8461_v60, %v8669_v33 }
 0x3ed   :  { %7611 = vmatpush3.msk.msra.mxu0 %vm11876_vm1, %v8132_v63  ;;  %vm11880_vm1 = vcmp.eq.s32.totalorder %v8451_v56, %v8669_v33 }
 0x3ee   :  { %7650 = vmatprep.subr.mxu0 %v11802_v34  ;;  %vm8845_vm0 = vmor %vm8469_vm7, %vm11880_vm1  ;;  %vm11886_vm7 = vcmp.eq.s32.totalorder %v8474_v62, %v8669_v33 }
 0x3ef   :  { %vm8860_vm1 = vmor %vm8483_vm8, %vm11883_vm15  ;;  %vm11889_vm8 = vcmp.eq.s32.totalorder %v8488_v1, %v8669_v33  ;;  %v11905_v1 = vmov 0 }
 0x3f0   :  { %vm8886_vm15 = vmor %vm8511_vm10, %vm11889_vm8  ;;  %vm11895_vm10 = vcmp.eq.s32.totalorder %v8516_v10, %v8669_v33 }
 0x3f1   :  { %vm8912_vm8 = vmor %vm8539_vm12, %vm11895_vm10  ;;  %vm11901_vm12 = vcmp.eq.s32.totalorder %v8544_v14, %v8669_v33 }
 0x3f2   :  { %vm8938_vm10 = vmor %vm11869_vm2, %vm11901_vm12  ;;  %vm11907_vm12 = vcmp.eq.s32.totalorder %v8572_v21, %v8669_v33 }
 0x3f3   :  { %v11903_v0 = vsel %vm8938_vm10, 4294967295, %v11902_v0  ;;  %vm8964_vm2 = vmor %vm11871_vm14, %vm11907_vm12  ;;  %vm11913_vm12 = vcmp.eq.s32.totalorder %v8623_v26, %v8669_v33  ;;  %vm11914_vm14 = vnez %v11853_v27 }
 0x3f4   :  { %v11909_v3 = vsel %vm8964_vm2, 4294967295, %v11908_v3 }
 0x406   :  { %v7509_v2 = vpop.f32.mrf.mxu0 }
 0x407   :  { %v852_v50 = vadd.f32 %v7516_v15, %v7509_v2 }
 0x408   :  { %v765_v19 = vpop.f32.mrf.mxu0 }
 0x409   :  { %v847_v47 = vadd.f32 %v846_v38, %v765_v19 }
 0x40a   :  { %v7523_v43 = vpop.f32.mrf.mxu0 }
 0x40b   :  { %v949_v53 = vadd.f32 %v7523_v43, %v852_v50  ;;  %v1670_v43 = vpop.permute.xlu0 %1669 }
 0x40c   :  { %v939_v51 = vpop.f32.mrf.mxu0 }
 0x40d   :  { %v948_v52 = vadd.f32 %v939_v51, %v847_v47 }
 0x40f   :  { %7556 = vmatprep.mubr.f32.mxu1 %v948_v52 }
 0x410   :  { %7557 = vmatmul.mubr.f32.vlgmr.msra.gmra.mxu1 %v949_v53 }
 0x411   :  { %7616 = vmatpush3.msk.msra.mxu1 %vm8836_vm3, %v8134_v59  ;;  %7647 = vmatprep.mubr.msk.f32.mxu1 %vm11792_vm6, %v11802_v34  ;;  %vm8873_vm6 = vmor %vm8497_vm9, %vm11886_vm7  ;;  %vm11892_vm9 = vcmp.eq.s32.totalorder %v8502_v8, %v8669_v33  ;;  %v11911_v8 = vmov 0 }
 0x412   :  { %7617 = vmatprep.subr.mxu1 %v11802_v34  ;;  %vm8899_vm7 = vmor %vm8525_vm11, %vm11892_vm9  ;;  %vm11898_vm11 = vcmp.eq.s32.totalorder %v8530_v12, %v8669_v33 }
 0x413   :  { %7618 = vmatpush3.msk.msra.mxu1 %vm8845_vm0, %v8134_v59  ;;  %vm8925_vm9 = vmor %vm8553_vm13, %vm11898_vm11  ;;  %vm11904_vm13 = vcmp.eq.s32.totalorder %v8558_v18, %v8669_v33 }
 0x414   :  { %7619 = vmatprep.subr.mxu1 %v11802_v34  ;;  %vm8951_vm11 = vmor %vm11870_vm5, %vm11904_vm13  ;;  %vm11910_vm13 = vcmp.eq.s32.totalorder %v8586_v23, %v8669_v33 }
 0x415   :  { %7620 = vmatpush3.msk.msra.mxu1 %vm8860_vm1, %v8134_v59  ;;  %v11906_v1 = vsel %vm8951_vm11, 4294967295, %v11905_v1  ;;  %vm8977_vm5 = vmor %vm11872_vm4, %vm11910_vm13  ;;  %vm11917_vm13 = vcmp.eq.s32.totalorder %v8631_v28, %v8669_v33  ;;  %vm11918_vm4 = vnez %v11855_v29 }
 0x416   :  { %7621 = vmatprep.subr.mxu1 %v11802_v34  ;;  %v11912_v8 = vsel %vm8977_vm5, 4294967295, %v11911_v8 }
 0x417   :  { %7622 = vmatpush3.msk.msra.mxu1 %vm8873_vm6, %v8134_v59 }
 0x418   :  { %7623 = vmatprep.subr.mxu1 %v11802_v34 }
 0x419   :  { %7624 = vmatpush3.msk.msra.mxu1 %vm8886_vm15, %v8134_v59 }
 0x41a   :  { %7625 = vmatprep.subr.mxu1 %v11802_v34 }
 0x41b   :  { %7626 = vmatpush3.msk.msra.mxu1 %vm8899_vm7, %v8134_v59 }
 0x41c   :  { %7627 = vmatprep.subr.mxu1 %v11802_v34 }
 0x41d   :  { %7628 = vmatpush3.msk.msra.mxu1 %vm8912_vm8, %v8134_v59 }
 0x41e   :  { %7629 = vmatprep.subr.mxu1 %v11802_v34 }
 0x41f   :  { %7630 = vmatpush3.msk.msra.mxu1 %vm8925_vm9, %v8134_v59 }
 0x420   :  { %7631 = vmatprep.subr.mxu1 %v11802_v34 }
 0x421   :  { %7632 = vmatpush3.msk.msra.mxu1 %vm8938_vm10, %v8134_v59 }
 0x422   :  { %7633 = vmatprep.subr.mxu1 %v11802_v34 }
 0x423   :  { %7634 = vmatpush3.msk.msra.mxu1 %vm8951_vm11, %v8134_v59  ;;  %vm8990_vm11 = vmor %vm11914_vm14, %vm11913_vm12  ;;  %vm1458_vm12 = vcmp.eq.s32.totalorder %v8250_v5, %v8669_v33  ;;  %vm11921_vm14 = vcmp.eq.s32.totalorder %v8645_v30, %v8669_v33 }
 0x424   :  { %7635 = vmatprep.subr.mxu1 %v11802_v34 }
 0x425   :  { %7636 = vmatpush3.msk.msra.mxu1 %vm8964_vm2, %v8134_v59  ;;  %vm9003_vm2 = vmor %vm11918_vm4, %vm11917_vm13  ;;  %vm11925_vm13 = vnez %v11859_v32 }
 0x426   :  { %7637 = vmatprep.subr.mxu1 %v11802_v34  ;;  %vm9028_vm4 = vmor %vm11925_vm13, %vm1458_vm12 }
 0x427   :  { %7638 = vmatpush3.msk.msra.mxu1 %vm8977_vm5, %v8134_v59  ;;  %vm11922_vm5 = vnez %v11857_v31 }
 0x428   :  { %7639 = vmatprep.subr.mxu1 %v11802_v34  ;;  %vm9018_vm10 = vmor %vm11922_vm5, %vm11921_vm14  ;;  %vm11928_vm14 = vmmov 0  }
 0x429   :  { %7640 = vmatpush3.msk.msra.mxu1 %vm8990_vm11, %v8134_v59 }
 0x42a   :  { %7641 = vmatprep.subr.mxu1 %v11802_v34 }
 0x42b   :  { %7642 = vmatpush3.msk.msra.mxu1 %vm9003_vm2, %v8134_v59 }
 0x42c   :  { %7643 = vmatprep.subr.mxu1 %v11802_v34 }
 0x42d   :  { %7644 = vmatpush3.msk.msra.mxu1 %vm9018_vm10, %v8134_v59 }
 0x42e   :  { %7645 = vmatprep.subr.mxu1 %v11802_v34 }
 0x42f   :  { %7646 = vmatpush3.msk.msra.mxu1 %vm9028_vm4, %v8134_v59 }
 0x430   :  { %7648 = vmatmul.mubr.f32.vlgmr.msra.gmra.mxu1 %v8258_v7 }
 0x486   :  { %v7565_v13 = vpop.f32.mrf.mxu0 }
 0x488   :  { %v1201_v14 = vpop.f32.mrf.mxu0 }
 0x48a   :  { %v7572_v17 = vpop.f32.mrf.mxu0 }
 0x48b   :  { %v1282_v18 = vadd.f32 %v7572_v17, %v7565_v13 }
 0x48c   :  { %v1276_v21 = vpop.f32.mrf.mxu0 }
 0x48d   :  { %v1277_v23 = vadd.f32 %v1276_v21, %v1201_v14 }
 0x48e   :  { %v7579_v26 = vpop.f32.mrf.mxu0 }
 0x48f   :  { %v1373_v28 = vadd.f32 %v7579_v26, %v1282_v18 }
 0x490   :  { %v1363_v30 = vpop.f32.mrf.mxu0 }
 0x491   :  { %v1372_v33 = vadd.f32 %v1363_v30, %v1277_v23 }
 0x493   :  { %7612 = vmatprep.mubr.f32.mxu0 %v1372_v33 }
 0x494   :  { %7613 = vmatmul.mubr.f32.vlgmr.msra.gmra.mxu0 %v1373_v28 }
 0x495   :  { %7651 = vmatpush3.msk.msra.mxu0 %vm8836_vm3, %v8134_v59  ;;  %7682 = vmatprep.mubr.msk.f32.mxu0 %vm11928_vm14, %v11802_v34  ;;  %vm11930_vm3 = vnez %v11906_v1 }
 0x496   :  { %7652 = vmatprep.subr.mxu0 %v11802_v34 }
 0x497   :  { %7653 = vmatpush3.msk.msra.mxu0 %vm8845_vm0, %v8134_v59  ;;  %vm11929_vm0 = vnez %v11903_v0 }
 0x498   :  { %7654 = vmatprep.subr.mxu0 %v11802_v34 }
 0x499   :  { %7655 = vmatpush3.msk.msra.mxu0 %vm8860_vm1, %v8134_v59  ;;  %vm11932_vm1 = vnez %v11912_v8 }
 0x49a   :  { %7656 = vmatprep.subr.mxu0 %v11802_v34 }
 0x49b   :  { %7657 = vmatpush3.msk.msra.mxu0 %vm8873_vm6, %v8134_v59  ;;  %vm11931_vm6 = vnez %v11909_v3  ;;  %v9121_v3 = vld [vmem:[%s11755_s9 + $0x40] sm:$0xff] }
 0x49c   :  { %7658 = vmatprep.subr.mxu0 %v11802_v34 }
 0x49d   :  { %7659 = vmatpush3.msk.msra.mxu0 %vm8886_vm15, %v8134_v59  ;;  %vm11934_vm15 = vcmask 7168  }
 0x49e   :  { %7660 = vmatprep.subr.mxu0 %v11802_v34 }
 0x49f   :  { %7661 = vmatpush3.msk.msra.mxu0 %vm8899_vm7, %v8134_v59  ;;  %vm11935_vm7 = vmmov %vm11934_vm15 }
 0x4a0   :  { %7662 = vmatprep.subr.mxu0 %v11802_v34 }
 0x4a1   :  { %7663 = vmatpush3.msk.msra.mxu0 %vm8912_vm8, %v8134_v59 }
 0x4a2   :  { %7664 = vmatprep.subr.mxu0 %v11802_v34 }
 0x4a3   :  { %7665 = vmatpush3.msk.msra.mxu0 %vm8925_vm9, %v8134_v59 }
 0x4a4   :  { %7666 = vmatprep.subr.mxu0 %v11802_v34 }
 0x4a5   :  { %7667 = vmatpush3.msk.msra.mxu0 %vm11929_vm0, %v8134_v59 }
 0x4a6   :  { %7668 = vmatprep.subr.mxu0 %v11802_v34 }
 0x4a7   :  { %7669 = vmatpush3.msk.msra.mxu0 %vm11930_vm3, %v8134_v59 }
 0x4a8   :  { %7670 = vmatprep.subr.mxu0 %v11802_v34 }
 0x4a9   :  { %7671 = vmatpush3.msk.msra.mxu0 %vm11931_vm6, %v8134_v59 }
 0x4aa   :  { %7672 = vmatprep.subr.mxu0 %v11802_v34 }
 0x4ab   :  { %7673 = vmatpush3.msk.msra.mxu0 %vm11932_vm1, %v8134_v59 }
 0x4ac   :  { %7674 = vmatprep.subr.mxu0 %v11802_v34 }
 0x4ad   :  { %7675 = vmatpush3.msk.msra.mxu0 %vm8990_vm11, %v8134_v59 }
 0x4ae   :  { %7676 = vmatprep.subr.mxu0 %v11802_v34 }
 0x4af   :  { %7677 = vmatpush3.msk.msra.mxu0 %vm9003_vm2, %v8134_v59  ;;  %vm11933_vm2 = vcmask 130048  }
 0x4b0   :  { %7678 = vmatprep.subr.mxu0 %v11802_v34  ;;  %7689 = vmatprep.mubr.msk.f32.mxu1 %vm11933_vm2, %v9112_v54  ;;  %vm11936_vm8 = vmmov %vm11933_vm2 }
 0x4b1   :  { %7679 = vmatpush3.msk.msra.mxu0 %vm9018_vm10, %v8134_v59  ;;  %vm11937_vm9 = vmmov %vm11933_vm2 }
 0x4b2   :  { %7680 = vmatprep.subr.mxu0 %v11802_v34  ;;  %vm11938_vm10 = vmmov %vm11933_vm2 }
 0x4b3   :  { %7681 = vmatpush3.msk.msra.mxu0 %vm9028_vm4, %v8134_v59  ;;  %vm1720_vm4 = vcmask 531456   ;;  %vm11939_vm11 = vmmov %vm11933_vm2 }
 0x4b4   :  { %7683 = vmatmul.mubr.f32.vlgmr.msra.gmra.mxu0 %v8279_v16  ;;  %v1665_v16 = vpop.permute.xlu1 %1664  ;;  %vm11940_vm12 = vmmov %vm11933_vm2 }
 0x4b5   :  { %7709 = vmatprep.mubr.msk.f32.mxu0 %vm11936_vm8, %v9121_v3  ;;  %vm11941_vm0 = vmmov %vm11933_vm2 }
 0x4b6   :  { %vm11942_vm3 = vmmov %vm11941_vm0 }
 0x4b7   :  { %vm11943_vm6 = vmmov %vm11941_vm0 }
 0x4b8   :  { %vm11944_vm1 = vmmov %vm11941_vm0 }
 0x4b9   :  { %vm11945_vm2 = vmmov %vm11941_vm0 }
 0x4ba   :  { %vm11947_vm8 = vmmov %vm11935_vm7 }
 0x4d0   :  { %v7558_v7 = vpop.f32.mrf.mxu1 }
 0x4d1   :  { %v1100_v40 = vadd.f32 %v7558_v7, %v1026_v35 }
 0x4d2   :  { %v1094_v39 = vpop.f32.mrf.mxu1 }
 0x4d3   :  { %v1095_v41 = vadd.f32 %v1094_v39, %v1021_v36  ;;  %v1104_v46 = vmul.f32 0.2, %v1100_v40 }
 0x4d5   :  { %v1103_v37 = vmul.f32 0.2, %v1095_v41  ;;  %v1106_v44 = vmax.f32 %v1100_v40, %v1104_v46 }
 0x4d7   :  { %v1105_v2 = vmax.f32 %v1095_v41, %v1103_v37  ;;  %v1683_v51 = vmul.f32 0.7, %v1106_v44  ;;  %v1709_v41 = vld [vmem:[%s11756_s10 + $0x18] sm:$0xff]  ;;  %v1700_v44 = vld [vmem:[%s11755_s9 + $0x30] sm:$0xff] }
 0x4d9   :  { %v1682_v52 = vmul.f32 0.7, %v1105_v2  ;;  %v1701_v2 = vld [vmem:[%s11755_s9 + $0x38] sm:$0xff] }
 0x4f0   :  { %v1572_v48 = vpop.f32.mrf.mxu1 }
 0x4f1   :  { %v1659_v49 = vrot.slane %v1572_v48, %v8253_v6  ;;  %v1699_v48 = vld [vmem:[%s11755_s9 + $0x28] sm:$0xff] }
 0x4f2   :  { %v7649_v15 = vpop.f32.mrf.mxu1 }
 0x4f3   :  { %v1660_v19 = vmul.f32 %v1659_v49, %v1649_v45  ;;  %v1661_v38 = vmul.f32 %v1659_v49, %v1654_v42 }
 0x4f5   :  { %v1672_v47 = vadd.f32 %v1665_v16, %v1660_v19  ;;  %v1673_v50 = vadd.f32 %v1670_v43, %v1661_v38  ;;  %v1703_v19 = vld [vmem:[%s11755_s9 + $0x48] sm:$0xff]  ;;  %v1694_v38 = vld [vmem:[%s11755_s9] sm:$0xff] }
 0x4f7   :  { %v1684_v53 = vmul.f32 0.3, %v1672_v47  ;;  %v1685_v57 = vmul.f32 0.3, %v1673_v50  ;;  %v1705_v47 = vld [vmem:[%s11755_s9 + $0x58] sm:$0xff]  ;;  %v1696_v50 = vld [vmem:[%s11755_s9 + $0x10] sm:$0xff] }
 0x4f9   :  { %v1687_v58 = vadd.f32 %v1685_v57, %v1683_v51  ;;  %v1686_v59 = vadd.f32 %v1684_v53, %v1682_v52  ;;  %v1697_v53 = vld [vmem:[%s11755_s9 + $0x18] sm:$0xff] }
 0x4fb   :  { %1714 = vrot.lane.b32.xlu0 %v1687_v58, %s8129_s30  ;;  %1712 = vrot.lane.b32.xlu1 %v1686_v59, %s8129_s30 }
 0x554   :  { %v7614_v56 = vpop.f32.mrf.mxu0 }
 0x555   :  { %v1446_v62 = vadd.f32 %v7614_v56, %v1026_v35 }
 0x556   :  { %v1440_v60 = vpop.f32.mrf.mxu0 }
 0x557   :  { %v1441_v8 = vadd.f32 %v1440_v60, %v1021_v36  ;;  %v1450_v11 = vmul.f32 0.2, %v1446_v62  ;;  %v1707_v60 = vld [vmem:[%s11756_s10 + $0x8] sm:$0xff] }
 0x559   :  { %v1449_v12 = vmul.f32 0.2, %v1441_v8  ;;  %v1452_v17 = vmax.f32 %v1446_v62, %v1450_v11 }
 0x55b   :  { %v1451_v21 = vmax.f32 %v1441_v8, %v1449_v12  ;;  %v1689_v33 = vmul.f32 0.7, %v1452_v17 }
 0x55d   :  { %v1688_v7 = vmul.f32 0.7, %v1451_v21 }
 0x56d   :  { %v1715_v4 = vpop.permute.xlu0 %1714  ;;  %v1713_v61 = vpop.permute.xlu1 %1712 }
 0x56e   :  { %v1719_v0 = vsel %vm11934_vm15, 0.0, %v1715_v4  ;;  %v1718_v1 = vsel %vm11935_vm7, 0.0, %v1713_v61  ;;  %vm11946_vm15 = vmmov %vm11941_vm0 }
 0x56f   :  { %v1722_v9 = vsel %vm1720_vm4, %v1719_v0, 0.0  ;;  %v1721_v10 = vsel %vm1720_vm4, %v1718_v1, 0.0 }
 0x570   :  { %1727 = vrot.lane.b32.xlu0 %v1722_v9, %s8130_s3  ;;  %1725 = vrot.lane.b32.xlu1 %v1721_v10, %s8130_s3 }
 0x574   :  { %1927 = vrot.lane.b32.xlu0 %v1722_v9, %s8131_s26  ;;  %v1642_v13 = vpop.f32.mrf.mxu0  ;;  %1925 = vrot.lane.b32.xlu1 %v1721_v10, %s8131_s26 }
 0x575   :  { %v1677_v14 = vrot.slane %v1642_v13, %v8253_v6  ;;  %v10044_v6 = vld [vmem:[#allocation3 + $0x118] sm:$0xff] }
 0x576   :  { %v7684_v18 = vpop.f32.mrf.mxu0 }
 0x577   :  { %v1678_v23 = vmul.f32 %v1677_v14, %v1649_v45  ;;  %v1679_v26 = vmul.f32 %v1677_v14, %v1654_v42  ;;  %v1708_v42 = vld [vmem:[%s11756_s10 + $0x10] sm:$0xff]  ;;  %v1706_v45 = vld [vmem:[%s11756_s10] sm:$0xff] }
 0x579   :  { %v1680_v28 = vadd.f32 %v1678_v23, %v1665_v16  ;;  %v1681_v30 = vadd.f32 %v1679_v26, %v1670_v43  ;;  %v1704_v43 = vld [vmem:[%s11755_s9 + $0x50] sm:$0xff]  ;;  %v1695_v16 = vld [vmem:[%s11755_s9 + $0x8] sm:$0xff] }
 0x57b   :  { %v1690_v35 = vmul.f32 0.3, %v1680_v28  ;;  %v1691_v36 = vmul.f32 0.3, %v1681_v30 }
 0x57d   :  { %v1693_v39 = vadd.f32 %v1691_v36, %v1689_v33  ;;  %v1692_v40 = vadd.f32 %v1690_v35, %v1688_v7 }
 0x57f   :  { %2068 = vrot.lane.b32.xlu0 %v1693_v39, %s8129_s30  ;;  %2066 = vrot.lane.b32.xlu1 %v1692_v40, %s8129_s30 }
 0x583   :  { %2049 = vperm.xlu1 %7993, %v1709_v41  }
 0x587   :  { %2044 = vperm.xlu1 %7993, %v1708_v42  }
 0x58b   :  { %2034 = vperm.xlu1 %7993, %v1706_v45  }
 0x5e2   :  { %v1728_v46 = vpop.permute.xlu0 %1727  ;;  %v1726_v37 = vpop.permute.xlu1 %1725 }
 0x5e3   :  { %7685 = vmatprep.subr.mxu1 %v1728_v46 }
 0x5e4   :  { %7686 = vmatpush3.msra.mxu1 %v1728_v46 }
 0x5e5   :  { %7687 = vmatprep.subr.mxu1 %v1726_v37 }
 0x5e6   :  { %v1928_v49 = vpop.permute.xlu0 %1927  ;;  %7688 = vmatpush3.msra.mxu1 %v1726_v37  ;;  %v1926_v15 = vpop.permute.xlu1 %1925 }
 0x5e7   :  { %7690 = vmatmul.mubr.msk.f32.vlgmr.msra.gmra.mxu1 %vm11937_vm9, %v1699_v48  ;;  %7695 = vmatprep.subr.msk.mxu1 %vm1720_vm4, %v1719_v0  ;;  %vm11948_vm9 = vmmov %vm11941_vm0 }
 0x5e8   :  { %7705 = vmatprep.subr.mxu0 %v1928_v49  ;;  %7696 = vmatpush3.msk.msra.mxu1 %vm1720_vm4, %v1719_v0 }
 0x5e9   :  { %7706 = vmatpush3.msra.mxu0 %v1928_v49  ;;  %7697 = vmatprep.subr.msk.mxu1 %vm1720_vm4, %v1718_v1 }
 0x5ea   :  { %7707 = vmatprep.subr.mxu0 %v1926_v15  ;;  %7692 = vmatprep.mubr.msk.f32.mxu1 %vm11938_vm10, %v1700_v44  ;;  %vm11949_vm10 = vmmov %vm11941_vm0 }
 0x5eb   :  { %7698 = vmatpush3.msk.msra.mxu1 %vm1720_vm4, %v1718_v1  ;;  %7708 = vmatpush3.msra.mxu0 %v1926_v15 }
 0x5ec   :  { %7693 = vmatmul.mubr.msk.f32.gmra.mxu1 %vm11939_vm11, %v1701_v2  ;;  %7710 = vmatmul.mubr.msk.f32.vlgmr.msra.gmra.mxu0 %vm11940_vm12, %v1703_v19  ;;  %vm11950_vm11 = vmmov %vm11941_vm0 }
 0x5ed   :  { %7699 = vmatprep.mubr.msk.f32.mxu1 %vm11941_vm0, %v1694_v38  ;;  %7712 = vmatprep.mubr.msk.f32.mxu0 %vm11942_vm3, %v1704_v43  ;;  %vm11951_vm12 = vmmov %vm11941_vm0 }
 0x5ee   :  { %vm11952_vm3 = vmmov %vm11941_vm0 }
 0x5f0   :  { %7700 = vmatmul.mubr.msk.f32.vlgmr.msra.gmra.mxu1 %vm11943_vm6, %v1695_v16  ;;  %7713 = vmatmul.mubr.msk.f32.gmra.mxu0 %vm11944_vm1, %v1705_v47  ;;  %vm11953_vm6 = vmmov %vm11941_vm0 }
 0x5f1   :  { %v2069_v51 = vpop.permute.xlu0 %2068  ;;  %v2067_v52 = vpop.permute.xlu1 %2066  ;;  %7702 = vmatprep.mubr.msk.f32.mxu1 %vm11945_vm2, %v1696_v50  ;;  %7729 = vmatprep.mubr.msk.f32.mxu0 %vm11946_vm15, %v1694_v38  ;;  %vm11954_vm1 = vmmov %vm11941_vm0 }
 0x5f2   :  { %v2073_v57 = vsel %vm11935_vm7, 0.0, %v2069_v51  ;;  %v2072_v58 = vsel %vm11947_vm8, 0.0, %v2067_v52  ;;  %vm11955_vm2 = vmmov %vm11941_vm0 }
 0x5f3   :  { %7725 = vmatprep.subr.msk.mxu0 %vm1720_vm4, %v2073_v57  ;;  %v2075_v59 = vsel %vm1720_vm4, %v2073_v57, 0.0  ;;  %v2074_v56 = vsel %vm1720_vm4, %v2072_v58, 0.0  ;;  %vm11956_vm15 = vmmov %vm11941_vm0 }
 0x5f4   :  { %7703 = vmatmul.mubr.msk.f32.gmra.mxu1 %vm11948_vm9, %v1697_v53  ;;  %2080 = vrot.lane.b32.xlu0 %v2075_v59, %s8130_s3  ;;  %vm11957_vm7 = vmmov %vm11941_vm0  ;;  %vm2417_vm9 = vcmask 261120  }
 0x5f5   :  { %7726 = vmatpush3.msk.msra.mxu0 %vm1720_vm4, %v2073_v57  ;;  %2254 = vrot.lane.b32.xlu1 %v2074_v56, %s8131_s26  ;;  %vm11958_vm8 = vmmov %vm11941_vm0 }
 0x5f6   :  { %7727 = vmatprep.subr.msk.mxu0 %vm1720_vm4, %v2072_v58  ;;  %7719 = vmatprep.mubr.msk.f32.mxu1 %vm11949_vm10, %v9112_v54  ;;  %vm11959_vm10 = vcmask 7168  }
 0x5f7   :  { %7728 = vmatpush3.msk.msra.mxu0 %vm1720_vm4, %v2072_v58 }
 0x5f8   :  { %2078 = vrot.lane.b32.xlu0 %v2074_v56, %s8130_s3  ;;  %7730 = vmatmul.mubr.msk.f32.vlgmr.msra.gmra.mxu0 %vm11950_vm11, %v1695_v16  ;;  %v9235_v16 = vld [vmem:[%s11757_s11 + $0x20] sm:$0xff]  ;;  %vm11960_vm11 = vmmov %vm11959_vm10 }
 0x5f9   :  { %7732 = vmatprep.mubr.msk.f32.mxu0 %vm11951_vm12, %v1696_v50  ;;  %vm11961_vm12 = vmmov %vm11959_vm10 }
 0x5fc   :  { %2039 = vperm.xlu0 %7992, %v1707_v60   ;;  %7733 = vmatmul.mubr.msk.f32.gmra.mxu0 %vm11941_vm0, %v1697_v53  ;;  %vm11962_vm0 = vmmov %vm11959_vm10 }
 0x5fd   :  { %7753 = vmatprep.mubr.msk.f32.mxu0 %vm2417_vm9, %v9235_v16 }
 0x5fe   :  { %v9208_v61 = vpop.permute.xlu1 %2049 }
 0x600   :  { %2256 = vrot.lane.b32.xlu0 %v2075_v59, %s8131_s26 }
 0x602   :  { %v9215_v62 = vpop.permute.xlu1 %2044 }
 0x606   :  { %v9219_v1 = vpop.permute.xlu1 %2034 }
 0x666   :  { %v2081_v4 = vpop.permute.xlu0 %2080 }
 0x667   :  { %7715 = vmatprep.subr.mxu1 %v2081_v4  ;;  %v2255_v9 = vpop.permute.xlu1 %2254 }
 0x668   :  { %7716 = vmatpush3.msra.mxu1 %v2081_v4 }
 0x66a   :  { %v2079_v54 = vpop.permute.xlu0 %2078 }
 0x66b   :  { %7717 = vmatprep.subr.mxu1 %v2079_v54 }
 0x66c   :  { %7718 = vmatpush3.msra.mxu1 %v2079_v54 }
 0x66d   :  { %7720 = vmatmul.mubr.msk.f32.vlgmr.msra.gmra.mxu1 %vm11952_vm3, %v1699_v48  ;;  %vm11963_vm3 = vnez %v11845_v20 }
 0x66e   :  { %7722 = vmatprep.mubr.msk.f32.mxu1 %vm11953_vm6, %v1700_v44  ;;  %vm11964_vm6 = vnez %v11847_v22 }
 0x671   :  { %7723 = vmatmul.mubr.msk.f32.gmra.mxu1 %vm11954_vm1, %v1701_v2  ;;  %vm11965_vm1 = vnez %v11849_v24 }
 0x672   :  { %7739 = vmatprep.mubr.msk.f32.mxu1 %vm11955_vm2, %v9121_v3  ;;  %vm11966_vm2 = vnez %v11851_v25 }
 0x677   :  { %v9217_v0 = vpop.permute.xlu0 %2039 }
 0x67b   :  { %v2257_v8 = vpop.permute.xlu0 %2256 }
 0x67c   :  { %7735 = vmatprep.subr.mxu1 %v2257_v8 }
 0x67d   :  { %7736 = vmatpush3.msra.mxu1 %v2257_v8 }
 0x67e   :  { %7737 = vmatprep.subr.mxu1 %v2255_v9 }
 0x67f   :  { %7738 = vmatpush3.msra.mxu1 %v2255_v9 }
 0x680   :  { %7740 = vmatmul.mubr.msk.f32.vlgmr.msra.gmra.mxu1 %vm11956_vm15, %v1703_v19  ;;  %vm11967_vm15 = vnez %v11853_v27 }
 0x681   :  { %7742 = vmatprep.mubr.msk.f32.mxu1 %vm11957_vm7, %v1704_v43  ;;  %vm11968_vm7 = vnez %v11855_v29 }
 0x684   :  { %7743 = vmatmul.mubr.msk.f32.gmra.mxu1 %vm11958_vm8, %v1705_v47  ;;  %v9240_v47 = vld [vmem:[%s11757_s11] sm:$0xff]  ;;  %vm11969_vm8 = vmmov %vm11962_vm0 }
 0x685   :  { %7767 = vmatprep.mubr.msk.f32.mxu1 %vm2417_vm9, %v9240_v47 }
 0x6a7   :  { %v7691_v10 = vpop.f32.mrf.mxu1 }
 0x6a9   :  { %v1809_v3 = vpop.f32.mrf.mxu1 }
 0x6ac   :  { %v7694_v11 = vpop.f32.mrf.mxu1  ;;  %v7711_v12 = vpop.f32.mrf.mxu0 }
 0x6ae   :  { %v1819_v13 = vpop.f32.mrf.mxu1  ;;  %v2009_v17 = vpop.f32.mrf.mxu0 }
 0x6b0   :  { %v7701_v14 = vpop.f32.mrf.mxu1  ;;  %v7714_v28 = vpop.f32.mrf.mxu0 }
 0x6b1   :  { %v1912_v18 = vadd.f32 %v7701_v14, %v7691_v10  ;;  %v9272_v14 = vld [vmem:[%s11757_s11 + $0x10] sm:$0xff] }
 0x6b2   :  { %v1906_v21 = vpop.f32.mrf.mxu1  ;;  %v2019_v40 = vpop.f32.mrf.mxu0 }
 0x6b3   :  { %v1907_v23 = vadd.f32 %v1906_v21, %v1809_v3  ;;  %v2029_v30 = vadd.f32 %v7711_v12, %v1912_v18  ;;  %v9265_v12 = vld [vmem:[%s11757_s11 + $0x8] sm:$0xff]  ;;  %v9287_v21 = vld [vmem:[%s11757_s11 + $0x18] sm:$0xff] }
 0x6b4   :  { %v7704_v26 = vpop.f32.mrf.mxu1 }
 0x6b5   :  { %v1922_v33 = vadd.f32 %v7704_v26, %v7694_v11  ;;  %v2028_v35 = vadd.f32 %v2009_v17, %v1907_v23  ;;  %v2053_v41 = vadd.f32 %v9217_v0, %v2029_v30 }
 0x6b6   :  { %v1916_v7 = vpop.f32.mrf.mxu1 }
 0x6b7   :  { %v1917_v36 = vadd.f32 %v1916_v7, %v1819_v13  ;;  %v2031_v39 = vadd.f32 %v7714_v28, %v1922_v33  ;;  %v2052_v46 = vadd.f32 %v9219_v1, %v2028_v35  ;;  %v2057_v49 = vmul.f32 0.2, %v2053_v41 }
 0x6b8   :  { %v7731_v56 = vpop.f32.mrf.mxu0 }
 0x6b9   :  { %v2055_v42 = vadd.f32 %v9208_v61, %v2031_v39  ;;  %v2030_v45 = vadd.f32 %v2019_v40, %v1917_v36  ;;  %v2056_v2 = vmul.f32 0.2, %v2052_v46  ;;  %v2061_v38 = vmax.f32 %v2053_v41, %v2057_v49 }
 0x6ba   :  { %v2235_v11 = vpop.f32.mrf.mxu0 }
 0x6bb   :  { %v2059_v37 = vmul.f32 0.2, %v2055_v42  ;;  %v2054_v48 = vadd.f32 %v9215_v62, %v2030_v45  ;;  %v2060_v43 = vmax.f32 %v2052_v46, %v2056_v2 }
 0x6bc   :  { %v7734_v18 = vpop.f32.mrf.mxu0 }
 0x6bd   :  { %v2058_v44 = vmul.f32 0.2, %v2054_v48  ;;  %v2063_v15 = vmax.f32 %v2055_v42, %v2059_v37 }
 0x6be   :  { %v2245_v28 = vpop.f32.mrf.mxu0 }
 0x6bf   :  { %2387 = vrot.lane.b32.xlu0 %v2063_v15, %s8129_s30  ;;  %v2062_v19 = vmax.f32 %v2054_v48, %v2058_v44 }
 0x6c1   :  { %2385 = vrot.lane.b32.xlu1 %v2062_v19, %s8129_s30 }
 0x6c3   :  { %2383 = vrot.lane.b32.xlu0 %v2061_v38, %s8129_s30 }
 0x6c5   :  { %2381 = vrot.lane.b32.xlu1 %v2060_v43, %s8129_s30 }
 0x72d   :  { %v7721_v50 = vpop.f32.mrf.mxu1 }
 0x72e   :  { %v2241_v23 = vadd.f32 %v7731_v56, %v7721_v50  ;;  %v9369_v56 = vld [vmem:[%s11757_s11 + $0x40] sm:$0xff] }
 0x72f   :  { %v2150_v59 = vpop.f32.mrf.mxu1 }
 0x730   :  { %v2236_v30 = vadd.f32 %v2235_v11, %v2150_v59  ;;  %v9364_v59 = vld [vmem:[%s11757_s11 + $0x38] sm:$0xff] }
 0x731   :  { %v2388_v51 = vpop.permute.xlu0 %2387  ;;  %v7724_v3 = vpop.f32.mrf.mxu1 }
 0x732   :  { %v2396_v52 = vsel %vm11959_vm10, 0.0, %v2388_v51  ;;  %v2251_v33 = vadd.f32 %v7734_v18, %v7724_v3  ;;  %vm11970_vm10 = vmmov %vm11962_vm0 }
 0x733   :  { %7759 = vmatprep.subr.msk.mxu1 %vm1720_vm4, %v2396_v52  ;;  %v2386_v53 = vpop.permute.xlu1 %2385  ;;  %v2400_v57 = vsel %vm1720_vm4, %v2396_v52, 0.0  ;;  %v2160_v17 = vpop.f32.mrf.mxu1 }
 0x734   :  { %v2395_v58 = vsel %vm11960_vm11, 0.0, %v2386_v53  ;;  %2411 = vrot.lane.b32.xlu0 %v2400_v57, %s8130_s3  ;;  %7760 = vmatpush3.msk.msra.mxu1 %vm1720_vm4, %v2396_v52  ;;  %v2246_v36 = vadd.f32 %v2245_v28, %v2160_v17  ;;  %v9350_v52 = vld [vmem:[%s11757_s11 + $0x28] sm:$0xff]  ;;  %v9355_v53 = vld [vmem:[%s11757_s11 + $0x30] sm:$0xff]  ;;  %vm11971_vm11 = vmmov %vm11962_vm0 }
 0x735   :  { %v2384_v60 = vpop.permute.xlu0 %2383  ;;  %7761 = vmatprep.subr.msk.mxu1 %vm1720_vm4, %v2395_v58  ;;  %v2399_v4 = vsel %vm1720_vm4, %v2395_v58, 0.0 }
 0x736   :  { %v2394_v54 = vsel %vm11961_vm12, 0.0, %v2384_v60  ;;  %7762 = vmatpush3.msk.msra.mxu1 %vm1720_vm4, %v2395_v58  ;;  %2409 = vrot.lane.b32.xlu1 %v2399_v4, %s8130_s3  ;;  %vm11972_vm12 = vmmov %vm11962_vm0 }
 0x737   :  { %7763 = vmatprep.subr.msk.mxu1 %vm1720_vm4, %v2394_v54  ;;  %v2382_v8 = vpop.permute.xlu1 %2381  ;;  %v2398_v9 = vsel %vm1720_vm4, %v2394_v54, 0.0 }
 0x738   :  { %v2393_v10 = vsel %vm11962_vm0, 0.0, %v2382_v8  ;;  %2407 = vrot.lane.b32.xlu0 %v2398_v9, %s8130_s3  ;;  %7764 = vmatpush3.msk.msra.mxu1 %vm1720_vm4, %v2394_v54  ;;  %v9378_v54 = vld [vmem:[%s11757_s11 + $0x48] sm:$0xff]  ;;  %v9383_v8 = vld [vmem:[%s11757_s11 + $0x50] sm:$0xff] }
 0x739   :  { %7765 = vmatprep.subr.msk.mxu1 %vm1720_vm4, %v2393_v10  ;;  %v2397_v13 = vsel %vm1720_vm4, %v2393_v10, 0.0 }
 0x73a   :  { %7766 = vmatpush3.msk.msra.mxu1 %vm1720_vm4, %v2393_v10  ;;  %2405 = vrot.lane.b32.xlu1 %v2397_v13, %s8130_s3 }
 0x73b   :  { %7768 = vmatmul.mubr.msk.f32.vlgmr.msra.gmra.mxu1 %vm2417_vm9, %v9265_v12  ;;  %7787 = vmatprep.subr.msk.mxu1 %vm11963_vm3, %v8132_v63 }
 0x73c   :  { %2618 = vrot.lane.b32.xlu0 %v2400_v57, %s8131_s26  ;;  %7770 = vmatprep.mubr.msk.f32.mxu1 %vm2417_vm9, %v9272_v14 }
 0x73d   :  { %7788 = vmatpush3.msk.msra.mxu1 %vm11963_vm3, %v8132_v63 }
 0x73e   :  { %2616 = vrot.lane.b32.xlu1 %v2399_v4, %s8131_s26  ;;  %7789 = vmatprep.subr.msk.mxu1 %vm11964_vm6, %v8132_v63 }
 0x73f   :  { %7771 = vmatmul.mubr.msk.f32.gmra.mxu1 %vm2417_vm9, %v9287_v21 }
 0x740   :  { %2614 = vrot.lane.b32.xlu0 %v2398_v9, %s8131_s26  ;;  %v7741_v26 = vpop.f32.mrf.mxu1  ;;  %7790 = vmatpush3.msk.msra.mxu1 %vm11964_vm6, %v8132_v63  ;;  %v9392_v9 = vld [vmem:[%s11757_s11 + $0x58] sm:$0xff] }
 0x741   :  { %7791 = vmatprep.subr.msk.mxu1 %vm11965_vm1, %v8132_v63  ;;  %v2346_v35 = vadd.f32 %v7741_v26, %v2241_v23 }
 0x742   :  { %2612 = vrot.lane.b32.xlu1 %v2397_v13, %s8131_s26  ;;  %v2326_v7 = vpop.f32.mrf.mxu1  ;;  %7792 = vmatpush3.msk.msra.mxu1 %vm11965_vm1, %v8132_v63 }
 0x743   :  { %7793 = vmatprep.subr.msk.mxu1 %vm11966_vm2, %v8132_v63  ;;  %v2345_v40 = vadd.f32 %v2326_v7, %v2236_v30  ;;  %v2350_v45 = vadd.f32 %v2346_v35, %v9217_v0  ;;  %v2373_v7 = vld [vmem:[%s11758_s12] sm:$0xff]  ;;  %v2374_v35 = vld [vmem:[%s11758_s12 + $0x8] sm:$0xff] }
 0x744   :  { %v7744_v39 = vpop.f32.mrf.mxu1  ;;  %7794 = vmatpush3.msk.msra.mxu1 %vm11966_vm2, %v8132_v63 }
 0x745   :  { %v2348_v41 = vadd.f32 %v7744_v39, %v2251_v33  ;;  %7795 = vmatprep.subr.msk.mxu1 %vm11967_vm15, %v8132_v63  ;;  %v2349_v48 = vadd.f32 %v2345_v40, %v9219_v1  ;;  %v2376_v39 = vld [vmem:[%s11758_s12 + $0x18] sm:$0xff]  ;;  %v3363_v40 = vld [vmem:[%s11760_s14] sm:$0xff] }
 0x746   :  { %v2336_v42 = vpop.f32.mrf.mxu1  ;;  %7796 = vmatpush3.msk.msra.mxu1 %vm11967_vm15, %v8132_v63 }
 0x747   :  { %v2352_v46 = vadd.f32 %v2348_v41, %v9208_v61  ;;  %v2347_v37 = vadd.f32 %v2336_v42, %v2246_v36  ;;  %7797 = vmatprep.subr.msk.mxu1 %vm11968_vm7, %v8132_v63  ;;  %v2354_v61 = vmul.f32 0.2, %v2350_v45  ;;  %v2375_v36 = vld [vmem:[%s11758_s12 + $0x10] sm:$0xff]  ;;  %v3364_v41 = vld [vmem:[%s11760_s14 + $0x8] sm:$0xff] }
 0x748   :  { %7798 = vmatpush3.msk.msra.mxu1 %vm11968_vm7, %v8132_v63  ;;  %v3365_v42 = vld [vmem:[%s11760_s14 + $0x10] sm:$0xff] }
 0x749   :  { %v2356_v49 = vmul.f32 0.2, %v2352_v46  ;;  %v2351_v44 = vadd.f32 %v2347_v37, %v9215_v62  ;;  %7799 = vmatprep.subr.msk.mxu1 %vm11922_vm5, %v8132_v63  ;;  %v2353_v62 = vmul.f32 0.2, %v2349_v48  ;;  %v2358_v2 = vmax.f32 %v2350_v45, %v2354_v61  ;;  %v3366_v45 = vld [vmem:[%s11760_s14 + $0x18] sm:$0xff] }
 0x74a   :  { %7800 = vmatpush3.msk.msra.mxu1 %vm11922_vm5, %v8132_v63 }
 0x74b   :  { %v2355_v0 = vmul.f32 0.2, %v2351_v44  ;;  %v2360_v15 = vmax.f32 %v2352_v46, %v2356_v49  ;;  %7801 = vmatprep.subr.msk.mxu1 %vm11925_vm13, %v8132_v63  ;;  %v2357_v19 = vmax.f32 %v2349_v48, %v2353_v62 }
 0x74c   :  { %7802 = vmatpush3.msk.msra.mxu1 %vm11925_vm13, %v8132_v63 }
 0x74d   :  { %2861 = vrot.lane.b32.xlu0 %v2360_v15, %s8129_s30  ;;  %v2359_v1 = vmax.f32 %v2351_v44, %v2355_v0 }
 0x74f   :  { %2859 = vrot.lane.b32.xlu1 %v2359_v1, %s8129_s30 }
 0x751   :  { %2857 = vrot.lane.b32.xlu0 %v2358_v2, %s8129_s30 }
 0x753   :  { %2855 = vrot.lane.b32.xlu1 %v2357_v19, %s8129_s30 }
 0x7a6   :  { %v2412_v38 = vpop.permute.xlu0 %2411 }
 0x7a7   :  { %7745 = vmatprep.subr.mxu0 %v2412_v38 }
 0x7a8   :  { %7746 = vmatpush3.msra.mxu0 %v2412_v38  ;;  %v2410_v43 = vpop.permute.xlu1 %2409 }
 0x7a9   :  { %7747 = vmatprep.subr.mxu0 %v2410_v43 }
 0x7aa   :  { %v2408_v50 = vpop.permute.xlu0 %2407  ;;  %7748 = vmatpush3.msra.mxu0 %v2410_v43 }
 0x7ab   :  { %7749 = vmatprep.subr.mxu0 %v2408_v50 }
 0x7ac   :  { %7750 = vmatpush3.msra.mxu0 %v2408_v50  ;;  %v2406_v51 = vpop.permute.xlu1 %2405 }
 0x7ad   :  { %7751 = vmatprep.subr.mxu0 %v2406_v51 }
 0x7ae   :  { %v2619_v57 = vpop.permute.xlu0 %2618  ;;  %7752 = vmatpush3.msra.mxu0 %v2406_v51 }
 0x7af   :  { %7754 = vmatmul.mubr.msk.f32.vlgmr.msra.gmra.mxu0 %vm2417_vm9, %v9350_v52  ;;  %7773 = vmatprep.subr.mxu0 %v2619_v57 }
 0x7b0   :  { %7774 = vmatpush3.msra.mxu0 %v2619_v57  ;;  %v2617_v58 = vpop.permute.xlu1 %2616  ;;  %7756 = vmatprep.mubr.msk.f32.mxu0 %vm2417_vm9, %v9355_v53 }
 0x7b1   :  { %7775 = vmatprep.subr.mxu0 %v2617_v58 }
 0x7b2   :  { %v2615_v60 = vpop.permute.xlu0 %2614  ;;  %7776 = vmatpush3.msra.mxu0 %v2617_v58 }
 0x7b3   :  { %7757 = vmatmul.mubr.msk.f32.gmra.mxu0 %vm2417_vm9, %v9364_v59  ;;  %7777 = vmatprep.subr.mxu0 %v2615_v60 }
 0x7b4   :  { %7778 = vmatpush3.msra.mxu0 %v2615_v60  ;;  %v2613_v4 = vpop.permute.xlu1 %2612  ;;  %7781 = vmatprep.mubr.msk.f32.mxu0 %vm2417_vm9, %v9369_v56 }
 0x7b5   :  { %7779 = vmatprep.subr.mxu0 %v2613_v4 }
 0x7b6   :  { %7780 = vmatpush3.msra.mxu0 %v2613_v4 }
 0x7b7   :  { %7782 = vmatmul.mubr.msk.f32.vlgmr.msra.gmra.mxu0 %vm2417_vm9, %v9378_v54 }
 0x7b8   :  { %7784 = vmatprep.mubr.msk.f32.mxu0 %vm2417_vm9, %v9383_v8 }
 0x7bb   :  { %7785 = vmatmul.mubr.msk.f32.gmra.mxu0 %vm2417_vm9, %v9392_v9 }
 0x7bc   :  { %7817 = vmatprep.mubr.msk.f32.mxu0 %vm2417_vm9, %v9235_v16 }
 0x7bf   :  { %v2862_v10 = vpop.permute.xlu0 %2861 }
 0x7c0   :  { %v2870_v3 = vsel %vm11969_vm8, 0.0, %v2862_v10 }
 0x7c1   :  { %v2860_v11 = vpop.permute.xlu1 %2859  ;;  %v2874_v13 = vsel %vm1720_vm4, %v2870_v3, 0.0 }
 0x7c2   :  { %v2869_v17 = vsel %vm11970_vm10, 0.0, %v2860_v11  ;;  %2885 = vrot.lane.b32.xlu0 %v2874_v13, %s8130_s3 }
 0x7c3   :  { %v2858_v18 = vpop.permute.xlu0 %2857  ;;  %v2873_v23 = vsel %vm1720_vm4, %v2869_v17, 0.0 }
 0x7c4   :  { %v2868_v26 = vsel %vm11971_vm11, 0.0, %v2858_v18  ;;  %2883 = vrot.lane.b32.xlu1 %v2873_v23, %s8130_s3 }
 0x7c5   :  { %v2856_v28 = vpop.permute.xlu1 %2855  ;;  %v2872_v16 = vsel %vm1720_vm4, %v2868_v26, 0.0 }
 0x7c6   :  { %v2867_v30 = vsel %vm11972_vm12, 0.0, %v2856_v28  ;;  %2881 = vrot.lane.b32.xlu0 %v2872_v16, %s8130_s3 }
 0x7c7   :  { %v2871_v33 = vsel %vm1720_vm4, %v2867_v30, 0.0 }
 0x7c8   :  { %2879 = vrot.lane.b32.xlu1 %v2871_v33, %s8130_s3 }
 0x7ca   :  { %3067 = vrot.lane.b32.xlu0 %v2874_v13, %s8131_s26 }
 0x7cc   :  { %3065 = vrot.lane.b32.xlu1 %v2873_v23, %s8131_s26 }
 0x7ce   :  { %3063 = vrot.lane.b32.xlu0 %v2872_v16, %s8131_s26 }
 0x7d0   :  { %3061 = vrot.lane.b32.xlu1 %v2871_v33, %s8131_s26 }
 0x7d2   :  { %2727 = vperm.xlu0 %7992, %v2373_v7  }
 0x7d4   :  { %2732 = vperm.xlu1 %7993, %v2374_v35  }
 0x7d6   :  { %2737 = vperm.xlu0 %7992, %v2375_v36  }
 0x7d8   :  { %2742 = vperm.xlu1 %7993, %v2376_v39  }
 0x7da   :  { %3735 = vperm.xlu0 %7992, %v3363_v40  }
 0x7dc   :  { %3740 = vperm.xlu1 %7993, %v3364_v41  }
 0x7de   :  { %3745 = vperm.xlu0 %7992, %v3365_v42  }
 0x7e0   :  { %3750 = vperm.xlu1 %7993, %v3366_v45  }
 0x7fb   :  { %v7769_v20 = vpop.f32.mrf.mxu1 }
 0x7fd   :  { %v2593_v25 = vpop.f32.mrf.mxu1 }
 0x7ff   :  { %v7772_v29 = vpop.f32.mrf.mxu1 }
 0x801   :  { %v2603_v31 = vpop.f32.mrf.mxu1 }
 0x834   :  { %v2886_v46 = vpop.permute.xlu0 %2885 }
 0x835   :  { %7809 = vmatprep.subr.mxu0 %v2886_v46 }
 0x836   :  { %7810 = vmatpush3.msra.mxu0 %v2886_v46  ;;  %v2884_v37 = vpop.permute.xlu1 %2883 }
 0x837   :  { %7811 = vmatprep.subr.mxu0 %v2884_v37 }
 0x838   :  { %v2882_v48 = vpop.permute.xlu0 %2881  ;;  %7812 = vmatpush3.msra.mxu0 %v2884_v37 }
 0x839   :  { %7813 = vmatprep.subr.mxu0 %v2882_v48 }
 0x83a   :  { %7814 = vmatpush3.msra.mxu0 %v2882_v48  ;;  %v2880_v49 = vpop.permute.xlu1 %2879 }
 0x83b   :  { %7815 = vmatprep.subr.mxu0 %v2880_v49 }
 0x83c   :  { %v3068_v44 = vpop.permute.xlu0 %3067  ;;  %7816 = vmatpush3.msra.mxu0 %v2880_v49 }
 0x83d   :  { %7823 = vmatprep.subr.msk.mxu0 %vm1720_vm4, %v2870_v3  ;;  %7837 = vmatprep.subr.mxu1 %v3068_v44 }
 0x83e   :  { %7818 = vmatmul.mubr.msk.f32.vlgmr.msra.gmra.mxu0 %vm2417_vm9, %v9350_v52  ;;  %v3066_v1 = vpop.permute.xlu1 %3065 }
 0x83f   :  { %7824 = vmatpush3.msk.msra.mxu0 %vm1720_vm4, %v2870_v3  ;;  %7820 = vmatprep.mubr.msk.f32.mxu0 %vm2417_vm9, %v9355_v53 }
 0x840   :  { %7825 = vmatprep.subr.msk.mxu0 %vm1720_vm4, %v2869_v17  ;;  %v3064_v43 = vpop.permute.xlu0 %3063 }
 0x841   :  { %7826 = vmatpush3.msk.msra.mxu0 %vm1720_vm4, %v2869_v17 }
 0x842   :  { %7827 = vmatprep.subr.msk.mxu0 %vm1720_vm4, %v2868_v26  ;;  %7821 = vmatmul.mubr.msk.f32.gmra.mxu0 %vm2417_vm9, %v9364_v59  ;;  %v3062_v50 = vpop.permute.xlu1 %3061 }
 0x843   :  { %7828 = vmatpush3.msk.msra.mxu0 %vm1720_vm4, %v2868_v26  ;;  %7831 = vmatprep.mubr.msk.f32.mxu0 %vm2417_vm9, %v9240_v47 }
 0x844   :  { %7829 = vmatprep.subr.msk.mxu0 %vm1720_vm4, %v2867_v30 }
 0x845   :  { %7830 = vmatpush3.msk.msra.mxu0 %vm1720_vm4, %v2867_v30  ;;  %vm11973_vm4 = vmmov %vm11962_vm0 }
 0x846   :  { %7832 = vmatmul.mubr.msk.f32.vlgmr.msra.gmra.mxu0 %vm2417_vm9, %v9265_v12  ;;  %7851 = vmatprep.subr.msk.mxu0 %vm11963_vm3, %v8132_v63 }
 0x847   :  { %7834 = vmatprep.mubr.msk.f32.mxu0 %vm2417_vm9, %v9272_v14  ;;  %7852 = vmatpush3.msk.msra.mxu0 %vm11963_vm3, %v8132_v63  ;;  %vm11974_vm3 = vmmov %vm11962_vm0 }
 0x848   :  { %7853 = vmatprep.subr.msk.mxu0 %vm11964_vm6, %v8132_v63 }
 0x849   :  { %7854 = vmatpush3.msk.msra.mxu0 %vm11964_vm6, %v8132_v63  ;;  %vm11975_vm6 = vmmov %vm11962_vm0 }
 0x84a   :  { %7835 = vmatmul.mubr.msk.f32.gmra.mxu0 %vm2417_vm9, %v9287_v21  ;;  %7855 = vmatprep.subr.msk.mxu0 %vm11965_vm1, %v8132_v63 }
 0x84b   :  { %7856 = vmatpush3.msk.msra.mxu0 %vm11965_vm1, %v8132_v63 }
 0x84c   :  { %7857 = vmatprep.subr.msk.mxu0 %vm11966_vm2, %v8132_v63 }
 0x84d   :  { %7858 = vmatpush3.msk.msra.mxu0 %vm11966_vm2, %v8132_v63 }
 0x84e   :  { %7859 = vmatprep.subr.msk.mxu0 %vm11967_vm15, %v8132_v63 }
 0x84f   :  { %7860 = vmatpush3.msk.msra.mxu0 %vm11967_vm15, %v8132_v63  ;;  %v9520_v58 = vpop.permute.xlu1 %2732 }
 0x850   :  { %7861 = vmatprep.subr.msk.mxu0 %vm11968_vm7, %v8132_v63 }
 0x851   :  { %7862 = vmatpush3.msk.msra.mxu0 %vm11968_vm7, %v8132_v63 }
 0x852   :  { %7863 = vmatprep.subr.msk.mxu0 %vm11922_vm5, %v8132_v63 }
 0x853   :  { %7864 = vmatpush3.msk.msra.mxu0 %vm11922_vm5, %v8132_v63  ;;  %vm2745_vm5 = vcmask 523264   ;;  %v9526_v11 = vpop.permute.xlu1 %2742 }
 0x854   :  { %7865 = vmatprep.subr.msk.mxu0 %vm11925_vm13, %v8132_v63 }
 0x855   :  { %7866 = vmatpush3.msk.msra.mxu0 %vm11925_vm13, %v8132_v63  ;;  %vm3392_vm13 = vcmask 269312  }
 0x86f   :  { %v7755_v22 = vpop.f32.mrf.mxu0 }
 0x870   :  { %v2599_v21 = vadd.f32 %v7769_v20, %v7755_v22 }
 0x871   :  { %v2496_v24 = vpop.f32.mrf.mxu0 }
 0x872   :  { %v2594_v14 = vadd.f32 %v2593_v25, %v2496_v24  ;;  %v9552_v25 = vpop.permute.xlu1 %3740 }
 0x873   :  { %v7758_v27 = vpop.f32.mrf.mxu0 }
 0x874   :  { %v2609_v63 = vadd.f32 %v7772_v29, %v7758_v27 }
 0x875   :  { %v2506_v47 = vpop.f32.mrf.mxu0 }
 0x876   :  { %v2604_v2 = vadd.f32 %v2603_v31, %v2506_v47  ;;  %v9554_v27 = vpop.permute.xlu1 %3750 }
 0x877   :  { %v7783_v12 = vpop.f32.mrf.mxu0 }
 0x878   :  { %v2722_v15 = vadd.f32 %v7783_v12, %v2599_v21 }
 0x879   :  { %v2702_v61 = vpop.f32.mrf.mxu0 }
 0x87a   :  { %v2721_v0 = vadd.f32 %v2702_v61, %v2594_v14 }
 0x87b   :  { %v7786_v62 = vpop.f32.mrf.mxu0 }
 0x87c   :  { %7803 = vmatprep.mubr.msk.f32.mxu1 %vm2745_vm5, %v2721_v0  ;;  %v2724_v38 = vadd.f32 %v7786_v62, %v2609_v63 }
 0x87d   :  { %v2712_v32 = vpop.f32.mrf.mxu0  ;;  %7804 = vmatmul.mubr.msk.f32.vlgmr.msra.gmra.mxu1 %vm2745_vm5, %v2722_v15 }
 0x87e   :  { %v2723_v19 = vadd.f32 %v2712_v32, %v2604_v2  ;;  %7838 = vmatpush3.msra.mxu1 %v3068_v44 }
 0x87f   :  { %7839 = vmatprep.subr.mxu1 %v3066_v1 }
 0x880   :  { %7840 = vmatpush3.msra.mxu1 %v3066_v1  ;;  %7806 = vmatprep.mubr.msk.f32.mxu1 %vm2745_vm5, %v2723_v19 }
 0x881   :  { %7841 = vmatprep.subr.mxu1 %v3064_v43  ;;  %7807 = vmatmul.mubr.msk.f32.gmra.mxu1 %vm2745_vm5, %v2724_v38 }
 0x882   :  { %7842 = vmatpush3.msra.mxu1 %v3064_v43  ;;  %7845 = vmatprep.mubr.msk.f32.mxu1 %vm2417_vm9, %v9369_v56  ;;  %v9522_v56 = vpop.permute.xlu0 %2727 }
 0x883   :  { %7843 = vmatprep.subr.mxu1 %v3062_v50 }
 0x884   :  { %7844 = vmatpush3.msra.mxu1 %v3062_v50 }
 0x885   :  { %7846 = vmatmul.mubr.msk.f32.vlgmr.msra.gmra.mxu1 %vm2417_vm9, %v9378_v54 }
 0x886   :  { %7848 = vmatprep.mubr.msk.f32.mxu1 %vm2417_vm9, %v9383_v8  ;;  %v9533_v28 = vpop.permute.xlu0 %2737 }
 0x889   :  { %7849 = vmatmul.mubr.msk.f32.gmra.mxu1 %vm2417_vm9, %v9392_v9 }
 0x8fe   :  { %v7819_v51 = vpop.f32.mrf.mxu0 }
 0x900   :  { %v2957_v52 = vpop.f32.mrf.mxu0 }
 0x902   :  { %v7822_v53 = vpop.f32.mrf.mxu0 }
 0x904   :  { %v2967_v57 = vpop.f32.mrf.mxu0 }
 0x906   :  { %v7833_v59 = vpop.f32.mrf.mxu0 }
 0x907   :  { %v3048_v36 = vadd.f32 %v7833_v59, %v7819_v51 }
 0x908   :  { %v3042_v10 = vpop.f32.mrf.mxu0 }
 0x909   :  { %v3043_v30 = vadd.f32 %v3042_v10, %v2957_v52 }
 0x90a   :  { %v7836_v23 = vpop.f32.mrf.mxu0 }
 0x90b   :  { %v3058_v49 = vadd.f32 %v7836_v23, %v7822_v53 }
 0x90c   :  { %v3052_v39 = vpop.f32.mrf.mxu0 }
 0x90d   :  { %v3053_v37 = vadd.f32 %v3052_v39, %v2967_v57 }
 0x93d   :  { %v7805_v60 = vpop.f32.mrf.mxu1 }
 0x93e   :  { %v2830_v4 = vadd.f32 %v7805_v60, %v9520_v58 }
 0x93f   :  { %v2824_v54 = vpop.f32.mrf.mxu1 }
 0x940   :  { %v2844_v3 = vmul.f32 0.2, %v2830_v4  ;;  %v2825_v8 = vadd.f32 %v2824_v54, %v9522_v56 }
 0x941   :  { %v7808_v9 = vpop.f32.mrf.mxu1 }
 0x942   :  { %v9528_v13 = vmax.f32 %v2830_v4, %v2844_v3  ;;  %v2843_v17 = vmul.f32 0.2, %v2825_v8  ;;  %v2840_v18 = vadd.f32 %v7808_v9, %v9526_v11 }
 0x943   :  { %v2834_v26 = vpop.f32.mrf.mxu1 }
 0x944   :  { %3374 = vrot.lane.b32.xlu1 %v9528_v13, %s8129_s30  ;;  %v9535_v33 = vmax.f32 %v2825_v8, %v2843_v17  ;;  %v2846_v7 = vmul.f32 0.2, %v2840_v18  ;;  %v2835_v35 = vadd.f32 %v2834_v26, %v9533_v28 }
 0x945   :  { %v7847_v16 = vpop.f32.mrf.mxu1 }
 0x946   :  { %v3159_v42 = vadd.f32 %v7847_v16, %v3048_v36  ;;  %v9540_v46 = vmax.f32 %v2840_v18, %v2846_v7  ;;  %v2845_v48 = vmul.f32 0.2, %v2835_v35 }
 0x947   :  { %v3139_v40 = vpop.f32.mrf.mxu1 }
 0x948   :  { %v3158_v41 = vadd.f32 %v3139_v40, %v3043_v30  ;;  %3372 = vrot.lane.b32.xlu1 %v9535_v33, %s8129_s30  ;;  %v9546_v24 = vmax.f32 %v2835_v35, %v2845_v48 }
 0x949   :  { %v7850_v45 = vpop.f32.mrf.mxu1 }
 0x94a   :  { %7867 = vmatprep.mubr.msk.f32.mxu0 %vm2745_vm5, %v3158_v41  ;;  %v3161_v22 = vadd.f32 %v7850_v45, %v3058_v49 }
 0x94b   :  { %v3149_v44 = vpop.f32.mrf.mxu1  ;;  %7868 = vmatmul.mubr.msk.f32.vlgmr.msra.gmra.mxu0 %vm2745_vm5, %v3159_v42 }
 0x94c   :  { %v3160_v20 = vadd.f32 %v3149_v44, %v3053_v37  ;;  %3378 = vrot.lane.b32.xlu1 %v9540_v46, %s8129_s30 }
 0x94e   :  { %7870 = vmatprep.mubr.msk.f32.mxu0 %vm2745_vm5, %v3160_v20 }
 0x94f   :  { %7871 = vmatmul.mubr.msk.f32.gmra.mxu0 %vm2745_vm5, %v3161_v22  ;;  %vm11976_vm5 = vmmov %vm11962_vm0 }
 0x950   :  { %3376 = vrot.lane.b32.xlu1 %v9546_v24, %s8129_s30 }
 0x9b6   :  { %v3375_v29 = vpop.permute.xlu1 %3374 }
 0x9b7   :  { %v9557_v47 = vsel %vm11973_vm4, 0.0, %v3375_v29  ;;  %vm11977_vm4 = vmmov %vm11962_vm0 }
 0x9b8   :  { %v3394_v12 = vsel %vm3392_vm13, %v9557_v47, 0.0 }
 0x9b9   :  { %3405 = vrot.lane.b32.xlu1 %v3394_v12, %s8130_s3 }
 0x9ba   :  { %v3373_v14 = vpop.permute.xlu1 %3372 }
 0x9bb   :  { %v9563_v21 = vsel %vm11962_vm0, 0.0, %v3373_v14 }
 0x9bc   :  { %v3393_v0 = vsel %vm3392_vm13, %v9563_v21, 0.0 }
 0x9bd   :  { %3618 = vrot.lane.b32.xlu1 %v3394_v12, %s8131_s26 }
 0x9be   :  { %v3379_v31 = vpop.permute.xlu1 %3378 }
 0x9bf   :  { %v9567_v61 = vsel %vm11974_vm3, 0.0, %v3379_v31  ;;  %vm11978_vm3 = vmmov %vm11962_vm0 }
 0x9c0   :  { %v3396_v15 = vsel %vm3392_vm13, %v9567_v61, 0.0 }
 0x9c1   :  { %3403 = vrot.lane.b32.xlu1 %v3393_v0, %s8130_s3  ;;  %3622 = vrot.lane.b32.xlu0 %v3396_v15, %s8131_s26 }
 0x9c2   :  { %v3377_v62 = vpop.permute.xlu1 %3376 }
 0x9c3   :  { %v9577_v1 = vsel %vm11975_vm6, 0.0, %v3377_v62  ;;  %vm11979_vm6 = vmmov %vm11962_vm0 }
 0x9c4   :  { %v3395_v2 = vsel %vm3392_vm13, %v9577_v1, 0.0 }
 0x9c5   :  { %3616 = vrot.lane.b32.xlu1 %v3393_v0, %s8131_s26 }
 0x9c9   :  { %3409 = vrot.lane.b32.xlu1 %v3396_v15, %s8130_s3 }
 0x9cd   :  { %3407 = vrot.lane.b32.xlu1 %v3395_v2, %s8130_s3 }
 0x9d1   :  { %3620 = vrot.lane.b32.xlu1 %v3395_v2, %s8131_s26 }
 0xa0b   :  { %v7869_v63 = vpop.f32.mrf.mxu0 }
 0xa0c   :  { %v3246_v32 = vadd.f32 %v7869_v63, %v9520_v58 }
 0xa0d   :  { %v3240_v19 = vpop.f32.mrf.mxu0 }
 0xa0e   :  { %v3260_v38 = vmul.f32 0.2, %v3246_v32  ;;  %v3241_v43 = vadd.f32 %v3240_v19, %v9522_v56 }
 0xa0f   :  { %v7872_v50 = vpop.f32.mrf.mxu0 }
 0xa10   :  { %v3264_v51 = vmax.f32 %v3246_v32, %v3260_v38  ;;  %v3259_v52 = vmul.f32 0.2, %v3241_v43  ;;  %v3256_v53 = vadd.f32 %v7872_v50, %v9526_v11 }
 0xa11   :  { %v3250_v57 = vpop.f32.mrf.mxu0 }
 0xa12   :  { %v3268_v59 = vadd.f32 %v3264_v51, %v9528_v13  ;;  %v3263_v60 = vmax.f32 %v3241_v43, %v3259_v52  ;;  %v3262_v4 = vmul.f32 0.2, %v3256_v53  ;;  %v3251_v10 = vadd.f32 %v3250_v57, %v9533_v28  ;;  %3771 = vrot.lane.b32.xlu1 %v3264_v51, %s8129_s30 }
 0xa14   :  { %v3273_v54 = vmul.f32 0.5, %v3268_v59  ;;  %v3267_v58 = vadd.f32 %v3263_v60, %v9535_v33  ;;  %v3266_v3 = vmax.f32 %v3256_v53, %v3262_v4  ;;  %v3261_v8 = vmul.f32 0.2, %v3251_v10  ;;  %3769 = vrot.lane.b32.xlu0 %v3263_v60, %s8129_s30 }
 0xa16   :  { %v3277_v56 = vsub.f32 %v9528_v13, %v3273_v54  ;;  %v3285_v9 = vsub.f32 %v3264_v51, %v3273_v54  ;;  %v3272_v11 = vmul.f32 0.5, %v3267_v58  ;;  %v3270_v17 = vadd.f32 %v3266_v3, %v9540_v46  ;;  %3775 = vrot.lane.b32.xlu1 %v3266_v3, %s8129_s30 }
 0xa17   :  { %v3265_v18 = vmax.f32 %v3251_v10, %v3261_v8 }
 0xa18   :  { %v3281_v23 = vmul.f32 %v3277_v56, %v3277_v56  ;;  %v3289_v26 = vmul.f32 %v3285_v9, %v3285_v9  ;;  %v3276_v28 = vsub.f32 %v9535_v33, %v3272_v11  ;;  %v3284_v16 = vsub.f32 %v3263_v60, %v3272_v11 }
 0xa19   :  { %v3275_v30 = vmul.f32 0.5, %v3270_v17  ;;  %v3269_v7 = vadd.f32 %v3265_v18, %v9546_v24 }
 0xa1a   :  { %v3293_v35 = vadd.f32 %v3289_v26, %v3281_v23  ;;  %v3280_v36 = vmul.f32 %v3276_v28, %v3276_v28  ;;  %v3288_v39 = vmul.f32 %v3284_v16, %v3284_v16  ;;  %3773 = vrot.lane.b32.xlu1 %v3265_v18, %s8129_s30 }
 0xa1b   :  { %v3279_v13 = vsub.f32 %v9540_v46, %v3275_v30  ;;  %v3287_v40 = vsub.f32 %v3266_v3, %v3275_v30  ;;  %v3274_v41 = vmul.f32 0.5, %v3269_v7 }
 0xa1c   :  { %v3297_v42 = vmul.f32 0.5, %v3293_v35  ;;  %v3292_v45 = vadd.f32 %v3288_v39, %v3280_v36 }
 0xa1d   :  { %v3283_v37 = vmul.f32 %v3279_v13, %v3279_v13  ;;  %v3291_v48 = vmul.f32 %v3287_v40, %v3287_v40  ;;  %v3278_v49 = vsub.f32 %v9546_v24, %v3274_v41  ;;  %v3286_v33 = vsub.f32 %v3265_v18, %v3274_v41 }
 0xa1e   :  { %v3301_v44 = vadd.f32 1e-08, %v3297_v42  ;;  %v3296_v20 = vmul.f32 0.5, %v3292_v45 }
 0xa1f   :  { %v3295_v22 = vadd.f32 %v3291_v48, %v3283_v37  ;;  %v3282_v29 = vmul.f32 %v3278_v49, %v3278_v49  ;;  %v3290_v12 = vmul.f32 %v3286_v33, %v3286_v33  ;;  %v9609_v48 = vpop.permute.xlu0 %3735 }
 0xa20   :  { %7994 = vrsqrt.f32 %v3301_v44  ;;  %v3300_v14 = vadd.f32 1e-08, %v3296_v20  ;;  %vm3313_vm1 = vcmp.eq.f32.partialorder %v3301_v44, inf  ;;  %v3316_v51 = vand.u32 2147483648, %v3301_v44 }
 0xa21   :  { %v3299_v31 = vmul.f32 0.5, %v3295_v22  ;;  %v3294_v0 = vadd.f32 %v3290_v12, %v3282_v29  ;;  %vm3315_vm7 = vcmp.eq.f32.partialorder %v3301_v44, 0.0 }
 0xa22   :  { %7996 = vrsqrt.f32 %v3300_v14  ;;  %vm3306_vm2 = vcmp.eq.f32.partialorder %v3300_v14, inf  ;;  %v3309_v19 = vand.u32 2147483648, %v3300_v14  ;;  %vm3308_vm15 = vcmp.eq.f32.partialorder %v3300_v14, 0.0 }
 0xa23   :  { %v3303_v46 = vadd.f32 1e-08, %v3299_v31  ;;  %v3298_v15 = vmul.f32 0.5, %v3294_v0  ;;  %v9611_v33 = vpop.permute.xlu0 %3745 }
 0xa25   :  { %7998 = vrsqrt.f32 %v3303_v46  ;;  %v3302_v62 = vadd.f32 1e-08, %v3298_v15  ;;  %vm3327_vm8 = vcmp.eq.f32.partialorder %v3303_v46, inf  ;;  %v3330_v58 = vand.u32 2147483648, %v3303_v46 }
 0xa26   :  { %vm3329_vm12 = vcmp.eq.f32.partialorder %v3303_v46, 0.0 }
 0xa27   :  { %8000 = vrsqrt.f32 %v3302_v62  ;;  %vm3320_vm10 = vcmp.eq.f32.partialorder %v3302_v62, inf  ;;  %v3323_v54 = vand.u32 2147483648, %v3302_v62  ;;  %vm3322_vm11 = vcmp.eq.f32.partialorder %v3302_v62, 0.0 }
 0xa2b   :  { %v3406_v40 = vpop.permute.xlu1 %3405 }
 0xa2d   :  { %v7995_v2 = vpop.eup %7994 }
 0xa2e   :  { %v3312_v63 = vmul.f32 %v7995_v2, %v3301_v44 }
 0xa2f   :  { %v7997_v32 = vpop.eup %7996  ;;  %v9605_v41 = vpop.permute.xlu1 %3618 }
 0xa30   :  { %v3305_v24 = vmul.f32 %v7997_v32, %v3300_v14  ;;  %v3314_v38 = vsel %vm3313_vm1, %v3301_v44, %v3312_v63  ;;  %vm3429_vm1 = vcmask 1040384  }
 0xa31   :  { %v3317_v59 = vsel %vm3315_vm7, %v3316_v51, %v3314_v38  ;;  %v9651_v51 = vld [vmem:[%s11759_s13 + $0x20] sm:$0xff]  ;;  %vm5476_vm7 = vcmask 1042434  }
 0xa32   :  { %v7999_v43 = vpop.eup %7998  ;;  %v3307_v50 = vsel %vm3306_vm2, %v3300_v14, %v3305_v24  ;;  %v3333_v8 = vsel %vm2417_vm9, %v3317_v59, 0.0  ;;  %7883 = vmatprep.mubr.msk.f32.mxu1 %vm3392_vm13, %v9651_v51  ;;  %v9661_v59 = vld [vmem:[%s11759_s13 + $0x40] sm:$0xff]  ;;  %vm4883_vm2 = vcmask 261312  }
 0xa33   :  { %v3310_v52 = vsel %vm3308_vm15, %v3309_v19, %v3307_v50  ;;  %v3326_v53 = vmul.f32 %v7999_v43, %v3303_v46  ;;  %v3404_v42 = vpop.permute.xlu1 %3403  ;;  %v3623_v20 = vpop.permute.xlu0 %3622  ;;  %7915 = vmatprep.mubr.msk.f32.mxu0 %vm3392_vm13, %v9661_v59  ;;  %vm5474_vm15 = vcmask 1041409  }
 0xa34   :  { %v8001_v57 = vpop.eup %8000  ;;  %v3332_v10 = vsel %vm2417_vm9, %v3310_v52, 0.0 }
 0xa35   :  { %v3319_v60 = vmul.f32 %v8001_v57, %v3302_v62  ;;  %v3328_v4 = vsel %vm3327_vm8, %v3303_v46, %v3326_v53  ;;  %v3334_v11 = vadd.f32 %v3333_v8, %v3332_v10  ;;  %v9699_v8 = vld [vmem:[%s11759_s13 + $0x48] sm:$0xff]  ;;  %vm5478_vm8 = vcmask 1043459  }
 0xa36   :  { %v3331_v9 = vsel %vm3329_vm12, %v3330_v58, %v3328_v4  ;;  %vm5484_vm12 = vcmask 1046534  }
 0xa37   :  { %v3321_v3 = vsel %vm3320_vm10, %v3302_v62, %v3319_v60  ;;  %v3337_v23 = vsel %vm2417_vm9, %v3331_v9, 0.0  ;;  %v9607_v45 = vpop.permute.xlu1 %3616  ;;  %vm5480_vm10 = vcmask 1044484  }
 0xa38   :  { %v3324_v56 = vsel %vm3322_vm11, %v3323_v54, %v3321_v3  ;;  %v9679_v54 = vld [vmem:[%s11759_s13 + $0x28] sm:$0xff]  ;;  %v3357_v3 = vld [vmem:[%s11759_s13 + $0x30] sm:$0xff]  ;;  %vm5482_vm11 = vcmask 1045509  }
 0xa39   :  { %v3335_v17 = vsel %vm2417_vm9, %v3324_v56, 0.0  ;;  %v3358_v56 = vld [vmem:[%s11759_s13 + $0x38] sm:$0xff] }
 0xa3a   :  { %v3336_v18 = vadd.f32 %v3335_v17, %v3334_v11  ;;  %v3361_v17 = vld [vmem:[%s11759_s13 + $0x50] sm:$0xff] }
 0xa3b   :  { %v3410_v37 = vpop.permute.xlu1 %3409 }
 0xa3c   :  { %v3338_v26 = vadd.f32 %v3337_v23, %v3336_v18  ;;  %v3362_v18 = vld [vmem:[%s11759_s13 + $0x58] sm:$0xff] }
 0xa3e   :  { %v3339_v28 = vrot.slane %v3338_v26, 4 }
 0xa3f   :  { %v3408_v49 = vpop.permute.xlu1 %3407 }
 0xa40   :  { %v3340_v16 = vadd.f32 %v3339_v28, %v3338_v26 }
 0xa42   :  { %v3341_v30 = vrot.slane %v3340_v16, 2 }
 0xa43   :  { %v3621_v44 = vpop.permute.xlu1 %3620 }
 0xa44   :  { %v3342_v7 = vadd.f32 %v3341_v30, %v3340_v16 }
 0xa46   :  { %v3343_v35 = vrot.slane %v3342_v7, 1 }
 0xa48   :  { %v3344_v36 = vadd.f32 %v3343_v35, %v3342_v7 }
 0xa4a   :  { %v3346_v39 = vmul.f32 0.03125, %v3344_v36 }
 0xa4c   :  { %v3347_v13 = vsel %vm2417_vm9, %v3346_v39, 0.0 }
 0xa4d   :  { %3348 = vadd.xlane.f32.xlu0 %v3347_v13 }
 0xa84   :  { %v3772_v22 = vpop.permute.xlu1 %3771 }
 0xa85   :  { %v9614_v29 = vsel %vm11976_vm5, 0.0, %v3772_v22  ;;  %v4197_v22 = vld [vmem:[#allocation3 + $0x368] sm:$0xff]  ;;  %vm5486_vm5 = vcmask 1047559  }
 0xa86   :  { %v3770_v12 = vpop.permute.xlu0 %3769  ;;  %v3786_v14 = vsel %vm3392_vm13, %v9614_v29, 0.0 }
 0xa87   :  { %v9619_v31 = vsel %vm11977_vm4, 0.0, %v3770_v12  ;;  %3795 = vrot.lane.b32.xlu0 %v3786_v14, %s8130_s3  ;;  %vm12122_vm4 = vmmov %vm11962_vm0 }
 0xa88   :  { %v3776_v0 = vpop.permute.xlu1 %3775  ;;  %v3785_v46 = vsel %vm3392_vm13, %v9619_v31, 0.0 }
 0xa89   :  { %3793 = vrot.lane.b32.xlu1 %v3785_v46, %s8130_s3  ;;  %v9626_v15 = vsel %vm11962_vm0, 0.0, %v3776_v0 }
 0xa8a   :  { %v3788_v63 = vsel %vm3392_vm13, %v9626_v15, 0.0 }
 0xa8b   :  { %3977 = vrot.lane.b32.xlu0 %v3786_v14, %s8131_s26 }
 0xa8c   :  { %v3774_v62 = vpop.permute.xlu1 %3773 }
 0xa8d   :  { %v9630_v2 = vsel %vm11978_vm3, 0.0, %v3774_v62  ;;  %3975 = vrot.lane.b32.xlu1 %v3785_v46, %s8131_s26  ;;  %vm12124_vm3 = vmmov %vm11962_vm0 }
 0xa8e   :  { %v3787_v32 = vsel %vm3392_vm13, %v9630_v2, 0.0 }
 0xa8f   :  { %3799 = vrot.lane.b32.xlu0 %v3788_v63, %s8130_s3 }
 0xa91   :  { %3979 = vrot.lane.b32.xlu1 %v3787_v32, %s8131_s26 }
 0xa93   :  { %3981 = vrot.lane.b32.xlu0 %v3788_v63, %s8131_s26  ;;  %v4097_v63 = vld [vmem:[#allocation3 + $0x48] sm:$0xff] }
 0xa97   :  { %3797 = vrot.lane.b32.xlu0 %v3787_v32, %s8130_s3 }
 0xad6   :  { %v3349_v24 = vpop.xlane.xlu0 %3348 }
 0xad7   :  { %v3350_v19 = vmul.f32 0.03125, %v3349_v24 }
 0xad9   :  { %3380 = vrot.lane.b32.xlu1 %v3350_v19, %s8129_s30 }
 0xaf9   :  { %v9668_v4 = vpop.permute.xlu0 %3795 }
 0xafb   :  { %v9642_v38 = vpop.permute.xlu1 %3793 }
 0xafd   :  { %v9681_v58 = vpop.permute.xlu0 %3977 }
 0xaff   :  { %v9644_v43 = vpop.permute.xlu1 %3975 }
 0xb01   :  { %v3800_v9 = vpop.permute.xlu0 %3799 }
 0xb03   :  { %v9646_v50 = vpop.permute.xlu1 %3979 }
 0xb05   :  { %v3982_v11 = vpop.permute.xlu0 %3981 }
 0xb09   :  { %v3798_v23 = vpop.permute.xlu0 %3797 }
 0xb4b   :  { %v3381_v52 = vpop.permute.xlu1 %3380 }
 0xb4c   :  { %v3391_v53 = vsel %vm11979_vm6, 0.0, %v3381_v52  ;;  %vm12125_vm6 = vmmov %vm11962_vm0 }
 0xb4d   :  { %v3397_v57 = vsel %vm3392_vm13, %v3391_v53, 0.0 }
 0xb4e   :  { %3411 = vrot.lane.b32.xlu1 %v3397_v57, %s8130_s3 }
 0xb52   :  { %3624 = vrot.lane.b32.xlu1 %v3397_v57, %s8131_s26  ;;  %s8136_s26 = smov [#allocation6]  }
 0xb53   :  { %s6945_s9 = sshll.u32 %s8136_s26, 4  ;;  %s6946_s9 = int_to_ptr.vmem [resolvable:$true] %s6945_s9 }
 0xb54   :  { %s8101_s1 = scalar_lea.vmem %s6946_s9, 16  ;;  %s8105_s10 = scalar_lea.vmem %s6946_s9, 32 }
 0xb55   :  { %p8102_p5 = scmp.ne.s32.totalorder %s6946_s9, %s8101_s1  ;;  %p8106_p6 = scmp.lt.s32.totalorder %s6946_s9, %s6946_s9 }
 0xb56   :  { %p8107_p7 = scmp.lt.s32.totalorder %s8105_s10, %s8101_s1 }
 0xb58   :  { %p8108_p8 = por %p8107_p7, %p8106_p6 }
 0xb5a   :  { %p8109_p9 = pnand %p8108_p8, %p8102_p5 }
 0xbc0   :  { %v3412_v60 = vpop.permute.xlu1 %3411 }
 0xbc1   :  { %7873 = vmatprep.subr.msk.mxu1 %vm3429_vm1, %v3412_v60 }
 0xbc2   :  { %7874 = vmatpush3.msk.msra.mxu1 %vm3429_vm1, %v3412_v60 }
 0xbc3   :  { %7875 = vmatprep.subr.mxu1 %v3410_v37 }
 0xbc4   :  { %7876 = vmatpush3.msra.mxu1 %v3410_v37  ;;  %v9670_v10 = vpop.permute.xlu1 %3624 }
 0xbc5   :  { %7877 = vmatprep.subr.mxu1 %v3408_v49  ;;  %7905 = vmatprep.subr.msk.mxu0 %vm3429_vm1, %v9670_v10 }
 0xbc6   :  { %7878 = vmatpush3.msra.mxu1 %v3408_v49  ;;  %7906 = vmatpush3.msk.msra.mxu0 %vm3429_vm1, %v9670_v10  ;;  %v4193_v49 = vld [vmem:[#allocation3 + $0x348] sm:$0xff] }
 0xbc7   :  { %7879 = vmatprep.subr.mxu1 %v3406_v40  ;;  %7907 = vmatprep.subr.mxu0 %v3623_v20 }
 0xbc8   :  { %7880 = vmatpush3.msra.mxu1 %v3406_v40  ;;  %7908 = vmatpush3.msra.mxu0 %v3623_v20 }
 0xbc9   :  { %7881 = vmatprep.subr.mxu1 %v3404_v42  ;;  %7909 = vmatprep.subr.mxu0 %v3621_v44 }
 0xbca   :  { %7882 = vmatpush3.msra.mxu1 %v3404_v42  ;;  %7910 = vmatpush3.msra.mxu0 %v3621_v44  ;;  %v4089_v44 = vld [vmem:[#allocation3 + $0x8] sm:$0xff] }
 0xbcb   :  { %7889 = vmatprep.subr.msk.mxu1 %vm3429_vm1, %v3397_v57  ;;  %7911 = vmatprep.subr.mxu0 %v9605_v41 }
 0xbcc   :  { %7884 = vmatmul.mubr.msk.f32.vlgmr.msra.gmra.mxu1 %vm3392_vm13, %v9679_v54  ;;  %7912 = vmatpush3.msra.mxu0 %v9605_v41 }
 0xbcd   :  { %7890 = vmatpush3.msk.msra.mxu1 %vm3429_vm1, %v3397_v57  ;;  %7913 = vmatprep.subr.mxu0 %v9607_v45 }
 0xbce   :  { %7891 = vmatprep.subr.msk.mxu1 %vm3392_vm13, %v9567_v61  ;;  %7914 = vmatpush3.msra.mxu0 %v9607_v45 }
 0xbcf   :  { %7892 = vmatpush3.msk.msra.mxu1 %vm3392_vm13, %v9567_v61  ;;  %7937 = vmatprep.subr.msk.mxu0 %vm3429_vm1, %v3397_v57  ;;  %v3351_v61 = vld [vmem:[%s11759_s13] sm:$0xff] }
 0xbd0   :  { %7893 = vmatprep.subr.msk.mxu1 %vm3392_vm13, %v9577_v1  ;;  %7886 = vmatprep.mubr.msk.f32.mxu1 %vm3392_vm13, %v3357_v3 }
 0xbd1   :  { %7894 = vmatpush3.msk.msra.mxu1 %vm3392_vm13, %v9577_v1  ;;  %7916 = vmatmul.mubr.msk.f32.vlgmr.msra.gmra.mxu0 %vm3392_vm13, %v9699_v8  ;;  %v3352_v1 = vld [vmem:[%s11759_s13 + $0x8] sm:$0xff] }
 0xbd2   :  { %7938 = vmatpush3.msk.msra.mxu0 %vm3429_vm1, %v3397_v57  ;;  %7887 = vmatmul.mubr.msk.f32.gmra.mxu1 %vm3392_vm13, %v3358_v56 }
 0xbd3   :  { %7895 = vmatprep.subr.msk.mxu1 %vm3392_vm13, %v9557_v47  ;;  %7939 = vmatprep.subr.msk.mxu0 %vm3392_vm13, %v9626_v15 }
 0xbd4   :  { %7896 = vmatpush3.msk.msra.mxu1 %vm3392_vm13, %v9557_v47  ;;  %7940 = vmatpush3.msk.msra.mxu0 %vm3392_vm13, %v9626_v15  ;;  %v3353_v47 = vld [vmem:[%s11759_s13 + $0x10] sm:$0xff] }
 0xbd5   :  { %7897 = vmatprep.subr.msk.mxu1 %vm3392_vm13, %v9563_v21  ;;  %7941 = vmatprep.subr.msk.mxu0 %vm3392_vm13, %v9630_v2 }
 0xbd6   :  { %7898 = vmatpush3.msk.msra.mxu1 %vm3392_vm13, %v9563_v21  ;;  %7899 = vmatprep.mubr.msk.f32.mxu1 %vm3392_vm13, %v3351_v61  ;;  %v3354_v21 = vld [vmem:[%s11759_s13 + $0x18] sm:$0xff] }
 0xbd7   :  { %7942 = vmatpush3.msk.msra.mxu0 %vm3392_vm13, %v9630_v2  ;;  %7900 = vmatmul.mubr.msk.f32.vlgmr.msra.gmra.mxu1 %vm3392_vm13, %v3352_v1  ;;  %v4209_v2 = vld [vmem:[#allocation3 + $0x3c8] sm:$0xff] }
 0xbd8   :  { %7921 = vmatprep.subr.msk.mxu1 %vm3429_vm1, %v3412_v60  ;;  %7943 = vmatprep.subr.msk.mxu0 %vm3392_vm13, %v9614_v29 }
 0xbd9   :  { %7922 = vmatpush3.msk.msra.mxu1 %vm3429_vm1, %v3412_v60  ;;  %7944 = vmatpush3.msk.msra.mxu0 %vm3392_vm13, %v9614_v29  ;;  %v4093_v29 = vld [vmem:[#allocation3 + $0x28] sm:$0xff] }
 0xbda   :  { %7923 = vmatprep.subr.mxu1 %v3800_v9  ;;  %7945 = vmatprep.subr.msk.mxu0 %vm3392_vm13, %v9619_v31 }
 0xbdb   :  { %7902 = vmatprep.mubr.msk.f32.mxu1 %vm3392_vm13, %v3353_v47  ;;  %7924 = vmatpush3.msra.mxu1 %v3800_v9  ;;  %v4092_v9 = vld [vmem:[#allocation3 + $0x20] sm:$0xff] }
 0xbdc   :  { %7946 = vmatpush3.msk.msra.mxu0 %vm3392_vm13, %v9619_v31  ;;  %7903 = vmatmul.mubr.msk.f32.gmra.mxu1 %vm3392_vm13, %v3354_v21 }
 0xbdd   :  { %7925 = vmatprep.subr.mxu1 %v3798_v23  ;;  %7918 = vmatprep.mubr.msk.f32.mxu0 %vm3392_vm13, %v3361_v17 }
 0xbde   :  { %7926 = vmatpush3.msra.mxu1 %v3798_v23  ;;  %7919 = vmatmul.mubr.msk.f32.gmra.mxu0 %vm3392_vm13, %v3362_v18 }
 0xbdf   :  { %7927 = vmatprep.subr.mxu1 %v9668_v4  ;;  %7931 = vmatprep.mubr.msk.f32.mxu1 %vm3392_vm13, %v9651_v51  ;;  %v4101_v51 = vld [vmem:[#allocation3 + $0x68] sm:$0xff] }
 0xbe0   :  { %7928 = vmatpush3.msra.mxu1 %v9668_v4  ;;  %7947 = vmatprep.mubr.msk.f32.mxu0 %vm3392_vm13, %v3351_v61  ;;  %v4105_v4 = vld [vmem:[#allocation3 + $0x88] sm:$0xff] }
 0xbe1   :  { %7929 = vmatprep.subr.mxu1 %v9642_v38  ;;  %7969 = vmatprep.subr.mxu0 %v11802_v34 }
 0xbe2   :  { %7930 = vmatpush3.msra.mxu1 %v9642_v38  ;;  %7948 = vmatmul.mubr.msk.f32.vlgmr.msra.gmra.mxu0 %vm3392_vm13, %v3352_v1 }
 0xbe3   :  { %7953 = vmatprep.subr.msk.mxu1 %vm3429_vm1, %v9670_v10  ;;  %7932 = vmatmul.mubr.msk.f32.vlgmr.msra.gmra.mxu1 %vm3392_vm13, %v9679_v54 }
 0xbe4   :  { %7954 = vmatpush3.msk.msra.mxu1 %vm3429_vm1, %v9670_v10  ;;  %7934 = vmatprep.mubr.msk.f32.mxu1 %vm3392_vm13, %v3357_v3  ;;  %v4088_v10 = vld [vmem:[#allocation3] sm:$0xff]  ;;  %vm6937_vm1 = vcmask 8192  }
 0xbe5   :  { %7955 = vmatprep.subr.mxu1 %v3982_v11  ;;  %7950 = vmatprep.mubr.msk.f32.mxu0 %vm3392_vm13, %v3353_v47 }
 0xbe6   :  { %7956 = vmatpush3.msra.mxu1 %v3982_v11  ;;  %7951 = vmatmul.mubr.msk.f32.gmra.mxu0 %vm3392_vm13, %v3354_v21  ;;  %v4113_v21 = vld [vmem:[#allocation3 + $0xc8] sm:$0xff] }
 0xbe7   :  { %7957 = vmatprep.subr.mxu1 %v9646_v50  ;;  %7935 = vmatmul.mubr.msk.f32.gmra.mxu1 %vm3392_vm13, %v3358_v56  ;;  %v4109_v56 = vld [vmem:[#allocation3 + $0xa8] sm:$0xff] }
 0xbe8   :  { %7958 = vmatpush3.msra.mxu1 %v9646_v50  ;;  %7963 = vmatprep.mubr.msk.f32.mxu1 %vm3392_vm13, %v9661_v59  ;;  %v4213_v50 = vld [vmem:[#allocation3 + $0x3e8] sm:$0xff] }
 0xbe9   :  { %7959 = vmatprep.subr.mxu1 %v9681_v58  ;;  %7977 = vmatprep.mubr.msk.f32.mxu0 %vm11928_vm14, %v11802_v34  ;;  %vm4869_vm14 = vcmask 130112  }
 0xbea   :  { %7960 = vmatpush3.msra.mxu1 %v9681_v58 }
 0xbeb   :  { %7961 = vmatprep.subr.mxu1 %v9644_v43 }
 0xbec   :  { %7962 = vmatpush3.msra.mxu1 %v9644_v43 }
 0xbed   :  { %7964 = vmatmul.mubr.msk.f32.vlgmr.msra.gmra.mxu1 %vm3392_vm13, %v9699_v8 }
 0xbee   :  { %7966 = vmatprep.mubr.msk.f32.mxu1 %vm3392_vm13, %v3361_v17  ;;  %v4096_v17 = vld [vmem:[#allocation3 + $0x40] sm:$0xff] }
 0xbf1   :  { %7967 = vmatmul.mubr.msk.f32.gmra.mxu1 %vm3392_vm13, %v3362_v18  ;;  %vm4876_vm13 = vcmask 195712  }
 0xc8c   :  { %v7885_v26 = vpop.f32.mrf.mxu1 }
 0xc8e   :  { %v3498_v28 = vpop.f32.mrf.mxu1 }
 0xc91   :  { %v7917_v39 = vpop.f32.mrf.mxu0 }
 0xc92   :  { %v9799_v16 = vpop.f32.mrf.mxu1 }
 0xc93   :  { %v3710_v45 = vpop.f32.mrf.mxu0 }
 0xc94   :  { %v9801_v30 = vpop.f32.mrf.mxu1 }
 0xc97   :  { %v7901_v7 = vpop.f32.mrf.mxu1 }
 0xc98   :  { %v3603_v35 = vadd.f32 %v7901_v7, %v7885_v26  ;;  %v4117_v7 = vld [vmem:[#allocation3 + $0xe8] sm:$0xff] }
 0xc99   :  { %v3597_v36 = vpop.f32.mrf.mxu1 }
 0xc9a   :  { %v3730_v13 = vadd.f32 %v7917_v39, %v3603_v35  ;;  %v3598_v40 = vadd.f32 %v3597_v36, %v3498_v28  ;;  %v4100_v35 = vld [vmem:[#allocation3 + $0x60] sm:$0xff] }
 0xc9c   :  { %v3754_v41 = vadd.f32 %v9552_v25, %v3730_v13  ;;  %v3729_v37 = vadd.f32 %v3710_v45, %v3598_v40 }
 0xc9e   :  { %v3758_v42 = vmul.f32 0.2, %v3754_v41  ;;  %v3753_v31 = vadd.f32 %v9609_v48, %v3729_v37 }
 0xca0   :  { %v9804_v20 = vmax.f32 %v3754_v41, %v3758_v42  ;;  %v3757_v32 = vmul.f32 0.2, %v3753_v31  ;;  %v4121_v41 = vld [vmem:[#allocation3 + $0x108] sm:$0xff]  ;;  %v4104_v42 = vld [vmem:[#allocation3 + $0x80] sm:$0xff] }
 0xca2   :  { %v4325_v12 = vmul.f32 %v4193_v49, %v9804_v20  ;;  %v4221_v14 = vmul.f32 %v4089_v44, %v9804_v20  ;;  %v4329_v15 = vmul.f32 %v4197_v22, %v9804_v20  ;;  %v4225_v62 = vmul.f32 %v4093_v29, %v9804_v20  ;;  %v4125_v22 = vld [vmem:[#allocation3 + $0x128] sm:$0xff]  ;;  %v4108_v29 = vld [vmem:[#allocation3 + $0xa0] sm:$0xff] }
 0xca3   :  { %v4341_v38 = vmul.f32 %v4209_v2, %v9804_v20  ;;  %v4229_v43 = vmul.f32 %v4097_v63, %v9804_v20  ;;  %v9817_v52 = vmax.f32 %v3753_v31, %v3757_v32  ;;  %v4345_v59 = vmul.f32 %v4213_v50, %v9804_v20 }
 0xca4   :  { %v4663_v0 = vsel %vm2417_vm9, %v4325_v12, 0.0  ;;  %v4351_v46 = vsel %vm2417_vm9, %v4221_v14, 0.0  ;;  %v4675_v24 = vsel %vm2417_vm9, %v4329_v15, 0.0  ;;  %v4363_v19 = vsel %vm2417_vm9, %v4225_v62, 0.0  ;;  %v4112_v15 = vld [vmem:[#allocation3 + $0xc0] sm:$0xff] }
 0xca5   :  { %4664 = vadd.xlane.f32.xlu0 %v4663_v0  ;;  %4352 = vadd.xlane.f32.xlu1 %v4351_v46  ;;  %v4711_v53 = vsel %vm2417_vm9, %v4341_v38, 0.0  ;;  %v4375_v57 = vsel %vm2417_vm9, %v4229_v43, 0.0  ;;  %v4233_v60 = vmul.f32 %v4101_v51, %v9804_v20  ;;  %v4723_v54 = vsel %vm2417_vm9, %v4345_v59, 0.0  ;;  %v4129_v46 = vld [vmem:[#allocation3 + $0x148] sm:$0xff]  ;;  %v9851_v38 = vpop.f32.mrf.mxu1  ;;  %v4120_v59 = vld [vmem:[#allocation3 + $0x100] sm:$0xff] }
 0xca6   :  { %v4237_v3 = vmul.f32 %v4105_v4, %v9804_v20  ;;  %v4220_v8 = vmul.f32 %v4088_v10, %v9817_v52  ;;  %v4241_v11 = vmul.f32 %v4109_v56, %v9804_v20  ;;  %v4224_v47 = vmul.f32 %v4092_v9, %v9817_v52  ;;  %v4124_v56 = vld [vmem:[#allocation3 + $0x120] sm:$0xff] }
 0xca7   :  { %v4387_v58 = vsel %vm2417_vm9, %v4233_v60, 0.0  ;;  %v4245_v26 = vmul.f32 %v4113_v21, %v9804_v20  ;;  %v4228_v28 = vmul.f32 %v4096_v17, %v9817_v52  ;;  %v4249_v13 = vmul.f32 %v4117_v7, %v9804_v20  ;;  %v9857_v60 = vpop.f32.mrf.mxu1  ;;  %v4145_v21 = vld [vmem:[#allocation3 + $0x1c8] sm:$0xff]  ;;  %v4128_v17 = vld [vmem:[#allocation3 + $0x140] sm:$0xff] }
 0xca8   :  { %v4399_v61 = vsel %vm2417_vm9, %v4237_v3, 0.0  ;;  %v4348_v1 = vsel %vm2417_vm9, %v4220_v8, 0.0  ;;  %v4411_v18 = vsel %vm2417_vm9, %v4241_v11, 0.0  ;;  %v4360_v23 = vsel %vm2417_vm9, %v4224_v47, 0.0  ;;  %v4141_v8 = vld [vmem:[#allocation3 + $0x1a8] sm:$0xff] }
 0xca9   :  { %4676 = vadd.xlane.f32.xlu0 %v4675_v24  ;;  %4364 = vadd.xlane.f32.xlu1 %v4363_v19  ;;  %v4423_v36 = vsel %vm2417_vm9, %v4245_v26, 0.0  ;;  %v4372_v39 = vsel %vm2417_vm9, %v4228_v28, 0.0  ;;  %v4232_v40 = vmul.f32 %v4100_v35, %v9817_v52  ;;  %v4435_v45 = vsel %vm2417_vm9, %v4249_v13, 0.0  ;;  %v4133_v24 = vld [vmem:[#allocation3 + $0x168] sm:$0xff]  ;;  %v4116_v19 = vld [vmem:[#allocation3 + $0xe0] sm:$0xff]  ;;  %v9859_v4 = vpop.f32.mrf.mxu1 }
 0xcaa   :  { %v4253_v49 = vmul.f32 %v4121_v41, %v9804_v20  ;;  %v4236_v44 = vmul.f32 %v4104_v42, %v9817_v52  ;;  %v4257_v31 = vmul.f32 %v4125_v22, %v9804_v20  ;;  %v4240_v0 = vmul.f32 %v4108_v29, %v9817_v52  ;;  %v4136_v22 = vld [vmem:[#allocation3 + $0x180] sm:$0xff] }
 0xcab   :  { %v4384_v37 = vsel %vm2417_vm9, %v4232_v40, 0.0  ;;  %v4261_v63 = vmul.f32 %v4129_v46, %v9804_v20  ;;  %v4244_v32 = vmul.f32 %v4112_v15, %v9817_v52  ;;  %v4265_v51 = vmul.f32 %v4133_v24, %v9804_v20  ;;  %v3871_v9 = vpop.f32.mrf.mxu1  ;;  %v4157_v15 = vld [vmem:[#allocation3 + $0x228] sm:$0xff] }
 0xcac   :  { %v4447_v12 = vsel %vm2417_vm9, %v4253_v49, 0.0  ;;  %v4396_v14 = vsel %vm2417_vm9, %v4236_v44, 0.0  ;;  %v4459_v62 = vsel %vm2417_vm9, %v4257_v31, 0.0  ;;  %v4408_v2 = vsel %vm2417_vm9, %v4240_v0, 0.0  ;;  %v4153_v44 = vld [vmem:[#allocation3 + $0x208] sm:$0xff] }
 0xcad   :  { %4712 = vadd.xlane.f32.xlu0 %v4711_v53  ;;  %4376 = vadd.xlane.f32.xlu1 %v4375_v57  ;;  %v4471_v43 = vsel %vm2417_vm9, %v4261_v63, 0.0  ;;  %v4420_v50 = vsel %vm2417_vm9, %v4244_v32, 0.0  ;;  %v4248_v53 = vmul.f32 %v4116_v19, %v9817_v52  ;;  %v4137_v57 = vld [vmem:[#allocation3 + $0x188] sm:$0xff]  ;;  %v4483_v10 = vsel %vm2417_vm9, %v4265_v51, 0.0  ;;  %v4144_v51 = vld [vmem:[#allocation3 + $0x1c0] sm:$0xff] }
 0xcae   :  { %v4252_v3 = vmul.f32 %v4120_v59, %v9817_v52  ;;  %v4273_v11 = vmul.f32 %v4141_v8, %v9804_v20  ;;  %v4256_v47 = vmul.f32 %v4124_v56, %v9817_v52  ;;  %v4277_v7 = vmul.f32 %v4145_v21, %v9804_v20 }
 0xcaf   :  { %v4260_v35 = vmul.f32 %v4128_v17, %v9817_v52  ;;  %v4285_v0 = vmul.f32 %v4153_v44, %v9804_v20  ;;  %v4268_v46 = vmul.f32 %v4136_v22, %v9817_v52  ;;  %v4289_v19 = vmul.f32 %v4157_v15, %v9804_v20  ;;  %v9921_v15 = vld [vmem:[#allocation3 + $0x300] sm:$0xff] }
 0xcb0   :  { %v4507_v26 = vsel %vm2417_vm9, %v4273_v11, 0.0  ;;  %v4456_v28 = vsel %vm2417_vm9, %v4256_v47, 0.0  ;;  %v4519_v42 = vsel %vm2417_vm9, %v4277_v7, 0.0  ;;  %v4169_v11 = vld [vmem:[#allocation3 + $0x288] sm:$0xff]  ;;  %v4152_v47 = vld [vmem:[#allocation3 + $0x200] sm:$0xff]  ;;  %v3613_v34 = vadd.f32 %v9851_v38, %v9799_v16 }
 0xcb1   :  { %4724 = vadd.xlane.f32.xlu0 %v4723_v54  ;;  %4388 = vadd.xlane.f32.xlu1 %v4387_v58  ;;  %v4432_v54 = vsel %vm2417_vm9, %v4248_v53, 0.0  ;;  %v4269_v58 = vmul.f32 %v4137_v57, %v9804_v20  ;;  %v4543_v32 = vsel %vm2417_vm9, %v4285_v0, 0.0  ;;  %v4492_v24 = vsel %vm2417_vm9, %v4268_v46, 0.0  ;;  %v9917_v0 = vld [vmem:[#allocation3 + $0x340] sm:$0xff] }
 0xcb2   :  { %v4555_v57 = vsel %vm2417_vm9, %v4289_v19, 0.0  ;;  %v4284_v7 = vmul.f32 %v4152_v47, %v9817_v52 }
 0xcb4   :  { %v4540_v22 = vsel %vm2417_vm9, %v4284_v7, 0.0  ;;  %v9977_v7 = vld [vmem:[#allocation3 + $0x3c0] sm:$0xff] }
 0xcb5   :  { %4400 = vadd.xlane.f32.xlu1 %v4399_v61  ;;  %4349 = vadd.xlane.f32.xlu0 %v4348_v1  ;;  %v4495_v61 = vsel %vm2417_vm9, %v4269_v58, 0.0  ;;  %v4444_v1 = vsel %vm2417_vm9, %v4252_v3, 0.0  ;;  %v4165_v58 = vld [vmem:[#allocation3 + $0x268] sm:$0xff]  ;;  %v4148_v3 = vld [vmem:[#allocation3 + $0x1e0] sm:$0xff] }
 0xcb9   :  { %4412 = vadd.xlane.f32.xlu1 %v4411_v18  ;;  %4361 = vadd.xlane.f32.xlu0 %v4360_v23  ;;  %v9869_v18 = vpop.f32.mrf.mxu0  ;;  %v9871_v23 = vpop.f32.mrf.mxu1 }
 0xcbb   :  { %v9877_v13 = vpop.f32.mrf.mxu0  ;;  %v9879_v40 = vpop.f32.mrf.mxu1 }
 0xcbd   :  { %4424 = vadd.xlane.f32.xlu1 %v4423_v36  ;;  %4373 = vadd.xlane.f32.xlu0 %v4372_v39  ;;  %v4149_v36 = vld [vmem:[#allocation3 + $0x1e8] sm:$0xff]  ;;  %v4132_v39 = vld [vmem:[#allocation3 + $0x160] sm:$0xff]  ;;  %v9881_v41 = vpop.f32.mrf.mxu0 }
 0xcbe   :  { %v4264_v49 = vmul.f32 %v4132_v39, %v9817_v52 }
 0xcbf   :  { %v3956_v29 = vpop.f32.mrf.mxu0 }
 0xcc0   :  { %v4480_v31 = vsel %vm2417_vm9, %v4264_v49, 0.0 }
 0xcc1   :  { %4436 = vadd.xlane.f32.xlu1 %v4435_v45  ;;  %4385 = vadd.xlane.f32.xlu0 %v4384_v37  ;;  %v4468_v45 = vsel %vm2417_vm9, %v4260_v35, 0.0  ;;  %v4281_v37 = vmul.f32 %v4149_v36, %v9804_v20  ;;  %v7952_v17 = vpop.f32.mrf.mxu0  ;;  %v4173_v35 = vld [vmem:[#allocation3 + $0x2a8] sm:$0xff]  ;;  %v4156_v36 = vld [vmem:[#allocation3 + $0x220] sm:$0xff] }
 0xcc2   :  { %v3972_v39 = vadd.f32 %v7952_v17, %v9871_v23  ;;  %v4288_v49 = vmul.f32 %v4156_v36, %v9817_v52 }
 0xcc4   :  { %v4552_v46 = vsel %vm2417_vm9, %v4288_v49, 0.0 }
 0xcc5   :  { %4448 = vadd.xlane.f32.xlu1 %v4447_v12  ;;  %4397 = vadd.xlane.f32.xlu0 %v4396_v14  ;;  %v9887_v12 = vpop.f32.mrf.mxu1  ;;  %v4531_v14 = vsel %vm2417_vm9, %v4281_v37, 0.0  ;;  %v4305_v37 = vmul.f32 %v4173_v35, %v9804_v20 }
 0xcc7   :  { %v4053_v63 = vpop.f32.mrf.mxu1  ;;  %v4603_v23 = vsel %vm2417_vm9, %v4305_v37, 0.0 }
 0xcc9   :  { %4460 = vadd.xlane.f32.xlu1 %v4459_v62  ;;  %4409 = vadd.xlane.f32.xlu0 %v4408_v2  ;;  %v4140_v62 = vld [vmem:[#allocation3 + $0x1a0] sm:$0xff]  ;;  %v3957_v2 = vadd.f32 %v3956_v29, %v3871_v9  ;;  %v4177_v29 = vld [vmem:[#allocation3 + $0x2c8] sm:$0xff] }
 0xccb   :  { %v4072_v53 = vadd.f32 %v4053_v63, %v3957_v2  ;;  %v4309_v2 = vmul.f32 %v4177_v29, %v9804_v20  ;;  %v9993_v29 = vld [vmem:[#allocation3 + $0x3e0] sm:$0xff] }
 0xccd   :  { %4472 = vadd.xlane.f32.xlu1 %v4471_v43  ;;  %4421 = vadd.xlane.f32.xlu0 %v4420_v50  ;;  %v4272_v43 = vmul.f32 %v4140_v62, %v9817_v52  ;;  %v4161_v50 = vld [vmem:[#allocation3 + $0x248] sm:$0xff]  ;;  %v4076_v8 = vadd.f32 %v4072_v53, %v9609_v48  ;;  %v4301_v48 = vmul.f32 %v4169_v11, %v9804_v20 }
 0xccf   :  { %v4504_v59 = vsel %vm2417_vm9, %v4272_v43, 0.0  ;;  %v4080_v21 = vmul.f32 0.2, %v4076_v8  ;;  %v4591_v44 = vsel %vm2417_vm9, %v4301_v48, 0.0 }
 0xcd1   :  { %4484 = vadd.xlane.f32.xlu1 %v4483_v10  ;;  %4433 = vadd.xlane.f32.xlu0 %v4432_v54  ;;  %v4293_v10 = vmul.f32 %v4161_v50, %v9804_v20  ;;  %v4276_v54 = vmul.f32 %v4144_v51, %v9817_v52  ;;  %v4164_v50 = vld [vmem:[#allocation3 + $0x260] sm:$0xff] }
 0xcd2   :  { %v9938_v51 = vld [vmem:[#allocation3 + $0x360] sm:$0xff] }
 0xcd3   :  { %v4567_v56 = vsel %vm2417_vm9, %v4293_v10, 0.0  ;;  %v4516_v9 = vsel %vm2417_vm9, %v4276_v54, 0.0 }
 0xcd5   :  { %4496 = vadd.xlane.f32.xlu1 %v4495_v61  ;;  %4445 = vadd.xlane.f32.xlu0 %v4444_v1  ;;  %v4297_v61 = vmul.f32 %v4165_v58, %v9804_v20  ;;  %v4280_v1 = vmul.f32 %v4148_v3, %v9817_v52  ;;  %v3966_v58 = vpop.f32.mrf.mxu0 }
 0xcd9   :  { %4508 = vadd.xlane.f32.xlu1 %v4507_v26  ;;  %4457 = vadd.xlane.f32.xlu0 %v4456_v28  ;;  %v4579_v26 = vsel %vm2417_vm9, %v4297_v61, 0.0  ;;  %v4528_v28 = vsel %vm2417_vm9, %v4280_v1, 0.0  ;;  %v4615_v1 = vsel %vm2417_vm9, %v4309_v2, 0.0 }
 0xcdd   :  { %4520 = vadd.xlane.f32.xlu1 %v4519_v42  ;;  %4469 = vadd.xlane.f32.xlu0 %v4468_v45  ;;  %v9911_v42 = vmax.f32 %v4076_v8, %v4080_v21  ;;  %v7968_v45 = vpop.f32.mrf.mxu1  ;;  %v9955_v8 = vld [vmem:[#allocation3 + $0x380] sm:$0xff]  ;;  %v9970_v21 = vld [vmem:[#allocation3 + $0x308] sm:$0xff] }
 0xcdf   :  { %11980 = vst [vmem:[#allocation12_spill] sm:$0xff] %v9911_v42  ;;  %v9925_v62 = vmul.f32 %v9917_v0, %v9911_v42  ;;  %v9933_v19 = vmul.f32 %v9921_v15, %v9911_v42  ;;  %v9936_v43 = vmul.f32 %v4152_v47, %v9911_v42  ;;  %v9948_v10 = vmul.f32 %v4156_v36, %v9911_v42  ;;  %v4063_v36 = vpop.f32.mrf.mxu1 }
 0xce0   :  { %v9952_v54 = vmul.f32 %v9938_v51, %v9911_v42  ;;  %v4296_v47 = vmul.f32 %v4164_v50, %v9817_v52  ;;  %v9974_v17 = vmul.f32 %v9955_v8, %v9911_v42  ;;  %v9986_v37 = vmul.f32 %v9977_v7, %v9911_v42 }
 0xce1   :  { %4532 = vadd.xlane.f32.xlu1 %v4531_v14  ;;  %4481 = vadd.xlane.f32.xlu0 %v4480_v31  ;;  %v4160_v14 = vld [vmem:[#allocation3 + $0x240] sm:$0xff]  ;;  %v4075_v31 = vadd.f32 %v7968_v45, %v3972_v39  ;;  %11981 = vst [vmem:[#allocation13_spill] sm:$0xff] %v9925_v62  ;;  %11982 = vst [vmem:[#allocation14_spill] sm:$0xff] %v9933_v19  ;;  %v4317_v39 = vmul.f32 %v9970_v21, %v9804_v20 }
 0xce2   :  { %v4292_v63 = vmul.f32 %v4160_v14, %v9817_v52  ;;  %11983 = vst [vmem:[#allocation15_spill] sm:$0xff] %v9936_v43  ;;  %11985 = vst [vmem:[#allocation17_spill] sm:$0xff] %v9948_v10  ;;  %v4172_v45 = vld [vmem:[#allocation3 + $0x2a0] sm:$0xff] }
 0xce3   :  { %11986 = vst [vmem:[#allocation18_spill] sm:$0xff] %v9952_v54  ;;  %11990 = vst [vmem:[#allocation22_spill] sm:$0xff] %v9974_v17  ;;  %v10208_v17 = vld [vmem:[#allocation3 + $0x2b0] sm:$0xff] }
 0xce4   :  { %v4564_v11 = vsel %vm2417_vm9, %v4292_v63, 0.0  ;;  %11992 = vst [vmem:[#allocation24_spill] sm:$0xff] %v9986_v37  ;;  %v4639_v63 = vsel %vm2417_vm9, %v4317_v39, 0.0  ;;  %v10146_v37 = vld [vmem:[#allocation3 + $0x2b8] sm:$0xff] }
 0xce5   :  { %4544 = vadd.xlane.f32.xlu1 %v4543_v32  ;;  %4493 = vadd.xlane.f32.xlu0 %v4492_v24  ;;  %v4181_v32 = vld [vmem:[#allocation3 + $0x2e8] sm:$0xff]  ;;  %v9929_v24 = vld [vmem:[#allocation3 + $0x320] sm:$0xff] }
 0xce6   :  { %v9942_v53 = vmul.f32 %v9929_v24, %v9911_v42  ;;  %v4313_v3 = vmul.f32 %v4181_v32, %v9804_v20 }
 0xce8   :  { %11984 = vst [vmem:[#allocation16_spill] sm:$0xff] %v9942_v53  ;;  %v4627_v49 = vsel %vm2417_vm9, %v4313_v3, 0.0  ;;  %v4176_v3 = vld [vmem:[#allocation3 + $0x2c0] sm:$0xff] }
 0xce9   :  { %4556 = vadd.xlane.f32.xlu1 %v4555_v57  ;;  %4505 = vadd.xlane.f32.xlu0 %v4504_v59  ;;  %v4079_v57 = vadd.f32 %v4075_v31, %v9554_v27  ;;  %v9945_v59 = vld [vmem:[#allocation3 + $0x3a0] sm:$0xff]  ;;  %v10000_v31 = vmul.f32 %v9993_v29, %v9911_v42 }
 0xcea   :  { %v9965_v61 = vmul.f32 %v9945_v59, %v9911_v42 }
 0xceb   :  { %v4083_v48 = vmul.f32 0.2, %v4079_v57  ;;  %11994 = vst [vmem:[#allocation26_spill] sm:$0xff] %v10000_v31  ;;  %v4328_v31 = vmul.f32 %v9938_v51, %v9817_v52  ;;  %v10152_v51 = vld [vmem:[#allocation3 + $0x230] sm:$0xff] }
 0xcec   :  { %11989 = vst [vmem:[#allocation21_spill] sm:$0xff] %v9965_v61 }
 0xced   :  { %4568 = vadd.xlane.f32.xlu1 %v4567_v56  ;;  %4517 = vadd.xlane.f32.xlu0 %v4516_v9  ;;  %v9958_v56 = vmul.f32 %v4164_v50, %v9911_v42  ;;  %v9961_v9 = vmul.f32 %v4160_v14, %v9911_v42  ;;  %v9996_v14 = vmul.f32 %v4172_v45, %v9911_v42 }
 0xcee   :  { %v4304_v50 = vmul.f32 %v4172_v45, %v9817_v52 }
 0xcef   :  { %11987 = vst [vmem:[#allocation19_spill] sm:$0xff] %v9958_v56  ;;  %11988 = vst [vmem:[#allocation20_spill] sm:$0xff] %v9961_v9  ;;  %v10238_v9 = vld [vmem:[#allocation3 + $0x3b0] sm:$0xff]  ;;  %v4103_v56 = vld [vmem:[#allocation3 + $0x78] sm:$0xff] }
 0xcf0   :  { %11993 = vst [vmem:[#allocation25_spill] sm:$0xff] %v9996_v14  ;;  %v4600_v45 = vsel %vm2417_vm9, %v4304_v50, 0.0  ;;  %v4320_v14 = vmul.f32 %v9929_v24, %v9817_v52 }
 0xcf1   :  { %4580 = vadd.xlane.f32.xlu1 %v4579_v26  ;;  %4529 = vadd.xlane.f32.xlu0 %v4528_v28  ;;  %v4168_v26 = vld [vmem:[#allocation3 + $0x280] sm:$0xff]  ;;  %v3967_v28 = vadd.f32 %v3966_v58, %v9879_v40  ;;  %v4201_v58 = vld [vmem:[#allocation3 + $0x388] sm:$0xff] }
 0xcf2   :  { %v9980_v35 = vmul.f32 %v4168_v26, %v9911_v42  ;;  %v4300_v40 = vmul.f32 %v4168_v26, %v9817_v52 }
 0xcf4   :  { %11991 = vst [vmem:[#allocation23_spill] sm:$0xff] %v9980_v35  ;;  %v4588_v32 = vsel %vm2417_vm9, %v4300_v40, 0.0  ;;  %v4205_v40 = vld [vmem:[#allocation3 + $0x3a8] sm:$0xff] }
 0xcf5   :  { %4592 = vadd.xlane.f32.xlu1 %v4591_v44  ;;  %4541 = vadd.xlane.f32.xlu0 %v4540_v22  ;;  %v4576_v44 = vsel %vm2417_vm9, %v4296_v47, 0.0  ;;  %v9991_v22 = vld [vmem:[#allocation3 + $0x328] sm:$0xff]  ;;  %v10014_v47 = vld [vmem:[#allocation3 + $0x238] sm:$0xff] }
 0xcf6   :  { %v4321_v2 = vmul.f32 %v9991_v22, %v9804_v20 }
 0xcf9   :  { %4604 = vadd.xlane.f32.xlu1 %v4603_v23  ;;  %4553 = vadd.xlane.f32.xlu0 %v4552_v46  ;;  %v10002_v23 = vmax.f32 %v4079_v57, %v4083_v48  ;;  %v4074_v46 = vadd.f32 %v4063_v36, %v3967_v28  ;;  %v10012_v57 = vld [vmem:[#allocation3 + $0x378] sm:$0xff]  ;;  %v4651_v28 = vsel %vm2417_vm9, %v4321_v2, 0.0  ;;  %v4180_v2 = vld [vmem:[#allocation3 + $0x2e0] sm:$0xff] }
 0xcfa   :  { %v10021_v48 = vld [vmem:[#allocation3 + $0x258] sm:$0xff] }
 0xcfb   :  { %11995 = vst [vmem:[#allocation27_spill] sm:$0xff] %v10002_v23  ;;  %v10025_v36 = vmul.f32 %v10014_v47, %v10002_v23  ;;  %v10029_v39 = vmul.f32 %v10012_v57, %v10002_v23 }
 0xcfd   :  { %4616 = vadd.xlane.f32.xlu1 %v4615_v1  ;;  %4565 = vadd.xlane.f32.xlu0 %v4564_v11  ;;  %v10009_v1 = vld [vmem:[#allocation3 + $0x318] sm:$0xff]  ;;  %v4078_v11 = vadd.f32 %v4074_v46, %v9611_v33  ;;  %11997 = vst [vmem:[#allocation29_spill] sm:$0xff] %v10025_v36  ;;  %11998 = vst [vmem:[#allocation30_spill] sm:$0xff] %v10029_v39  ;;  %v10036_v46 = vmul.f32 %v10021_v48, %v10002_v23 }
 0xcfe   :  { %v10018_v26 = vmul.f32 %v10009_v1, %v10002_v23  ;;  %v4312_v39 = vmul.f32 %v4180_v2, %v9817_v52  ;;  %v10064_v36 = vld [vmem:[#allocation3 + $0x138] sm:$0xff] }
 0xcff   :  { %11999 = vst [vmem:[#allocation31_spill] sm:$0xff] %v10036_v46  ;;  %v4082_v50 = vmul.f32 0.2, %v4078_v11  ;;  %v10059_v46 = vmul.f32 %v10044_v6, %v10002_v23  ;;  %v10081_v2 = vld [vmem:[#allocation3 + $0x2d8] sm:$0xff] }
 0xd00   :  { %11996 = vst [vmem:[#allocation28_spill] sm:$0xff] %v10018_v26 }
 0xd01   :  { %4628 = vadd.xlane.f32.xlu1 %v4627_v49  ;;  %4577 = vadd.xlane.f32.xlu0 %v4576_v44  ;;  %v4333_v49 = vmul.f32 %v4201_v58, %v9804_v20  ;;  %v4308_v44 = vmul.f32 %v4176_v3, %v9817_v52  ;;  %12002 = vst [vmem:[#allocation34_spill] sm:$0xff] %v10059_v46 }
 0xd02   :  { %v10076_v46 = vmul.f32 %v10064_v36, %v10002_v23 }
 0xd03   :  { %v4687_v16 = vsel %vm2417_vm9, %v4333_v49, 0.0  ;;  %v4612_v38 = vsel %vm2417_vm9, %v4308_v44, 0.0  ;;  %v3732_v49 = vadd.f32 %v9869_v18, %v3613_v34  ;;  %v10079_v44 = vmax.f32 %v4078_v11, %v4082_v50  ;;  %v10097_v18 = vld [vmem:[#allocation3 + $0x158] sm:$0xff] }
 0xd04   :  { %12004 = vst [vmem:[#allocation36_spill] sm:$0xff] %v10076_v46  ;;  %v4316_v34 = vmul.f32 %v9921_v15, %v9817_v52  ;;  %v10099_v11 = vld [vmem:[#allocation3 + $0x1b8] sm:$0xff]  ;;  %v10103_v50 = vmul.f32 %v10081_v2, %v10002_v23  ;;  %v4624_v46 = vsel %vm2417_vm9, %v4312_v39, 0.0  ;;  %v10115_v15 = vmul.f32 %v10097_v18, %v10002_v23 }
 0xd05   :  { %4640 = vadd.xlane.f32.xlu1 %v4639_v63  ;;  %4589 = vadd.xlane.f32.xlu0 %v4588_v32  ;;  %v10038_v63 = vld [vmem:[#allocation3 + $0x338] sm:$0xff]  ;;  %12005 = vst [vmem:[#allocation37_spill] sm:$0xff] %v10079_v44  ;;  %v10119_v26 = vmul.f32 %v10099_v11, %v10002_v23 }
 0xd06   :  { %v10040_v32 = vld [vmem:[#allocation3 + $0x398] sm:$0xff]  ;;  %v10052_v3 = vmul.f32 %v10038_v63, %v10002_v23  ;;  %12008 = vst [vmem:[#allocation40_spill] sm:$0xff] %v10103_v50  ;;  %12010 = vst [vmem:[#allocation42_spill] sm:$0xff] %v10115_v15  ;;  %v3756_v15 = vadd.f32 %v9554_v27, %v3732_v49  ;;  %v10156_v49 = vmul.f32 %v10146_v37, %v10002_v23 }
 0xd07   :  { %v10048_v58 = vmul.f32 %v10040_v32, %v10002_v23  ;;  %12011 = vst [vmem:[#allocation43_spill] sm:$0xff] %v10119_v26  ;;  %v10121_v50 = vld [vmem:[#allocation3 + $0x2f8] sm:$0xff]  ;;  %v10136_v26 = vld [vmem:[#allocation3 + $0x350] sm:$0xff] }
 0xd08   :  { %12001 = vst [vmem:[#allocation33_spill] sm:$0xff] %v10052_v3  ;;  %v10083_v3 = vld [vmem:[#allocation3 + $0x3b8] sm:$0xff]  ;;  %v10131_v39 = vmul.f32 %v10121_v50, %v10002_v23  ;;  %v10150_v27 = vmul.f32 %v10136_v26, %v10079_v44  ;;  %12016 = vst [vmem:[#allocation48_spill] sm:$0xff] %v10156_v49  ;;  %v3760_v24 = vmul.f32 0.2, %v3756_v15  ;;  %v4332_v49 = vmul.f32 %v9955_v8, %v9817_v52 }
 0xd09   :  { %4652 = vadd.xlane.f32.xlu1 %v4651_v28  ;;  %4601 = vadd.xlane.f32.xlu0 %v4600_v45  ;;  %12000 = vst [vmem:[#allocation32_spill] sm:$0xff] %v10048_v58  ;;  %v4337_v28 = vmul.f32 %v4205_v40, %v9804_v20  ;;  %v10055_v45 = vld [vmem:[#allocation3 + $0x218] sm:$0xff] }
 0xd0a   :  { %v10068_v58 = vmul.f32 %v10055_v45, %v10002_v23  ;;  %v10070_v20 = vld [vmem:[#allocation3 + $0x198] sm:$0xff]  ;;  %12013 = vst [vmem:[#allocation45_spill] sm:$0xff] %v10131_v39  ;;  %12015 = vst [vmem:[#allocation47_spill] sm:$0xff] %v10150_v27  ;;  %v4340_v27 = vmul.f32 %v9977_v7, %v9817_v52  ;;  %v10174_v39 = vld [vmem:[#allocation3 + $0x290] sm:$0xff]  ;;  %v4344_v7 = vmul.f32 %v9993_v29, %v9817_v52  ;;  %v4684_v35 = vsel %vm2417_vm9, %v4332_v49, 0.0 }
 0xd0b   :  { %v10072_v40 = vld [vmem:[#allocation3 + $0x278] sm:$0xff]  ;;  %v10216_v49 = vld [vmem:[#allocation3 + $0x3f0] sm:$0xff] }
 0xd0c   :  { %12003 = vst [vmem:[#allocation35_spill] sm:$0xff] %v10068_v58  ;;  %v4324_v58 = vmul.f32 %v9917_v0, %v9817_v52  ;;  %v10111_v0 = vld [vmem:[#allocation3 + $0x298] sm:$0xff]  ;;  %v4720_v61 = vsel %vm2417_vm9, %v4344_v7, 0.0 }
 0xd0d   :  { %4688 = vadd.xlane.f32.xlu1 %v4687_v16  ;;  %4613 = vadd.xlane.f32.xlu0 %v4612_v38  ;;  %v10087_v16 = vmul.f32 %v10070_v20, %v10002_v23  ;;  %v10091_v38 = vmul.f32 %v10072_v40, %v10002_v23 }
 0xd0f   :  { %12006 = vst [vmem:[#allocation38_spill] sm:$0xff] %v10087_v16  ;;  %12007 = vst [vmem:[#allocation39_spill] sm:$0xff] %v10091_v38  ;;  %v10107_v16 = vmul.f32 %v10083_v3, %v10002_v23  ;;  %v4699_v38 = vsel %vm2417_vm9, %v4337_v28, 0.0  ;;  %v10127_v28 = vld [vmem:[#allocation3 + $0x310] sm:$0xff] }
 0xd11   :  { %12009 = vst [vmem:[#allocation41_spill] sm:$0xff] %v10107_v16  ;;  %4700 = vadd.xlane.f32.xlu1 %v4699_v38  ;;  %4625 = vadd.xlane.f32.xlu0 %v4624_v46  ;;  %v10125_v16 = vmul.f32 %v10111_v0, %v10002_v23  ;;  %v10140_v46 = vmul.f32 %v10127_v28, %v10079_v44  ;;  %v4660_v38 = vsel %vm2417_vm9, %v4324_v58, 0.0  ;;  %v10158_v58 = vld [vmem:[#allocation3 + $0x370] sm:$0xff] }
 0xd12   :  { %v10178_v23 = vld [vmem:[#allocation3 + $0x3d0] sm:$0xff] }
 0xd13   :  { %12012 = vst [vmem:[#allocation44_spill] sm:$0xff] %v10125_v16  ;;  %12014 = vst [vmem:[#allocation46_spill] sm:$0xff] %v10140_v46  ;;  %v4636_v16 = vsel %vm2417_vm9, %v4316_v34, 0.0  ;;  %v10162_v34 = vmul.f32 %v10152_v51, %v10079_v44  ;;  %v10166_v46 = vmul.f32 %v10158_v58, %v10079_v44  ;;  %v10192_v8 = vmul.f32 %v10178_v23, %v10079_v44 }
 0xd15   :  { %4661 = vadd.xlane.f32.xlu1 %v4660_v38  ;;  %4637 = vadd.xlane.f32.xlu0 %v4636_v16  ;;  %12017 = vst [vmem:[#allocation49_spill] sm:$0xff] %v10162_v34  ;;  %12018 = vst [vmem:[#allocation50_spill] sm:$0xff] %v10166_v46  ;;  %v4672_v38 = vsel %vm2417_vm9, %v4328_v31, 0.0  ;;  %v4648_v16 = vsel %vm2417_vm9, %v4320_v14, 0.0  ;;  %v10176_v34 = vld [vmem:[#allocation3 + $0x330] sm:$0xff]  ;;  %v10182_v46 = vmul.f32 %v10174_v39, %v10079_v44 }
 0xd16   :  { %v10184_v31 = vmax.f32 %v3756_v15, %v3760_v24  ;;  %v10188_v14 = vld [vmem:[#allocation3 + $0x210] sm:$0xff]  ;;  %12020 = vst [vmem:[#allocation52_spill] sm:$0xff] %v10192_v8  ;;  %v4336_v15 = vmul.f32 %v9945_v59, %v9817_v52  ;;  %v4095_v24 = vld [vmem:[#allocation3 + $0x38] sm:$0xff]  ;;  %v10220_v52 = vmul.f32 %v10208_v17, %v10079_v44 }
 0xd17   :  { %12019 = vst [vmem:[#allocation51_spill] sm:$0xff] %v10182_v46  ;;  %v10202_v46 = vld [vmem:[#allocation3 + $0x250] sm:$0xff]  ;;  %v10206_v29 = vmul.f32 %v10188_v14, %v10079_v44  ;;  %v4091_v8 = vld [vmem:[#allocation3 + $0x18] sm:$0xff] }
 0xd18   :  { %12024 = vst [vmem:[#allocation56_spill] sm:$0xff] %v10220_v52  ;;  %v4696_v42 = vsel %vm2417_vm9, %v4336_v15, 0.0  ;;  %v4223_v52 = vmul.f32 %v4091_v8, %v10184_v31 }
 0xd19   :  { %4673 = vadd.xlane.f32.xlu1 %v4672_v38  ;;  %4649 = vadd.xlane.f32.xlu0 %v4648_v16  ;;  %v10196_v38 = vmul.f32 %v10176_v34, %v10079_v44  ;;  %v4708_v16 = vsel %vm2417_vm9, %v4340_v27, 0.0  ;;  %12022 = vst [vmem:[#allocation54_spill] sm:$0xff] %v10206_v29  ;;  %v10214_v27 = vmul.f32 %v10202_v46, %v10079_v44  ;;  %v10229_v29 = vld [vmem:[#allocation3 + $0x270] sm:$0xff] }
 0xd1b   :  { %12021 = vst [vmem:[#allocation53_spill] sm:$0xff] %v10196_v38  ;;  %v10210_v38 = vld [vmem:[#allocation3 + $0x390] sm:$0xff]  ;;  %12023 = vst [vmem:[#allocation55_spill] sm:$0xff] %v10214_v27  ;;  %v10233_v27 = vmul.f32 %v10216_v49, %v10079_v44 }
 0xd1c   :  { %v10224_v59 = vmul.f32 %v10210_v38, %v10079_v44 }
 0xd1d   :  { %4709 = vadd.xlane.f32.xlu1 %v4708_v16  ;;  %4685 = vadd.xlane.f32.xlu0 %v4684_v35  ;;  %v3608_v35 = vadd.f32 %v9857_v60, %v9801_v30  ;;  %v4227_v16 = vmul.f32 %v4095_v24, %v10184_v31  ;;  %12026 = vst [vmem:[#allocation58_spill] sm:$0xff] %v10233_v27  ;;  %v4099_v30 = vld [vmem:[#allocation3 + $0x58] sm:$0xff]  ;;  %v10244_v24 = vld [vmem:[#allocation3 + $0x2d0] sm:$0xff] }
 0xd1e   :  { %12025 = vst [vmem:[#allocation57_spill] sm:$0xff] %v10224_v59  ;;  %v10242_v59 = vmul.f32 %v10229_v29, %v10079_v44  ;;  %v4195_v60 = vld [vmem:[#allocation3 + $0x358] sm:$0xff]  ;;  %v10248_v27 = vmul.f32 %v10238_v9, %v10079_v44  ;;  %v10252_v7 = vmul.f32 %v10244_v24, %v10079_v44 }
 0xd1f   :  { %v3731_v8 = vadd.f32 %v9877_v13, %v3608_v35  ;;  %v4369_v15 = vsel %vm2417_vm9, %v4227_v16, 0.0  ;;  %v4331_v13 = vmul.f32 %v10012_v57, %v10184_v31  ;;  %v4211_v35 = vld [vmem:[#allocation3 + $0x3d8] sm:$0xff] }
 0xd20   :  { %12027 = vst [vmem:[#allocation59_spill] sm:$0xff] %v10242_v59  ;;  %12028 = vst [vmem:[#allocation60_spill] sm:$0xff] %v10248_v27  ;;  %v4357_v59 = vsel %vm2417_vm9, %v4223_v52, 0.0  ;;  %v4107_v52 = vld [vmem:[#allocation3 + $0x98] sm:$0xff] }
 0xd21   :  { %4721 = vadd.xlane.f32.xlu1 %v4720_v61  ;;  %4697 = vadd.xlane.f32.xlu0 %v4696_v42  ;;  %12029 = vst [vmem:[#allocation61_spill] sm:$0xff] %v10252_v7  ;;  %v4231_v42 = vmul.f32 %v4099_v30, %v10184_v31  ;;  %v4327_v61 = vmul.f32 %v4195_v60, %v10184_v31 }
 0xd22   :  { %v3755_v54 = vadd.f32 %v9611_v33, %v3731_v8  ;;  %v4235_v7 = vmul.f32 %v4103_v56, %v10184_v31  ;;  %v4239_v33 = vmul.f32 %v4107_v52, %v10184_v31  ;;  %v4343_v60 = vmul.f32 %v4211_v35, %v10184_v31  ;;  %v4111_v8 = vld [vmem:[#allocation3 + $0xb8] sm:$0xff]  ;;  %v4090_v52 = vld [vmem:[#allocation3 + $0x10] sm:$0xff] }
 0xd23   :  { %v4381_v27 = vsel %vm2417_vm9, %v4231_v42, 0.0  ;;  %v4669_v44 = vsel %vm2417_vm9, %v4327_v61, 0.0  ;;  %v4215_v56 = vld [vmem:[#allocation3 + $0x3f8] sm:$0xff] }
 0xd24   :  { %v3759_v16 = vmul.f32 0.2, %v3755_v54  ;;  %v4393_v30 = vsel %vm2417_vm9, %v4235_v7, 0.0  ;;  %v4717_v42 = vsel %vm2417_vm9, %v4343_v60, 0.0  ;;  %v4243_v7 = vmul.f32 %v4111_v8, %v10184_v31  ;;  %v4119_v60 = vld [vmem:[#allocation3 + $0xf8] sm:$0xff]  ;;  %v4094_v8 = vld [vmem:[#allocation3 + $0x30] sm:$0xff] }
 0xd25   :  { %4370 = vadd.xlane.f32.xlu1 %v4369_v15  ;;  %4358 = vadd.xlane.f32.xlu0 %v4357_v59  ;;  %v4681_v59 = vsel %vm2417_vm9, %v4331_v13, 0.0  ;;  %v4347_v61 = vmul.f32 %v4215_v56, %v10184_v31  ;;  %v4115_v13 = vld [vmem:[#allocation3 + $0xd8] sm:$0xff] }
 0xd29   :  { %4382 = vadd.xlane.f32.xlu1 %v4381_v27  ;;  %4670 = vadd.xlane.f32.xlu0 %v4669_v44  ;;  %v10271_v27 = vmax.f32 %v3755_v54, %v3759_v16  ;;  %v4405_v44 = vsel %vm2417_vm9, %v4239_v33, 0.0  ;;  %v4729_v54 = vsel %vm2417_vm9, %v4347_v61, 0.0  ;;  %v4247_v16 = vmul.f32 %v4115_v13, %v10184_v31  ;;  %v4098_v13 = vld [vmem:[#allocation3 + $0x50] sm:$0xff] }
 0xd2b   :  { %v4222_v33 = vmul.f32 %v4090_v52, %v10271_v27  ;;  %v4429_v10 = vsel %vm2417_vm9, %v4247_v16, 0.0  ;;  %v4226_v61 = vmul.f32 %v4094_v8, %v10271_v27 }
 0xd2d   :  { %4394 = vadd.xlane.f32.xlu1 %v4393_v30  ;;  %4682 = vadd.xlane.f32.xlu0 %v4681_v59  ;;  %v4417_v59 = vsel %vm2417_vm9, %v4243_v7, 0.0  ;;  %v4354_v53 = vsel %vm2417_vm9, %v4222_v33, 0.0  ;;  %v4251_v7 = vmul.f32 %v4119_v60, %v10184_v31  ;;  %v4366_v33 = vsel %vm2417_vm9, %v4226_v61, 0.0 }
 0xd2e   :  { %v10269_v15 = vpop.xlane.xlu0 %4664  ;;  %v4353_v57 = vpop.xlane.xlu1 %4352  ;;  %v4255_v60 = vmul.f32 %v10044_v6, %v10184_v31  ;;  %v4259_v61 = vmul.f32 %v10064_v36, %v10184_v31  ;;  %v4263_v36 = vmul.f32 %v10097_v18, %v10184_v31 }
 0xd2f   :  { %v4441_v16 = vsel %vm2417_vm9, %v4251_v7, 0.0 }
 0xd31   :  { %4406 = vadd.xlane.f32.xlu1 %v4405_v44  ;;  %4718 = vadd.xlane.f32.xlu0 %v4717_v42  ;;  %v4864_v42 = vadd.s32 4294967288, %v8448_v55 }
 0xd32   :  { %v10277_v35 = vpop.xlane.xlu0 %4676  ;;  %v4365_v30 = vpop.xlane.xlu1 %4364 }
 0xd33   :  { %v10297_v43 = vsub.s32 %v4864_v42, %v8250_v5 }
 0xd35   :  { %4418 = vadd.xlane.f32.xlu1 %v4417_v59  ;;  %4730 = vadd.xlane.f32.xlu0 %v4729_v54  ;;  %v10294_v54 = vsub.s32 %v8448_v55, %v8250_v5  ;;  %v4868_v62 = vrot.slane %v4353_v57, %v10297_v43  ;;  %v4453_v5 = vsel %vm2417_vm9, %v4255_v60, 0.0  ;;  %v4892_v57 = vrot.slane %v4365_v30, %v10297_v43 }
 0xd36   :  { %v10283_v56 = vpop.xlane.xlu0 %4712  ;;  %v4377_v44 = vpop.xlane.xlu1 %4376  ;;  %v4465_v60 = vsel %vm2417_vm9, %v4259_v61, 0.0 }
 0xd39   :  { %4430 = vadd.xlane.f32.xlu1 %v4429_v10  ;;  %4355 = vadd.xlane.f32.xlu0 %v4354_v53  ;;  %v4230_v53 = vmul.f32 %v4098_v13, %v10271_v27  ;;  %v4102_v10 = vld [vmem:[#allocation3 + $0x70] sm:$0xff] }
 0xd3a   :  { %v10290_v52 = vpop.xlane.xlu0 %4724  ;;  %v4389_v59 = vpop.xlane.xlu1 %4388  ;;  %v4234_v6 = vmul.f32 %v4102_v10, %v10271_v27 }
 0xd3b   :  { %v4378_v7 = vsel %vm2417_vm9, %v4230_v53, 0.0 }
 0xd3c   :  { %v4390_v53 = vsel %vm2417_vm9, %v4234_v6, 0.0  ;;  %v4477_v6 = vsel %vm2417_vm9, %v4263_v36, 0.0 }
 0xd3d   :  { %4442 = vadd.xlane.f32.xlu1 %v4441_v16  ;;  %4367 = vadd.xlane.f32.xlu0 %v4366_v33  ;;  %v4106_v16 = vld [vmem:[#allocation3 + $0x90] sm:$0xff] }
 0xd3e   :  { %v4401_v8 = vpop.xlane.xlu1 %4400  ;;  %v4350_v19 = vpop.xlane.xlu0 %4349  ;;  %v4238_v10 = vmul.f32 %v4106_v16, %v10271_v27 }
 0xd3f   :  { %v4863_v42 = vrot.slane %v4350_v19, %v10294_v54 }
 0xd41   :  { %v10312_v13 = vsel %vm4869_vm14, %v4868_v62, %v4863_v42  ;;  %4454 = vadd.xlane.f32.xlu1 %v4453_v5  ;;  %4379 = vadd.xlane.f32.xlu0 %v4378_v7  ;;  %v4135_v5 = vld [vmem:[#allocation3 + $0x178] sm:$0xff]  ;;  %v4110_v42 = vld [vmem:[#allocation3 + $0xb0] sm:$0xff] }
 0xd42   :  { %12030 = vst [vmem:[#allocation62_spill] sm:$0xff] %v10312_v13  ;;  %v4413_v33 = vpop.xlane.xlu1 %4412  ;;  %v4362_v55 = vpop.xlane.xlu0 %4361  ;;  %v4402_v13 = vsel %vm2417_vm9, %v4238_v10, 0.0  ;;  %v4267_v18 = vmul.f32 %v4135_v5, %v10184_v31  ;;  %v4242_v16 = vmul.f32 %v4110_v42, %v10271_v27  ;;  %v4271_v5 = vmul.f32 %v10070_v20, %v10184_v31 }
 0xd43   :  { %v4888_v19 = vrot.slane %v4362_v55, %v10294_v54  ;;  %v4911_v55 = vrot.slane %v4377_v44, %v10297_v43  ;;  %v4930_v44 = vrot.slane %v4389_v59, %v10297_v43  ;;  %v4949_v59 = vrot.slane %v4401_v8, %v10297_v43 }
 0xd44   :  { %v4489_v36 = vsel %vm2417_vm9, %v4267_v18, 0.0  ;;  %v4414_v10 = vsel %vm2417_vm9, %v4242_v16, 0.0  ;;  %v4501_v18 = vsel %vm2417_vm9, %v4271_v5, 0.0  ;;  %v4275_v20 = vmul.f32 %v10099_v11, %v10184_v31 }
 0xd45   :  { %v10322_v62 = vsel %vm4869_vm14, %v4892_v57, %v4888_v19  ;;  %4466 = vadd.xlane.f32.xlu1 %v4465_v60  ;;  %4391 = vadd.xlane.f32.xlu0 %v4390_v53  ;;  %v4114_v19 = vld [vmem:[#allocation3 + $0xd0] sm:$0xff] }
 0xd46   :  { %v4425_v7 = vpop.xlane.xlu1 %4424  ;;  %v4374_v30 = vpop.xlane.xlu0 %4373  ;;  %v4246_v42 = vmul.f32 %v4114_v19, %v10271_v27 }
 0xd47   :  { %v4907_v61 = vrot.slane %v4374_v30, %v10294_v54 }
 0xd48   :  { %v4426_v16 = vsel %vm2417_vm9, %v4246_v42, 0.0  ;;  %v4513_v42 = vsel %vm2417_vm9, %v4275_v20, 0.0 }
 0xd49   :  { %v10331_v57 = vsel %vm4869_vm14, %v4911_v55, %v4907_v61  ;;  %4478 = vadd.xlane.f32.xlu1 %v4477_v6  ;;  %4403 = vadd.xlane.f32.xlu0 %v4402_v13  ;;  %v4118_v13 = vld [vmem:[#allocation3 + $0xf0] sm:$0xff] }
 0xd4a   :  { %v4437_v60 = vpop.xlane.xlu1 %4436  ;;  %v4386_v53 = vpop.xlane.xlu0 %4385  ;;  %v4250_v19 = vmul.f32 %v4118_v13, %v10271_v27 }
 0xd4b   :  { %v4926_v30 = vrot.slane %v4386_v53, %v10294_v54 }
 0xd4d   :  { %v10341_v55 = vsel %vm4869_vm14, %v4930_v44, %v4926_v30  ;;  %4490 = vadd.xlane.f32.xlu1 %v4489_v36  ;;  %4415 = vadd.xlane.f32.xlu0 %v4414_v10  ;;  %v4147_v30 = vld [vmem:[#allocation3 + $0x1d8] sm:$0xff]  ;;  %v4122_v36 = vld [vmem:[#allocation3 + $0x110] sm:$0xff] }
 0xd4e   :  { %12031 = vst [vmem:[#allocation63_spill] sm:$0xff] %v10341_v55  ;;  %v4449_v61 = vpop.xlane.xlu1 %4448  ;;  %v4398_v6 = vpop.xlane.xlu0 %4397  ;;  %v4438_v55 = vsel %vm2417_vm9, %v4250_v19, 0.0  ;;  %v4279_v11 = vmul.f32 %v4147_v30, %v10184_v31  ;;  %v4254_v13 = vmul.f32 %v4122_v36, %v10271_v27 }
 0xd4f   :  { %v4945_v53 = vrot.slane %v4398_v6, %v10294_v54  ;;  %v4968_v6 = vrot.slane %v4413_v33, %v10297_v43  ;;  %v4987_v33 = vrot.slane %v4425_v7, %v10297_v43  ;;  %v5006_v7 = vrot.slane %v4437_v60, %v10297_v43 }
 0xd50   :  { %v4525_v20 = vsel %vm2417_vm9, %v4279_v11, 0.0  ;;  %v4450_v19 = vsel %vm2417_vm9, %v4254_v13, 0.0  ;;  %v5025_v60 = vrot.slane %v4449_v61, %v10297_v43 }
 0xd51   :  { %v10351_v44 = vsel %vm4869_vm14, %v4949_v59, %v4945_v53  ;;  %4502 = vadd.xlane.f32.xlu1 %v4501_v18  ;;  %4427 = vadd.xlane.f32.xlu0 %v4426_v16  ;;  %v4151_v53 = vld [vmem:[#allocation3 + $0x1f8] sm:$0xff]  ;;  %v4126_v18 = vld [vmem:[#allocation3 + $0x130] sm:$0xff] }
 0xd52   :  { %12032 = vst [vmem:[#allocation64_spill] sm:$0xff] %v10351_v44  ;;  %v4461_v10 = vpop.xlane.xlu1 %4460  ;;  %v4410_v8 = vpop.xlane.xlu0 %4409  ;;  %v4283_v30 = vmul.f32 %v4151_v53, %v10184_v31  ;;  %v4258_v36 = vmul.f32 %v4126_v18, %v10271_v27  ;;  %v4287_v53 = vmul.f32 %v10055_v45, %v10184_v31  ;;  %v4291_v45 = vmul.f32 %v10014_v47, %v10184_v31 }
 0xd53   :  { %v4964_v5 = vrot.slane %v4410_v8, %v10294_v54  ;;  %v5044_v61 = vrot.slane %v4461_v10, %v10297_v43  ;;  %v4295_v47 = vmul.f32 %v10021_v48, %v10184_v31  ;;  %v4299_v48 = vmul.f32 %v10072_v40, %v10184_v31 }
 0xd54   :  { %v4537_v11 = vsel %vm2417_vm9, %v4283_v30, 0.0  ;;  %v4462_v13 = vsel %vm2417_vm9, %v4258_v36, 0.0  ;;  %v4549_v30 = vsel %vm2417_vm9, %v4287_v53, 0.0  ;;  %v4561_v53 = vsel %vm2417_vm9, %v4291_v45, 0.0 }
 0xd55   :  { %v10360_v59 = vsel %vm4869_vm14, %v4968_v6, %v4964_v5  ;;  %4514 = vadd.xlane.f32.xlu1 %v4513_v42  ;;  %4439 = vadd.xlane.f32.xlu0 %v4438_v55  ;;  %v4130_v55 = vld [vmem:[#allocation3 + $0x150] sm:$0xff]  ;;  %v4573_v45 = vsel %vm2417_vm9, %v4295_v47, 0.0  ;;  %v4585_v47 = vsel %vm2417_vm9, %v4299_v48, 0.0  ;;  %v4303_v40 = vmul.f32 %v10111_v0, %v10184_v31 }
 0xd56   :  { %v4473_v16 = vpop.xlane.xlu1 %4472  ;;  %v4422_v44 = vpop.xlane.xlu0 %4421  ;;  %v4262_v18 = vmul.f32 %v4130_v55, %v10271_v27  ;;  %v4307_v0 = vmul.f32 %v10146_v37, %v10184_v31  ;;  %v4311_v37 = vmul.f32 %v10081_v2, %v10184_v31  ;;  %v4315_v2 = vmul.f32 %v10121_v50, %v10184_v31 }
 0xd57   :  { %v4983_v8 = vrot.slane %v4422_v44, %v10294_v54  ;;  %v5063_v10 = vrot.slane %v4473_v16, %v10297_v43  ;;  %v4597_v48 = vsel %vm2417_vm9, %v4303_v40, 0.0  ;;  %v4319_v50 = vmul.f32 %v10009_v1, %v10184_v31 }
 0xd58   :  { %v4474_v36 = vsel %vm2417_vm9, %v4262_v18, 0.0  ;;  %v4609_v40 = vsel %vm2417_vm9, %v4307_v0, 0.0  ;;  %v4323_v1 = vmul.f32 %v10038_v63, %v10184_v31 }
 0xd59   :  { %v10369_v6 = vsel %vm4869_vm14, %v4987_v33, %v4983_v8  ;;  %4526 = vadd.xlane.f32.xlu1 %v4525_v20  ;;  %4451 = vadd.xlane.f32.xlu0 %v4450_v19  ;;  %v4134_v8 = vld [vmem:[#allocation3 + $0x170] sm:$0xff] }
 0xd5a   :  { %v4485_v5 = vpop.xlane.xlu1 %4484  ;;  %v4434_v42 = vpop.xlane.xlu0 %4433  ;;  %v4266_v55 = vmul.f32 %v4134_v8, %v10271_v27 }
 0xd5b   :  { %v5002_v44 = vrot.slane %v4434_v42, %v10294_v54  ;;  %v5082_v16 = vrot.slane %v4485_v5, %v10297_v43 }
 0xd5c   :  { %v4486_v18 = vsel %vm2417_vm9, %v4266_v55, 0.0 }
 0xd5d   :  { %v10379_v33 = vsel %vm4869_vm14, %v5006_v7, %v5002_v44  ;;  %4538 = vadd.xlane.f32.xlu1 %v4537_v11  ;;  %4463 = vadd.xlane.f32.xlu0 %v4462_v13  ;;  %v4138_v44 = vld [vmem:[#allocation3 + $0x190] sm:$0xff] }
 0xd5e   :  { %v4497_v20 = vpop.xlane.xlu1 %4496  ;;  %v4446_v19 = vpop.xlane.xlu0 %4445  ;;  %v4270_v8 = vmul.f32 %v4138_v44, %v10271_v27 }
 0xd5f   :  { %v5021_v42 = vrot.slane %v4446_v19, %v10294_v54  ;;  %v5101_v5 = vrot.slane %v4497_v20, %v10297_v43 }
 0xd60   :  { %v4498_v55 = vsel %vm2417_vm9, %v4270_v8, 0.0 }
 0xd61   :  { %v10389_v7 = vsel %vm4869_vm14, %v5025_v60, %v5021_v42  ;;  %4550 = vadd.xlane.f32.xlu1 %v4549_v30  ;;  %4475 = vadd.xlane.f32.xlu0 %v4474_v36  ;;  %v4142_v42 = vld [vmem:[#allocation3 + $0x1b0] sm:$0xff] }
 0xd62   :  { %v4509_v11 = vpop.xlane.xlu1 %4508  ;;  %v4458_v13 = vpop.xlane.xlu0 %4457  ;;  %v4274_v44 = vmul.f32 %v4142_v42, %v10271_v27 }
 0xd63   :  { %v5040_v19 = vrot.slane %v4458_v13, %v10294_v54  ;;  %v5120_v20 = vrot.slane %v4509_v11, %v10297_v43 }
 0xd64   :  { %v4510_v8 = vsel %vm2417_vm9, %v4274_v44, 0.0 }
 0xd65   :  { %v10399_v60 = vsel %vm4869_vm14, %v5044_v61, %v5040_v19  ;;  %4562 = vadd.xlane.f32.xlu1 %v4561_v53  ;;  %4487 = vadd.xlane.f32.xlu0 %v4486_v18  ;;  %v4146_v19 = vld [vmem:[#allocation3 + $0x1d0] sm:$0xff] }
 0xd66   :  { %v4521_v30 = vpop.xlane.xlu1 %4520  ;;  %v4470_v36 = vpop.xlane.xlu0 %4469  ;;  %v4278_v42 = vmul.f32 %v4146_v19, %v10271_v27 }
 0xd67   :  { %v5059_v13 = vrot.slane %v4470_v36, %v10294_v54  ;;  %v5139_v11 = vrot.slane %v4521_v30, %v10297_v43 }
 0xd68   :  { %v4522_v44 = vsel %vm2417_vm9, %v4278_v42, 0.0 }
 0xd69   :  { %v10409_v61 = vsel %vm4869_vm14, %v5063_v10, %v5059_v13  ;;  %4574 = vadd.xlane.f32.xlu1 %v4573_v45  ;;  %4499 = vadd.xlane.f32.xlu0 %v4498_v55  ;;  %v4150_v13 = vld [vmem:[#allocation3 + $0x1f0] sm:$0xff] }
 0xd6a   :  { %v4533_v53 = vpop.xlane.xlu1 %4532  ;;  %v4482_v18 = vpop.xlane.xlu0 %4481  ;;  %v4282_v19 = vmul.f32 %v4150_v13, %v10271_v27  ;;  %v4286_v13 = vmul.f32 %v10188_v14, %v10271_v27  ;;  %v4290_v14 = vmul.f32 %v10152_v51, %v10271_v27  ;;  %v4294_v51 = vmul.f32 %v10202_v46, %v10271_v27 }
 0xd6b   :  { %v5078_v36 = vrot.slane %v4482_v18, %v10294_v54  ;;  %v5158_v30 = vrot.slane %v4533_v53, %v10297_v43  ;;  %v4298_v46 = vmul.f32 %v10229_v29, %v10271_v27  ;;  %v4335_v29 = vmul.f32 %v10040_v32, %v10184_v31 }
 0xd6c   :  { %v4534_v42 = vsel %vm2417_vm9, %v4282_v19, 0.0  ;;  %v4546_v0 = vsel %vm2417_vm9, %v4286_v13, 0.0 }
 0xd6d   :  { %v10419_v10 = vsel %vm4869_vm14, %v5082_v16, %v5078_v36  ;;  %4586 = vadd.xlane.f32.xlu1 %v4585_v47  ;;  %4511 = vadd.xlane.f32.xlu0 %v4510_v8  ;;  %v4582_v63 = vsel %vm2417_vm9, %v4298_v46, 0.0 }
 0xd6e   :  { %v4545_v45 = vpop.xlane.xlu1 %4544  ;;  %v4494_v55 = vpop.xlane.xlu0 %4493 }
 0xd6f   :  { %v5097_v18 = vrot.slane %v4494_v55, %v10294_v54  ;;  %v5177_v53 = vrot.slane %v4545_v45, %v10297_v43  ;;  %v3962_v45 = vadd.f32 %v9881_v41, %v9859_v4 }
 0xd71   :  { %v10429_v16 = vsel %vm4869_vm14, %v5101_v5, %v5097_v18  ;;  %4598 = vadd.xlane.f32.xlu1 %v4597_v48  ;;  %4523 = vadd.xlane.f32.xlu0 %v4522_v44  ;;  %v4621_v44 = vsel %vm2417_vm9, %v4311_v37, 0.0 }
 0xd72   :  { %v4557_v36 = vpop.xlane.xlu1 %4556  ;;  %v4506_v47 = vpop.xlane.xlu0 %4505 }
 0xd73   :  { %v5116_v8 = vrot.slane %v4506_v47, %v10294_v54 }
 0xd75   :  { %v10440_v55 = vsel %vm4869_vm14, %v5120_v20, %v5116_v8  ;;  %4610 = vadd.xlane.f32.xlu1 %v4609_v40  ;;  %4535 = vadd.xlane.f32.xlu0 %v4534_v42  ;;  %v4633_v40 = vsel %vm2417_vm9, %v4315_v2, 0.0  ;;  %v4558_v42 = vsel %vm2417_vm9, %v4290_v14, 0.0 }
 0xd76   :  { %v4569_v5 = vpop.xlane.xlu1 %4568  ;;  %v4518_v18 = vpop.xlane.xlu0 %4517 }
 0xd77   :  { %v5135_v48 = vrot.slane %v4518_v18, %v10294_v54 }
 0xd79   :  { %v10451_v19 = vsel %vm4869_vm14, %v5139_v11, %v5135_v48  ;;  %4622 = vadd.xlane.f32.xlu1 %v4621_v44  ;;  %4547 = vadd.xlane.f32.xlu0 %v4546_v0  ;;  %v4645_v48 = vsel %vm2417_vm9, %v4319_v50, 0.0  ;;  %v4570_v44 = vsel %vm2417_vm9, %v4294_v51, 0.0  ;;  %v5215_v50 = vrot.slane %v4569_v5, %v10297_v43 }
 0xd7a   :  { %v4581_v47 = vpop.xlane.xlu1 %4580  ;;  %v4530_v20 = vpop.xlane.xlu0 %4529 }
 0xd7b   :  { %v5154_v8 = vrot.slane %v4530_v20, %v10294_v54  ;;  %v5196_v20 = vrot.slane %v4557_v36, %v10297_v43  ;;  %v4073_v36 = vadd.f32 %v9887_v12, %v3962_v45 }
 0xd7d   :  { %v10462_v37 = vsel %vm4869_vm14, %v5158_v30, %v5154_v8  ;;  %4634 = vadd.xlane.f32.xlu1 %v4633_v40  ;;  %4559 = vadd.xlane.f32.xlu0 %v4558_v42  ;;  %v4657_v8 = vsel %vm2417_vm9, %v4323_v1, 0.0  ;;  %v4302_v40 = vmul.f32 %v10174_v39, %v10271_v27  ;;  %v4339_v39 = vmul.f32 %v10083_v3, %v10184_v31 }
 0xd7e   :  { %v4593_v13 = vpop.xlane.xlu1 %4592  ;;  %v4542_v18 = vpop.xlane.xlu0 %4541  ;;  %v4077_v5 = vadd.f32 %v4073_v36, %v9552_v25  ;;  %v4310_v31 = vmul.f32 %v10244_v24, %v10271_v27  ;;  %v4182_v25 = vld [vmem:[#allocation3 + $0x2f0] sm:$0xff]  ;;  %v4334_v24 = vmul.f32 %v10210_v38, %v10271_v27 }
 0xd7f   :  { %v5173_v11 = vrot.slane %v4542_v18, %v10294_v54  ;;  %v4693_v18 = vsel %vm2417_vm9, %v4335_v29, 0.0  ;;  %v4594_v32 = vsel %vm2417_vm9, %v4302_v40, 0.0  ;;  %v4705_v46 = vsel %vm2417_vm9, %v4339_v39, 0.0 }
 0xd80   :  { %v4314_v29 = vmul.f32 %v4182_v25, %v10271_v27  ;;  %v4318_v39 = vmul.f32 %v10127_v28, %v10271_v27  ;;  %v4322_v28 = vmul.f32 %v10176_v34, %v10271_v27  ;;  %v4326_v34 = vmul.f32 %v10136_v26, %v10271_v27 }
 0xd81   :  { %v10473_v0 = vsel %vm4869_vm14, %v5177_v53, %v5173_v11  ;;  %4646 = vadd.xlane.f32.xlu1 %v4645_v48  ;;  %4571 = vadd.xlane.f32.xlu0 %v4570_v44  ;;  %v4306_v53 = vmul.f32 %v10208_v17, %v10271_v27  ;;  %v5234_v44 = vrot.slane %v4581_v47, %v10297_v43 }
 0xd82   :  { %v4605_v2 = vpop.xlane.xlu1 %4604  ;;  %v4554_v14 = vpop.xlane.xlu0 %4553  ;;  %v4330_v17 = vmul.f32 %v10158_v58, %v10271_v27  ;;  %v4618_v58 = vsel %vm2417_vm9, %v4310_v31, 0.0  ;;  %v4630_v38 = vsel %vm2417_vm9, %v4314_v29, 0.0  ;;  %v4666_v26 = vsel %vm2417_vm9, %v4326_v34, 0.0 }
 0xd83   :  { %v5192_v30 = vrot.slane %v4554_v14, %v10294_v54  ;;  %v4606_v3 = vsel %vm2417_vm9, %v4306_v53, 0.0 }
 0xd85   :  { %v10486_v42 = vsel %vm4869_vm14, %v5196_v20, %v5192_v30  ;;  %4658 = vadd.xlane.f32.xlu1 %v4657_v8  ;;  %4583 = vadd.xlane.f32.xlu0 %v4582_v63  ;;  %v4081_v20 = vmul.f32 0.2, %v4077_v5  ;;  %v5253_v30 = vrot.slane %v4593_v13, %v10297_v43  ;;  %v4678_v63 = vsel %vm2417_vm9, %v4330_v17, 0.0 }
 0xd86   :  { %v4617_v4 = vpop.xlane.xlu1 %4616  ;;  %v4566_v41 = vpop.xlane.xlu0 %4565 }
 0xd87   :  { %v5211_v51 = vrot.slane %v4566_v41, %v10294_v54  ;;  %v10524_v13 = vmax.f32 %v4077_v5, %v4081_v20  ;;  %v5291_v5 = vrot.slane %v4617_v4, %v10297_v43  ;;  %v4654_v20 = vsel %vm2417_vm9, %v4322_v28, 0.0 }
 0xd89   :  { %v10498_v11 = vsel %vm4869_vm14, %v5215_v50, %v5211_v51  ;;  %4694 = vadd.xlane.f32.xlu1 %v4693_v18  ;;  %4595 = vadd.xlane.f32.xlu0 %v4594_v32  ;;  %v5272_v50 = vrot.slane %v4605_v2, %v10297_v43  ;;  %v4690_v18 = vsel %vm2417_vm9, %v4334_v24, 0.0  ;;  %v4346_v32 = vmul.f32 %v10216_v49, %v10271_v27 }
 0xd8a   :  { %v4629_v12 = vpop.xlane.xlu1 %4628  ;;  %v4578_v48 = vpop.xlane.xlu0 %4577  ;;  %v5622_v49 = vmul.f32 %v9970_v21, %v10524_v13  ;;  %v5626_v21 = vmul.f32 %v9991_v22, %v10524_v13 }
 0xd8b   :  { %v5230_v1 = vrot.slane %v4578_v48, %v10294_v54  ;;  %v5310_v31 = vrot.slane %v4629_v12, %v10297_v43  ;;  %v5367_v12 = vrot.slane %v10269_v15, %v10297_v43 }
 0xd8c   :  { %v5956_v22 = vsel %vm2417_vm9, %v5626_v21, 0.0  ;;  %v8004_v21 = vld [vmem:[#allocation3 + $0x388] sm:$0xff] }
 0xd8d   :  { %v10510_v14 = vsel %vm4869_vm14, %v5234_v44, %v5230_v1  ;;  %4706 = vadd.xlane.f32.xlu1 %v4705_v46  ;;  %4607 = vadd.xlane.f32.xlu0 %v4606_v3  ;;  %v4726_v1 = vsel %vm2417_vm9, %v4346_v32, 0.0  ;;  %v4642_v46 = vsel %vm2417_vm9, %v4318_v39, 0.0  ;;  %v5386_v32 = vrot.slane %v10277_v35, %v10297_v43 }
 0xd8e   :  { %v4641_v45 = vpop.xlane.xlu1 %4640  ;;  %v4590_v47 = vpop.xlane.xlu0 %4589  ;;  %v5638_v34 = vmul.f32 %v8004_v21, %v10524_v13 }
 0xd8f   :  { %v5249_v8 = vrot.slane %v4590_v47, %v10294_v54  ;;  %v5944_v47 = vsel %vm2417_vm9, %v5622_v49, 0.0  ;;  %v4342_v49 = vmul.f32 %v10178_v23, %v10271_v27 }
 0xd91   :  { %v10520_v40 = vsel %vm4869_vm14, %v5253_v30, %v5249_v8  ;;  %4679 = vadd.xlane.f32.xlu1 %v4678_v63  ;;  %4619 = vadd.xlane.f32.xlu0 %v4618_v58  ;;  %v5329_v58 = vrot.slane %v4641_v45, %v10297_v43 }
 0xd92   :  { %v10522_v41 = vpop.xlane.xlu1 %4652  ;;  %v4602_v36 = vpop.xlane.xlu0 %4601 }
 0xd93   :  { %v5268_v51 = vrot.slane %v4602_v36, %v10294_v54  ;;  %v8002_v36 = vld [vmem:[#allocation3 + $0x368] sm:$0xff]  ;;  %v5348_v39 = vrot.slane %v10522_v41, %v10297_v43 }
 0xd95   :  { %v10535_v53 = vsel %vm4869_vm14, %v5272_v50, %v5268_v51  ;;  %4691 = vadd.xlane.f32.xlu1 %v4690_v18  ;;  %4631 = vadd.xlane.f32.xlu0 %v4630_v38  ;;  %v5634_v50 = vmul.f32 %v8002_v36, %v10524_v13  ;;  %v4338_v51 = vmul.f32 %v10238_v9, %v10271_v27  ;;  %v5992_v36 = vsel %vm2417_vm9, %v5638_v34, 0.0 }
 0xd96   :  { %v10537_v48 = vpop.xlane.xlu1 %4688  ;;  %v4614_v2 = vpop.xlane.xlu0 %4613 }
 0xd97   :  { %v5287_v44 = vrot.slane %v4614_v2, %v10294_v54 }
 0xd99   :  { %v10548_v3 = vsel %vm4869_vm14, %v5291_v5, %v5287_v44  ;;  %4727 = vadd.xlane.f32.xlu1 %v4726_v1  ;;  %4643 = vadd.xlane.f32.xlu0 %v4642_v46  ;;  %v5980_v5 = vsel %vm2417_vm9, %v5634_v50, 0.0  ;;  %v4702_v44 = vsel %vm2417_vm9, %v4338_v51, 0.0  ;;  %v8003_v1 = vld [vmem:[#allocation3 + $0x248] sm:$0xff] }
 0xd9a   :  { %v10550_v17 = vpop.xlane.xlu1 %4700  ;;  %v4626_v4 = vpop.xlane.xlu0 %4625  ;;  %v5598_v46 = vmul.f32 %v8003_v1, %v10524_v13  ;;  %v8006_v51 = vld [vmem:[#allocation3 + $0x108] sm:$0xff] }
 0xd9b   :  { %v5306_v25 = vrot.slane %v4626_v4, %v10294_v54 }
 0xd9c   :  { %v5872_v27 = vsel %vm2417_vm9, %v5598_v46, 0.0  ;;  %v8009_v46 = vld [vmem:[#allocation3 + $0x228] sm:$0xff] }
 0xd9d   :  { %v10561_v30 = vsel %vm4869_vm14, %v5310_v31, %v5306_v25  ;;  %5945 = vadd.xlane.f32.xlu1 %v5944_v47  ;;  %4655 = vadd.xlane.f32.xlu0 %v4654_v20  ;;  %v5443_v31 = vrot.slane %v10283_v56, %v10297_v43  ;;  %v5405_v25 = vrot.slane %v10537_v48, %v10297_v43  ;;  %v4714_v20 = vsel %vm2417_vm9, %v4342_v49, 0.0 }
 0xd9e   :  { %v4662_v8 = vpop.xlane.xlu1 %4661  ;;  %v4638_v63 = vpop.xlane.xlu0 %4637  ;;  %v5594_v49 = vmul.f32 %v8009_v46, %v10524_v13 }
 0xd9f   :  { %v5363_v24 = vrot.slane %v4662_v8, %v10294_v54  ;;  %v5325_v29 = vrot.slane %v4638_v63, %v10294_v54  ;;  %v8005_v8 = vld [vmem:[#allocation3 + $0x348] sm:$0xff] }
 0xda0   :  { %v5630_v63 = vmul.f32 %v8005_v8, %v10524_v13 }
 0xda1   :  { %v10574_v18 = vsel %vm4869_vm14, %v5367_v12, %v5363_v24  ;;  %v10577_v15 = vsel %vm4869_vm14, %v5329_v58, %v5325_v29  ;;  %5957 = vadd.xlane.f32.xlu1 %v5956_v22  ;;  %4667 = vadd.xlane.f32.xlu0 %v4666_v26  ;;  %v5462_v24 = vrot.slane %v10290_v52, %v10297_v43 }
 0xda2   :  { %v4674_v45 = vpop.xlane.xlu1 %4673  ;;  %v4650_v38 = vpop.xlane.xlu0 %4649  ;;  %v5424_v29 = vrot.slane %v10550_v17, %v10297_v43  ;;  %v5968_v50 = vsel %vm2417_vm9, %v5630_v63, 0.0 }
 0xda3   :  { %v5382_v2 = vrot.slane %v4674_v45, %v10294_v54  ;;  %v5344_v9 = vrot.slane %v4650_v38, %v10294_v54  ;;  %v5558_v45 = vmul.f32 %v8006_v51, %v10524_v13  ;;  %v8007_v38 = vld [vmem:[#allocation3 + $0x208] sm:$0xff] }
 0xda5   :  { %v10591_v28 = vsel %vm4869_vm14, %v5386_v32, %v5382_v2  ;;  %v10594_v35 = vsel %vm4869_vm14, %v5348_v39, %v5344_v9  ;;  %5981 = vadd.xlane.f32.xlu1 %v5980_v5  ;;  %4703 = vadd.xlane.f32.xlu0 %v4702_v44  ;;  %v5590_v32 = vmul.f32 %v8007_v38, %v10524_v13  ;;  %v5752_v9 = vsel %vm2417_vm9, %v5558_v45, 0.0  ;;  %v8008_v44 = vld [vmem:[#allocation3 + $0x128] sm:$0xff] }
 0xda6   :  { %v4710_v41 = vpop.xlane.xlu1 %4709  ;;  %v4686_v4 = vpop.xlane.xlu0 %4685  ;;  %v5562_v1 = vmul.f32 %v8008_v44, %v10524_v13 }
 0xda7   :  { %v5439_v47 = vrot.slane %v4710_v41, %v10294_v54  ;;  %v5401_v23 = vrot.slane %v4686_v4, %v10294_v54  ;;  %v5848_v5 = vsel %vm2417_vm9, %v5590_v32, 0.0  ;;  %v8014_v32 = vld [vmem:[#allocation3 + $0x3e8] sm:$0xff] }
 0xda9   :  { %v10607_v12 = vsel %vm4869_vm14, %v5443_v31, %v5439_v47  ;;  %v10610_v56 = vsel %vm4869_vm14, %v5405_v25, %v5401_v23  ;;  %5873 = vadd.xlane.f32.xlu1 %v5872_v27  ;;  %4715 = vadd.xlane.f32.xlu0 %v4714_v20  ;;  %v5764_v31 = vsel %vm2417_vm9, %v5562_v1, 0.0  ;;  %v5860_v25 = vsel %vm2417_vm9, %v5594_v49, 0.0  ;;  %v8010_v47 = vld [vmem:[#allocation3 + $0x168] sm:$0xff] }
 0xdaa   :  { %v4722_v48 = vpop.xlane.xlu1 %4721  ;;  %v4698_v58 = vpop.xlane.xlu0 %4697  ;;  %v5570_v23 = vmul.f32 %v8010_v47, %v10524_v13  ;;  %v8011_v27 = vld [vmem:[#allocation3 + $0x268] sm:$0xff] }
 0xdab   :  { %v5458_v22 = vrot.slane %v4722_v48, %v10294_v54  ;;  %v5420_v26 = vrot.slane %v4698_v58, %v10294_v54  ;;  %v5602_v20 = vmul.f32 %v8011_v27, %v10524_v13  ;;  %v8012_v48 = vld [vmem:[#allocation3 + $0x2a8] sm:$0xff] }
 0xdac   :  { %v5788_v8 = vsel %vm2417_vm9, %v5570_v23, 0.0  ;;  %v5610_v58 = vmul.f32 %v8012_v48, %v10524_v13  ;;  %v12034_v49 = vld [vmem:[#allocation9_spill] sm:$0xff] }
 0xdad   :  { %v10623_v39 = vsel %vm4869_vm14, %v5462_v24, %v5458_v22  ;;  %v10626_v52 = vsel %vm4869_vm14, %v5424_v29, %v5420_v26  ;;  %5993 = vadd.xlane.f32.xlu1 %v5992_v36  ;;  %5969 = vadd.xlane.f32.xlu0 %v5968_v50  ;;  %v5884_v63 = vsel %vm2417_vm9, %v5602_v20, 0.0  ;;  %v8013_v24 = vld [vmem:[#allocation3 + $0x3a8] sm:$0xff]  ;;  %v12033_v36 = vld [vmem:[#allocation11_spill] sm:$0xff] }
 0xdae   :  { %v10628_v17 = vpop.xlane.xlu1 %4370  ;;  %v10630_v2 = vpop.xlane.xlu0 %4358  ;;  %v5642_v29 = vmul.f32 %v8013_v24, %v10524_v13  ;;  %v4871_v50 = vadd.s32 4294967280, %v12033_v36  ;;  %v4878_v51 = vadd.s32 4294967272, %v12033_v36  ;;  %v5908_v45 = vsel %vm2417_vm9, %v5610_v58, 0.0  ;;  %v8016_v27 = vld [vmem:[#allocation3 + $0x48] sm:$0xff] }
 0xdaf   :  { %v5534_v20 = vmul.f32 %v8016_v27, %v10524_v13  ;;  %v8020_v27 = vld [vmem:[#allocation3 + $0x2c8] sm:$0xff] }
 0xdb0   :  { %v6004_v38 = vsel %vm2417_vm9, %v5642_v29, 0.0  ;;  %v8018_v29 = vld [vmem:[#allocation3 + $0x188] sm:$0xff] }
 0xdb1   :  { %5753 = vadd.xlane.f32.xlu1 %v5752_v9  ;;  %5849 = vadd.xlane.f32.xlu0 %v5848_v5  ;;  %v5650_v9 = vmul.f32 %v8014_v32, %v10524_v13  ;;  %v8015_v5 = vld [vmem:[#allocation3 + $0x148] sm:$0xff]  ;;  %v5574_v36 = vmul.f32 %v8018_v29, %v10524_v13 }
 0xdb2   :  { %v10636_v41 = vpop.xlane.xlu1 %4382  ;;  %v10638_v4 = vpop.xlane.xlu0 %4670  ;;  %v5566_v44 = vmul.f32 %v8015_v5, %v10524_v13 }
 0xdb3   :  { %v6028_v47 = vsel %vm2417_vm9, %v5650_v9, 0.0  ;;  %v12035_v9 = vld [vmem:[#allocation62_spill] sm:$0xff] }
 0xdb4   :  { %v5776_v23 = vsel %vm2417_vm9, %v5566_v44, 0.0 }
 0xdb5   :  { %5765 = vadd.xlane.f32.xlu1 %v5764_v31  ;;  %5861 = vadd.xlane.f32.xlu0 %v5860_v25  ;;  %v10667_v31 = vsub.s32 %v4871_v50, %v12034_v49  ;;  %v10670_v25 = vsub.s32 %v4878_v51, %v12034_v49  ;;  %v5680_v51 = vsel %vm2417_vm9, %v5534_v20, 0.0  ;;  %v5614_v20 = vmul.f32 %v8020_v27, %v10524_v13 }
 0xdb6   :  { %v10644_v21 = vpop.xlane.xlu1 %4394  ;;  %v10646_v34 = vpop.xlane.xlu0 %4682 }
 0xdb7   :  { %v4882_v50 = vrot.slane %v10630_v2, %v10670_v25  ;;  %v5800_v2 = vsel %vm2417_vm9, %v5574_v36, 0.0 }
 0xdb9   :  { %5789 = vadd.xlane.f32.xlu1 %v5788_v8  ;;  %5885 = vadd.xlane.f32.xlu0 %v5884_v63  ;;  %v8017_v8 = vld [vmem:[#allocation3 + $0x288] sm:$0xff] }
 0xdba   :  { %v10652_v22 = vpop.xlane.xlu1 %4406  ;;  %v10654_v26 = vpop.xlane.xlu0 %4718  ;;  %v5606_v63 = vmul.f32 %v8017_v8, %v10524_v13  ;;  %v4902_v8 = vrot.slane %v10628_v17, %v10670_v25 }
 0xdbd   :  { %5909 = vadd.xlane.f32.xlu1 %v5908_v45  ;;  %6005 = vadd.xlane.f32.xlu0 %v6004_v38  ;;  %v5896_v45 = vsel %vm2417_vm9, %v5606_v63, 0.0  ;;  %v8019_v38 = vld [vmem:[#allocation3 + $0x3c8] sm:$0xff] }
 0xdbe   :  { %v10662_v1 = vpop.xlane.xlu1 %4418  ;;  %v10664_v46 = vpop.xlane.xlu0 %4730  ;;  %v5646_v32 = vmul.f32 %v8019_v38, %v10524_v13  ;;  %v8022_v38 = vld [vmem:[#allocation3 + $0x68] sm:$0xff] }
 0xdc0   :  { %v6016_v63 = vsel %vm2417_vm9, %v5646_v32, 0.0  ;;  %v5538_v32 = vmul.f32 %v8022_v38, %v10524_v13 }
 0xdc1   :  { %6029 = vadd.xlane.f32.xlu1 %v6028_v47  ;;  %5777 = vadd.xlane.f32.xlu0 %v5776_v23 }
 0xdc2   :  { %v10676_v48 = vpop.xlane.xlu1 %4430  ;;  %v4356_v58 = vpop.xlane.xlu0 %4355 }
 0xdc3   :  { %v4875_v24 = vrot.slane %v4356_v58, %v10667_v31  ;;  %v8021_v58 = vld [vmem:[#allocation3 + $0x8] sm:$0xff] }
 0xdc5   :  { %v4877_v5 = vsel %vm4876_vm13, %v4875_v24, %v12035_v9  ;;  %5681 = vadd.xlane.f32.xlu1 %v5680_v51  ;;  %5897 = vadd.xlane.f32.xlu0 %v5896_v45  ;;  %v5526_v24 = vmul.f32 %v8021_v58, %v10524_v13  ;;  %v8023_v9 = vld [vmem:[#allocation3 + $0x28] sm:$0xff] }
 0xdc6   :  { %v4884_v44 = vsel %vm4883_vm2, %v4882_v50, %v4877_v5  ;;  %v10688_v49 = vpop.xlane.xlu1 %4442  ;;  %v4368_v47 = vpop.xlane.xlu0 %4367  ;;  %v5530_v5 = vmul.f32 %v8023_v9, %v10524_v13 }
 0xdc7   :  { %v4897_v23 = vrot.slane %v4368_v47, %v10667_v31  ;;  %v5920_v47 = vsel %vm2417_vm9, %v5614_v20, 0.0  ;;  %v8025_v20 = vld [vmem:[#allocation3 + $0x88] sm:$0xff] }
 0xdc9   :  { %v4898_v29 = vsel %vm4876_vm13, %v4897_v23, %v10322_v62  ;;  %5801 = vadd.xlane.f32.xlu1 %v5800_v2  ;;  %6017 = vadd.xlane.f32.xlu0 %v6016_v63  ;;  %v4921_v62 = vrot.slane %v10636_v41, %v10670_v25  ;;  %v5656_v23 = vsel %vm2417_vm9, %v5526_v24, 0.0  ;;  %v8024_v41 = vld [vmem:[#allocation3 + $0x1a8] sm:$0xff]  ;;  %v5542_v24 = vmul.f32 %v8025_v20, %v10524_v13 }
 0xdca   :  { %v4903_v50 = vsel %vm4883_vm2, %v4902_v8, %v4898_v29  ;;  %v10700_v36 = vpop.xlane.xlu1 %4454  ;;  %v4380_v51 = vpop.xlane.xlu0 %4379  ;;  %v5578_v29 = vmul.f32 %v8024_v41, %v10524_v13  ;;  %v12037_v41 = vld [vmem:[#allocation64_spill] sm:$0xff] }
 0xdcb   :  { %v5475_v45 = vsel %vm5474_vm15, %v4903_v50, %v4884_v44  ;;  %v4916_v17 = vrot.slane %v4380_v51, %v10667_v31  ;;  %v5692_v50 = vsel %vm2417_vm9, %v5538_v32, 0.0  ;;  %v5668_v51 = vsel %vm2417_vm9, %v5530_v5, 0.0 }
 0xdcc   :  { %v4959_v5 = vrot.slane %v10652_v22, %v10670_v25 }
 0xdcd   :  { %v4917_v2 = vsel %vm4876_vm13, %v4916_v17, %v10331_v57  ;;  %5921 = vadd.xlane.f32.xlu1 %v5920_v47  ;;  %5657 = vadd.xlane.f32.xlu0 %v5656_v23  ;;  %v4940_v57 = vrot.slane %v10644_v21, %v10670_v25  ;;  %v12036_v17 = vld [vmem:[#allocation63_spill] sm:$0xff]  ;;  %v5812_v21 = vsel %vm2417_vm9, %v5578_v29, 0.0 }
 0xdce   :  { %v4922_v44 = vsel %vm4883_vm2, %v4921_v62, %v4917_v2  ;;  %v10713_v27 = vpop.xlane.xlu1 %4466  ;;  %v4392_v8 = vpop.xlane.xlu0 %4391  ;;  %v8026_v2 = vld [vmem:[#allocation3 + $0x2e8] sm:$0xff] }
 0xdcf   :  { %v5477_v63 = vsel %vm5476_vm7, %v4922_v44, %v5475_v45  ;;  %v4935_v58 = vrot.slane %v4392_v8, %v10667_v31  ;;  %v5618_v32 = vmul.f32 %v8026_v2, %v10524_v13  ;;  %v5704_v44 = vsel %vm2417_vm9, %v5542_v24, 0.0  ;;  %v8027_v8 = vld [vmem:[#allocation3 + $0x1c8] sm:$0xff] }
 0xdd1   :  { %v4936_v38 = vsel %vm4876_vm13, %v4935_v58, %v12036_v17  ;;  %5693 = vadd.xlane.f32.xlu1 %v5692_v50  ;;  %5669 = vadd.xlane.f32.xlu0 %v5668_v51  ;;  %v5582_v58 = vmul.f32 %v8027_v8, %v10524_v13  ;;  %v5932_v22 = vsel %vm2417_vm9, %v5618_v32, 0.0  ;;  %v8028_v51 = vld [vmem:[#allocation3 + $0xc8] sm:$0xff] }
 0xdd2   :  { %v4941_v45 = vsel %vm4883_vm2, %v4940_v57, %v4936_v38  ;;  %v10726_v9 = vpop.xlane.xlu1 %4478  ;;  %v4404_v62 = vpop.xlane.xlu0 %4403  ;;  %v5550_v24 = vmul.f32 %v8028_v51, %v10524_v13  ;;  %v4978_v38 = vrot.slane %v10662_v1, %v10670_v25  ;;  %v8031_v8 = vld [vmem:[#allocation3 + $0x1e8] sm:$0xff] }
 0xdd3   :  { %v5479_v47 = vsel %vm5478_vm8, %v4941_v45, %v5477_v63  ;;  %v4954_v23 = vrot.slane %v4404_v62, %v10667_v31  ;;  %v5824_v45 = vsel %vm2417_vm9, %v5582_v58, 0.0  ;;  %v8029_v62 = vld [vmem:[#allocation3 + $0xa8] sm:$0xff]  ;;  %v5586_v58 = vmul.f32 %v8031_v8, %v10524_v13 }
 0xdd5   :  { %v4955_v20 = vsel %vm4876_vm13, %v4954_v23, %v12037_v41  ;;  %5813 = vadd.xlane.f32.xlu1 %v5812_v21  ;;  %5705 = vadd.xlane.f32.xlu0 %v5704_v44  ;;  %v5546_v23 = vmul.f32 %v8029_v62, %v10524_v13  ;;  %v8030_v44 = vld [vmem:[#allocation3 + $0xe8] sm:$0xff] }
 0xdd6   :  { %v4960_v63 = vsel %vm4883_vm2, %v4959_v5, %v4955_v20  ;;  %v10739_v29 = vpop.xlane.xlu1 %4490  ;;  %v4416_v57 = vpop.xlane.xlu0 %4415  ;;  %v5554_v1 = vmul.f32 %v8030_v44, %v10524_v13  ;;  %v5728_v20 = vsel %vm2417_vm9, %v5550_v24, 0.0  ;;  %v12039_v44 = vld [vmem:[#allocation14_spill] sm:$0xff] }
 0xdd7   :  { %v4973_v50 = vrot.slane %v4416_v57, %v10667_v31  ;;  %v5481_v17 = vsel %vm5480_vm10, %v4960_v63, %v5479_v47  ;;  %v5716_v63 = vsel %vm2417_vm9, %v5546_v23, 0.0 }
 0xdd8   :  { %v5740_v24 = vsel %vm2417_vm9, %v5554_v1, 0.0 }
 0xdd9   :  { %v4974_v21 = vsel %vm4876_vm13, %v4973_v50, %v10360_v59  ;;  %5933 = vadd.xlane.f32.xlu1 %v5932_v22  ;;  %5825 = vadd.xlane.f32.xlu0 %v5824_v45  ;;  %v4997_v59 = vrot.slane %v10676_v48, %v10670_v25  ;;  %v5016_v48 = vrot.slane %v10688_v49, %v10670_v25 }
 0xdda   :  { %v4979_v2 = vsel %vm4883_vm2, %v4978_v38, %v4974_v21  ;;  %v10752_v32 = vpop.xlane.xlu1 %4502  ;;  %v4428_v5 = vpop.xlane.xlu0 %4427  ;;  %v5836_v38 = vsel %vm2417_vm9, %v5586_v58, 0.0  ;;  %v5035_v49 = vrot.slane %v10700_v36, %v10670_v25  ;;  %v5054_v36 = vrot.slane %v10713_v27, %v10670_v25 }
 0xddb   :  { %v4992_v47 = vrot.slane %v4428_v5, %v10667_v31  ;;  %v5483_v41 = vsel %vm5482_vm11, %v4979_v2, %v5481_v17  ;;  %v12038_v5 = vld [vmem:[#allocation13_spill] sm:$0xff] }
 0xddd   :  { %v4993_v57 = vsel %vm4876_vm13, %v4992_v47, %v10369_v6  ;;  %5729 = vadd.xlane.f32.xlu1 %v5728_v20  ;;  %5717 = vadd.xlane.f32.xlu0 %v5716_v63  ;;  %v5965_v47 = vsel %vm2417_vm9, %v12038_v5, 0.0  ;;  %v12040_v20 = vld [vmem:[#allocation15_spill] sm:$0xff] }
 0xdde   :  { %v10764_v50 = vpop.xlane.xlu1 %4514  ;;  %v4440_v22 = vpop.xlane.xlu0 %4439  ;;  %v4998_v13 = vsel %vm4883_vm2, %v4997_v59, %v4993_v57  ;;  %v5845_v63 = vsel %vm2417_vm9, %v12040_v20, 0.0  ;;  %v12041_v57 = vld [vmem:[#allocation16_spill] sm:$0xff] }
 0xddf   :  { %v5011_v51 = vrot.slane %v4440_v22, %v10667_v31  ;;  %v5485_v17 = vsel %vm5484_vm12, %v4998_v13, %v5483_v41  ;;  %v5953_v22 = vsel %vm2417_vm9, %v12041_v57, 0.0  ;;  %v8032_v57 = vld [vmem:[#allocation3 + $0x140] sm:$0xff] }
 0xde1   :  { %v5012_v6 = vsel %vm4876_vm13, %v5011_v51, %v10379_v33  ;;  %5741 = vadd.xlane.f32.xlu1 %v5740_v24  ;;  %5837 = vadd.xlane.f32.xlu0 %v5836_v38  ;;  %v5941_v33 = vsel %vm2417_vm9, %v12039_v44, 0.0  ;;  %v5073_v24 = vrot.slane %v10726_v9, %v10670_v25  ;;  %v12042_v38 = vld [vmem:[#allocation17_spill] sm:$0xff]  ;;  %v5092_v44 = vrot.slane %v10739_v29, %v10670_v25 }
 0xde2   :  { %v10775_v45 = vpop.xlane.xlu1 %4526  ;;  %v4452_v62 = vpop.xlane.xlu0 %4451  ;;  %v5017_v23 = vsel %vm4883_vm2, %v5016_v48, %v5012_v6  ;;  %v5857_v6 = vsel %vm2417_vm9, %v12042_v38, 0.0 }
 0xde3   :  { %v5030_v21 = vrot.slane %v4452_v62, %v10667_v31  ;;  %v10780_v2 = vsel %vm5486_vm5, %v5017_v23, %v5485_v17  ;;  %v12043_v62 = vld [vmem:[#allocation18_spill] sm:$0xff] }
 0xde5   :  { %v5031_v1 = vsel %vm4876_vm13, %v5030_v21, %v10389_v7  ;;  %5966 = vadd.xlane.f32.xlu1 %v5965_v47  ;;  %5942 = vadd.xlane.f32.xlu0 %v5941_v33  ;;  %v12044_v33 = vld [vmem:[#allocation19_spill] sm:$0xff] }
 0xde6   :  { %v5036_v8 = vsel %vm4883_vm2, %v5035_v49, %v5031_v1  ;;  %v10791_v58 = vpop.xlane.xlu1 %4538  ;;  %v4464_v41 = vpop.xlane.xlu0 %4463  ;;  %v5881_v1 = vsel %vm2417_vm9, %v12044_v33, 0.0 }
 0xde7   :  { %v5049_v59 = vrot.slane %v4464_v41, %v10667_v31 }
 0xde9   :  { %v5050_v7 = vsel %vm4876_vm13, %v5049_v59, %v10399_v60  ;;  %5846 = vadd.xlane.f32.xlu1 %v5845_v63  ;;  %5954 = vadd.xlane.f32.xlu0 %v5953_v22  ;;  %v5977_v60 = vsel %vm2417_vm9, %v12043_v62, 0.0  ;;  %v12046_v22 = vld [vmem:[#allocation12_spill] sm:$0xff] }
 0xdea   :  { %v5055_v13 = vsel %vm4883_vm2, %v5054_v36, %v5050_v7  ;;  %v10803_v51 = vpop.xlane.xlu1 %4550  ;;  %v4476_v17 = vpop.xlane.xlu0 %4475  ;;  %v5565_v7 = vmul.f32 %v8032_v57, %v12046_v22 }
 0xdeb   :  { %v5488_v48 = vsel %vm5474_vm15, %v5055_v13, %v5036_v8  ;;  %v5068_v27 = vrot.slane %v4476_v17, %v10667_v31  ;;  %v12045_v8 = vld [vmem:[#allocation20_spill] sm:$0xff]  ;;  %v5111_v13 = vrot.slane %v10752_v32, %v10670_v25  ;;  %v12047_v17 = vld [vmem:[#allocation21_spill] sm:$0xff] }
 0xded   :  { %v5069_v23 = vsel %vm4876_vm13, %v5068_v27, %v10409_v61  ;;  %5858 = vadd.xlane.f32.xlu1 %v5857_v6  ;;  %5978 = vadd.xlane.f32.xlu0 %v5977_v60  ;;  %v5869_v61 = vsel %vm2417_vm9, %v12045_v8, 0.0 }
 0xdee   :  { %v5074_v21 = vsel %vm4883_vm2, %v5073_v24, %v5069_v23  ;;  %v10816_v49 = vpop.xlane.xlu1 %4562  ;;  %v4488_v5 = vpop.xlane.xlu0 %4487  ;;  %v8033_v24 = vld [vmem:[#allocation3 + $0x100] sm:$0xff] }
 0xdef   :  { %v5489_v47 = vsel %vm5476_vm7, %v5074_v21, %v5488_v48  ;;  %v5087_v9 = vrot.slane %v4488_v5, %v10667_v31  ;;  %v12048_v48 = vld [vmem:[#allocation22_spill] sm:$0xff]  ;;  %v5557_v38 = vmul.f32 %v8033_v24, %v12046_v22  ;;  %v5130_v5 = vrot.slane %v10764_v50, %v10670_v25  ;;  %v12050_v24 = vld [vmem:[#allocation24_spill] sm:$0xff] }
 0xdf0   :  { %v5989_v27 = vsel %vm2417_vm9, %v12048_v48, 0.0 }
 0xdf1   :  { %v5088_v41 = vsel %vm4876_vm13, %v5087_v9, %v10419_v10  ;;  %5882 = vadd.xlane.f32.xlu1 %v5881_v1  ;;  %5870 = vadd.xlane.f32.xlu0 %v5869_v61  ;;  %v6001_v10 = vsel %vm2417_vm9, %v12047_v17, 0.0  ;;  %v5749_v9 = vsel %vm2417_vm9, %v5557_v38, 0.0  ;;  %v6013_v38 = vsel %vm2417_vm9, %v12050_v24, 0.0 }
 0xdf2   :  { %v5093_v59 = vsel %vm4883_vm2, %v5092_v44, %v5088_v41  ;;  %v10829_v36 = vpop.xlane.xlu1 %4574  ;;  %v4500_v20 = vpop.xlane.xlu0 %4499  ;;  %v8034_v44 = vld [vmem:[#allocation3 + $0x120] sm:$0xff] }
 0xdf3   :  { %v5490_v63 = vsel %vm5478_vm8, %v5093_v59, %v5489_v47  ;;  %v5106_v29 = vrot.slane %v4500_v20, %v10667_v31  ;;  %v5773_v47 = vsel %vm2417_vm9, %v5565_v7, 0.0  ;;  %v5149_v59 = vrot.slane %v10775_v45, %v10670_v25  ;;  %v12049_v20 = vld [vmem:[#allocation23_spill] sm:$0xff] }
 0xdf5   :  { %v5107_v6 = vsel %vm4876_vm13, %v5106_v29, %v10429_v16  ;;  %6002 = vadd.xlane.f32.xlu1 %v6001_v10  ;;  %5990 = vadd.xlane.f32.xlu0 %v5989_v27  ;;  %v5561_v16 = vmul.f32 %v8034_v44, %v12046_v22  ;;  %v5168_v27 = vrot.slane %v10791_v58, %v10670_v25 }
 0xdf6   :  { %v5112_v62 = vsel %vm4883_vm2, %v5111_v13, %v5107_v6  ;;  %v10844_v60 = vpop.xlane.xlu1 %4586  ;;  %v4512_v23 = vpop.xlane.xlu0 %4511 }
 0xdf7   :  { %v5125_v32 = vrot.slane %v4512_v23, %v10667_v31  ;;  %v5491_v21 = vsel %vm5480_vm10, %v5112_v62, %v5490_v63  ;;  %v5893_v63 = vsel %vm2417_vm9, %v12049_v20, 0.0  ;;  %v5761_v29 = vsel %vm2417_vm9, %v5561_v16, 0.0 }
 0xdf8   :  { %v5187_v16 = vrot.slane %v10803_v51, %v10670_v25  ;;  %v5206_v51 = vrot.slane %v10816_v49, %v10670_v25 }
 0xdf9   :  { %v5126_v33 = vsel %vm4876_vm13, %v5125_v32, %v10440_v55  ;;  %5774 = vadd.xlane.f32.xlu1 %v5773_v47  ;;  %5750 = vadd.xlane.f32.xlu0 %v5749_v9  ;;  %v8035_v55 = vld [vmem:[#allocation3 + $0x160] sm:$0xff] }
 0xdfa   :  { %v5131_v1 = vsel %vm4883_vm2, %v5130_v5, %v5126_v33  ;;  %v10856_v8 = vpop.xlane.xlu1 %4598  ;;  %v4524_v61 = vpop.xlane.xlu0 %4523  ;;  %v5569_v57 = vmul.f32 %v8035_v55, %v12046_v22  ;;  %v8037_v47 = vld [vmem:[#allocation3 + $0x20] sm:$0xff] }
 0xdfb   :  { %v5144_v41 = vrot.slane %v4524_v61, %v10667_v31  ;;  %v5492_v50 = vsel %vm5482_vm11, %v5131_v1, %v5491_v21  ;;  %v5529_v9 = vmul.f32 %v8037_v47, %v12046_v22  ;;  %v12051_v33 = vld [vmem:[#allocation25_spill] sm:$0xff] }
 0xdfc   :  { %v5785_v6 = vsel %vm2417_vm9, %v5569_v57, 0.0  ;;  %v5905_v1 = vsel %vm2417_vm9, %v12051_v33, 0.0  ;;  %v8038_v57 = vld [vmem:[#allocation3 + $0x80] sm:$0xff] }
 0xdfd   :  { %v5145_v7 = vsel %vm4876_vm13, %v5144_v41, %v10451_v19  ;;  %5894 = vadd.xlane.f32.xlu1 %v5893_v63  ;;  %5762 = vadd.xlane.f32.xlu0 %v5761_v29  ;;  %v8036_v19 = vld [vmem:[#allocation3] sm:$0xff]  ;;  %v5665_v63 = vsel %vm2417_vm9, %v5529_v9, 0.0  ;;  %v12052_v29 = vld [vmem:[#allocation26_spill] sm:$0xff] }
 0xdfe   :  { %v10868_v13 = vpop.xlane.xlu1 %4610  ;;  %v4536_v17 = vpop.xlane.xlu0 %4535  ;;  %v5150_v10 = vsel %vm4883_vm2, %v5149_v59, %v5145_v7  ;;  %v5525_v62 = vmul.f32 %v8036_v19, %v12046_v22  ;;  %v6025_v55 = vsel %vm2417_vm9, %v12052_v29, 0.0  ;;  %v8039_v7 = vld [vmem:[#allocation3 + $0x40] sm:$0xff]  ;;  %v5225_v19 = vrot.slane %v10829_v36, %v10670_v25 }
 0xdff   :  { %v5163_v45 = vrot.slane %v4536_v17, %v10667_v31  ;;  %v5493_v48 = vsel %vm5484_vm12, %v5150_v10, %v5492_v50  ;;  %v5533_v17 = vmul.f32 %v8039_v7, %v12046_v22  ;;  %v5263_v7 = vrot.slane %v10856_v8, %v10670_v25 }
 0xe01   :  { %v5164_v23 = vsel %vm4876_vm13, %v5163_v45, %v10462_v37  ;;  %6014 = vadd.xlane.f32.xlu1 %v6013_v38  ;;  %5786 = vadd.xlane.f32.xlu0 %v5785_v6  ;;  %v5653_v37 = vsel %vm2417_vm9, %v5525_v62, 0.0  ;;  %v8040_v38 = vld [vmem:[#allocation3 + $0x1c0] sm:$0xff] }
 0xe02   :  { %v10881_v32 = vpop.xlane.xlu1 %4622  ;;  %v4548_v21 = vpop.xlane.xlu0 %4547  ;;  %v5169_v5 = vsel %vm4883_vm2, %v5168_v27, %v5164_v23  ;;  %v5581_v6 = vmul.f32 %v8040_v38, %v12046_v22  ;;  %v8041_v23 = vld [vmem:[#allocation3 + $0x180] sm:$0xff] }
 0xe03   :  { %v5182_v58 = vrot.slane %v4548_v21, %v10667_v31  ;;  %v10887_v44 = vsel %vm5486_vm5, %v5169_v5, %v5493_v48  ;;  %v5573_v21 = vmul.f32 %v8041_v23, %v12046_v22  ;;  %v8046_v23 = vld [vmem:[#allocation3 + $0x1a0] sm:$0xff] }
 0xe05   :  { %v5183_v61 = vsel %vm4876_vm13, %v5182_v58, %v10473_v0  ;;  %5654 = vadd.xlane.f32.xlu1 %v5653_v37  ;;  %5906 = vadd.xlane.f32.xlu0 %v5905_v1  ;;  %v5541_v0 = vmul.f32 %v8038_v57, %v12046_v22  ;;  %v8042_v37 = vld [vmem:[#allocation3 + $0xa0] sm:$0xff]  ;;  %v5244_v1 = vrot.slane %v10844_v60, %v10670_v25 }
 0xe06   :  { %v5188_v41 = vsel %vm4883_vm2, %v5187_v16, %v5183_v61  ;;  %v10897_v50 = vpop.xlane.xlu1 %4634  ;;  %v4560_v59 = vpop.xlane.xlu0 %4559  ;;  %v5545_v33 = vmul.f32 %v8042_v37, %v12046_v22  ;;  %v5821_v61 = vsel %vm2417_vm9, %v5581_v6, 0.0  ;;  %v8044_v57 = vld [vmem:[#allocation3 + $0x1e0] sm:$0xff] }
 0xe07   :  { %v5201_v20 = vrot.slane %v4560_v59, %v10667_v31  ;;  %v5701_v62 = vsel %vm2417_vm9, %v5541_v0, 0.0  ;;  %v5585_v0 = vmul.f32 %v8044_v57, %v12046_v22  ;;  %v8048_v57 = vld [vmem:[#allocation3 + $0xc0] sm:$0xff] }
 0xe09   :  { %v5202_v10 = vsel %vm4876_vm13, %v5201_v20, %v10486_v42  ;;  %5666 = vadd.xlane.f32.xlu1 %v5665_v63  ;;  %6026 = vadd.xlane.f32.xlu0 %v6025_v55  ;;  %v5677_v42 = vsel %vm2417_vm9, %v5533_v17, 0.0  ;;  %v5713_v17 = vsel %vm2417_vm9, %v5545_v33, 0.0 }
 0xe0a   :  { %v5207_v45 = vsel %vm4883_vm2, %v5206_v51, %v5202_v10  ;;  %v10910_v48 = vpop.xlane.xlu1 %4646  ;;  %v4572_v27 = vpop.xlane.xlu0 %4571  ;;  %v8045_v10 = vld [vmem:[#allocation3 + $0x60] sm:$0xff] }
 0xe0b   :  { %v5495_v49 = vsel %vm5474_vm15, %v5207_v45, %v5188_v41  ;;  %v5220_v24 = vrot.slane %v4572_v27, %v10667_v31  ;;  %v8043_v41 = vld [vmem:[#allocation3 + $0x2c0] sm:$0xff]  ;;  %v5537_v45 = vmul.f32 %v8045_v10, %v12046_v22 }
 0xe0c   :  { %v5613_v59 = vmul.f32 %v8043_v41, %v12046_v22 }
 0xe0d   :  { %v5221_v5 = vsel %vm4876_vm13, %v5220_v24, %v10498_v11  ;;  %5702 = vadd.xlane.f32.xlu1 %v5701_v62  ;;  %5678 = vadd.xlane.f32.xlu0 %v5677_v42  ;;  %v5797_v11 = vsel %vm2417_vm9, %v5573_v21, 0.0  ;;  %v5833_v62 = vsel %vm2417_vm9, %v5585_v0, 0.0  ;;  %v5689_v42 = vsel %vm2417_vm9, %v5537_v45, 0.0 }
 0xe0e   :  { %v5226_v58 = vsel %vm4883_vm2, %v5225_v19, %v5221_v5  ;;  %v10923_v47 = vpop.xlane.xlu1 %4658  ;;  %v4584_v9 = vpop.xlane.xlu0 %4583  ;;  %v5282_v19 = vrot.slane %v10868_v13, %v10670_v25  ;;  %v5549_v0 = vmul.f32 %v8048_v57, %v12046_v22 }
 0xe0f   :  { %v5496_v16 = vsel %vm5476_vm7, %v5226_v58, %v5495_v49  ;;  %v5239_v36 = vrot.slane %v4584_v9, %v10667_v31 }
 0xe11   :  { %v5240_v20 = vsel %vm4876_vm13, %v5239_v36, %v10510_v14  ;;  %5822 = vadd.xlane.f32.xlu1 %v5821_v61  ;;  %5798 = vadd.xlane.f32.xlu0 %v5797_v11  ;;  %v5917_v14 = vsel %vm2417_vm9, %v5613_v59, 0.0  ;;  %v8047_v36 = vld [vmem:[#allocation3 + $0x2e0] sm:$0xff] }
 0xe12   :  { %v5245_v63 = vsel %vm4883_vm2, %v5244_v1, %v5240_v20  ;;  %v4695_v51 = vpop.xlane.xlu1 %4694  ;;  %v4596_v29 = vpop.xlane.xlu0 %4595  ;;  %v5617_v37 = vmul.f32 %v8047_v36, %v12046_v22  ;;  %v5396_v1 = vrot.slane %v10646_v34, %v10670_v25  ;;  %v12053_v61 = vld [vmem:[#allocation28_spill] sm:$0xff]  ;;  %v12056_v36 = vld [vmem:[#allocation31_spill] sm:$0xff] }
 0xe13   :  { %v5497_v55 = vsel %vm5478_vm8, %v5245_v63, %v5496_v16  ;;  %v5258_v60 = vrot.slane %v4596_v29, %v10667_v31  ;;  %v5950_v11 = vsel %vm2417_vm9, %v12053_v61, 0.0 }
 0xe14   :  { %v5929_v10 = vsel %vm2417_vm9, %v5617_v37, 0.0 }
 0xe15   :  { %v5259_v27 = vsel %vm4876_vm13, %v5258_v60, %v10520_v40  ;;  %5714 = vadd.xlane.f32.xlu1 %v5713_v17  ;;  %5918 = vadd.xlane.f32.xlu0 %v5917_v14  ;;  %v5577_v40 = vmul.f32 %v8046_v23, %v12046_v22  ;;  %v12054_v17 = vld [vmem:[#allocation29_spill] sm:$0xff]  ;;  %v5725_v23 = vsel %vm2417_vm9, %v5549_v0, 0.0 }
 0xe16   :  { %v5264_v49 = vsel %vm4883_vm2, %v5263_v7, %v5259_v27  ;;  %v10947_v24 = vpop.xlane.xlu1 %4706  ;;  %v4608_v38 = vpop.xlane.xlu0 %4607  ;;  %v5415_v7 = vrot.slane %v4695_v51, %v10670_v25  ;;  %v5866_v14 = vsel %vm2417_vm9, %v12054_v17, 0.0 }
 0xe17   :  { %v5277_v6 = vrot.slane %v4608_v38, %v10667_v31  ;;  %v5498_v8 = vsel %vm5480_vm10, %v5264_v49, %v5497_v55  ;;  %v5809_v41 = vsel %vm2417_vm9, %v5577_v40, 0.0  ;;  %v8049_v40 = vld [vmem:[#allocation3 + $0xe0] sm:$0xff]  ;;  %v5434_v17 = vrot.slane %v10947_v24, %v10670_v25 }
 0xe19   :  { %v5278_v21 = vsel %vm4876_vm13, %v5277_v6, %v10535_v53  ;;  %5834 = vadd.xlane.f32.xlu1 %v5833_v62  ;;  %5690 = vadd.xlane.f32.xlu0 %v5689_v42  ;;  %v5301_v53 = vrot.slane %v10881_v32, %v10670_v25  ;;  %v5339_v42 = vrot.slane %v10910_v48, %v10670_v25 }
 0xe1a   :  { %v5283_v5 = vsel %vm4883_vm2, %v5282_v19, %v5278_v21  ;;  %v4680_v58 = vpop.xlane.xlu1 %4679  ;;  %v4620_v9 = vpop.xlane.xlu0 %4619  ;;  %v12055_v19 = vld [vmem:[#allocation30_spill] sm:$0xff]  ;;  %v5553_v21 = vmul.f32 %v8049_v40, %v12046_v22  ;;  %v5358_v22 = vrot.slane %v10923_v47, %v10670_v25  ;;  %v5377_v47 = vrot.slane %v10638_v4, %v10670_v25 }
 0xe1b   :  { %v5391_v16 = vrot.slane %v4680_v58, %v10667_v31  ;;  %v5296_v13 = vrot.slane %v4620_v9, %v10667_v31  ;;  %v5499_v33 = vsel %vm5482_vm11, %v5283_v5, %v5498_v8  ;;  %v5986_v62 = vsel %vm2417_vm9, %v12055_v19, 0.0 }
 0xe1c   :  { %v5737_v37 = vsel %vm2417_vm9, %v5553_v21, 0.0  ;;  %v5453_v19 = vrot.slane %v10654_v26, %v10670_v25 }
 0xe1d   :  { %v5392_v59 = vsel %vm4876_vm13, %v5391_v16, %v10591_v28  ;;  %v5297_v20 = vsel %vm4876_vm13, %v5296_v13, %v10548_v3  ;;  %5951 = vadd.xlane.f32.xlu1 %v5950_v11  ;;  %5810 = vadd.xlane.f32.xlu0 %v5809_v41  ;;  %v5320_v3 = vrot.slane %v10897_v50, %v10670_v25  ;;  %v12057_v41 = vld [vmem:[#allocation32_spill] sm:$0xff] }
 0xe1e   :  { %v10975_v63 = vsel %vm4883_vm2, %v5396_v1, %v5392_v59  ;;  %v4692_v34 = vpop.xlane.xlu1 %4691  ;;  %v4632_v29 = vpop.xlane.xlu0 %4631  ;;  %v5302_v32 = vsel %vm4883_vm2, %v5301_v53, %v5297_v20  ;;  %v5998_v59 = vsel %vm2417_vm9, %v12057_v41, 0.0  ;;  %v12058_v20 = vld [vmem:[#allocation33_spill] sm:$0xff] }
 0xe1f   :  { %v5410_v55 = vrot.slane %v4692_v34, %v10667_v31  ;;  %v5315_v60 = vrot.slane %v4632_v29, %v10667_v31  ;;  %v5500_v28 = vsel %vm5484_vm12, %v5302_v32, %v5499_v33  ;;  %v8050_v34 = vld [vmem:[#allocation3 + $0x358] sm:$0xff] }
 0xe20   :  { %v12059_v29 = vld [vmem:[#allocation27_spill] sm:$0xff] }
 0xe21   :  { %v5411_v45 = vsel %vm4876_vm13, %v5410_v55, %v10610_v56  ;;  %v5316_v27 = vsel %vm4876_vm13, %v5315_v60, %v10561_v30  ;;  %5867 = vadd.xlane.f32.xlu1 %v5866_v14  ;;  %5930 = vadd.xlane.f32.xlu0 %v5929_v10  ;;  %v5472_v30 = vrot.slane %v10664_v46, %v10670_v25  ;;  %v12060_v14 = vld [vmem:[#allocation34_spill] sm:$0xff] }
 0xe22   :  { %v5416_v49 = vsel %vm4883_vm2, %v5415_v7, %v5411_v45  ;;  %v4728_v38 = vpop.xlane.xlu1 %4727  ;;  %v4644_v6 = vpop.xlane.xlu0 %4643  ;;  %v5321_v50 = vsel %vm4883_vm2, %v5320_v3, %v5316_v27  ;;  %v5632_v32 = vmul.f32 %v8050_v34, %v12059_v29  ;;  %v8051_v3 = vld [vmem:[#allocation3 + $0x18] sm:$0xff]  ;;  %v12067_v34 = vld [vmem:[#allocation42_spill] sm:$0xff] }
 0xe23   :  { %v5467_v51 = vrot.slane %v4728_v38, %v10667_v31  ;;  %v5334_v8 = vrot.slane %v4644_v6, %v10667_v31  ;;  %v10999_v56 = vsel %vm5486_vm5, %v5321_v50, %v5500_v28  ;;  %v5528_v7 = vmul.f32 %v8051_v3, %v12059_v29 }
 0xe24   :  { %v5974_v10 = vsel %vm2417_vm9, %v5632_v32, 0.0  ;;  %v5782_v32 = vsel %vm2417_vm9, %v12067_v34, 0.0  ;;  %v8059_v34 = vld [vmem:[#allocation3 + $0x98] sm:$0xff] }
 0xe25   :  { %v5468_v5 = vsel %vm4876_vm13, %v5467_v51, %v10623_v39  ;;  %v5335_v58 = vsel %vm4876_vm13, %v5334_v8, %v10577_v15  ;;  %5987 = vadd.xlane.f32.xlu1 %v5986_v62  ;;  %5726 = vadd.xlane.f32.xlu0 %v5725_v23  ;;  %v5878_v39 = vsel %vm2417_vm9, %v12056_v36, 0.0  ;;  %v12061_v62 = vld [vmem:[#allocation35_spill] sm:$0xff] }
 0xe26   :  { %v5340_v9 = vsel %vm4883_vm2, %v5339_v42, %v5335_v58  ;;  %v11012_v16 = vpop.xlane.xlu1 %5945  ;;  %v4656_v46 = vpop.xlane.xlu0 %4655  ;;  %v5473_v48 = vsel %vm4883_vm2, %v5472_v30, %v5468_v5  ;;  %v8052_v30 = vld [vmem:[#allocation3 + $0x58] sm:$0xff] }
 0xe27   :  { %v5353_v13 = vrot.slane %v4656_v46, %v10667_v31  ;;  %v12062_v58 = vld [vmem:[#allocation36_spill] sm:$0xff] }
 0xe29   :  { %v5354_v15 = vsel %vm4876_vm13, %v5353_v13, %v10594_v35  ;;  %5879 = vadd.xlane.f32.xlu1 %v5878_v39  ;;  %5738 = vadd.xlane.f32.xlu0 %v5737_v37  ;;  %v5962_v35 = vsel %vm2417_vm9, %v12058_v20, 0.0  ;;  %v12064_v39 = vld [vmem:[#allocation39_spill] sm:$0xff] }
 0xe2a   :  { %v5359_v33 = vsel %vm4883_vm2, %v5358_v22, %v5354_v15  ;;  %v11024_v1 = vpop.xlane.xlu1 %5957  ;;  %v4668_v53 = vpop.xlane.xlu0 %4667  ;;  %v12063_v22 = vld [vmem:[#allocation38_spill] sm:$0xff]  ;;  %v5890_v37 = vsel %vm2417_vm9, %v12064_v39, 0.0  ;;  %v12073_v39 = vld [vmem:[#allocation48_spill] sm:$0xff] }
 0xe2b   :  { %v5502_v61 = vsel %vm5474_vm15, %v5359_v33, %v5340_v9  ;;  %v5372_v11 = vrot.slane %v4668_v53, %v10667_v31  ;;  %v5770_v9 = vsel %vm2417_vm9, %v12062_v58, 0.0  ;;  %v5806_v36 = vsel %vm2417_vm9, %v12063_v22, 0.0  ;;  %v12072_v22 = vld [vmem:[#allocation47_spill] sm:$0xff] }
 0xe2d   :  { %v5373_v55 = vsel %vm4876_vm13, %v5372_v11, %v10574_v18  ;;  %5999 = vadd.xlane.f32.xlu1 %v5998_v59  ;;  %5963 = vadd.xlane.f32.xlu0 %v5962_v35  ;;  %v5758_v18 = vsel %vm2417_vm9, %v12060_v14, 0.0 }
 0xe2e   :  { %v5378_v60 = vsel %vm4883_vm2, %v5377_v47, %v5373_v55  ;;  %v11038_v57 = vpop.xlane.xlu1 %5981  ;;  %v4704_v0 = vpop.xlane.xlu0 %4703  ;;  %v8053_v47 = vld [vmem:[#allocation3 + $0x78] sm:$0xff] }
 0xe2f   :  { %v5503_v4 = vsel %vm5476_vm7, %v5378_v60, %v5502_v61  ;;  %v5429_v28 = vrot.slane %v4704_v0, %v10667_v31  ;;  %v12066_v61 = vld [vmem:[#allocation41_spill] sm:$0xff]  ;;  %v5540_v41 = vmul.f32 %v8053_v47, %v12059_v29  ;;  %v12068_v0 = vld [vmem:[#allocation43_spill] sm:$0xff] }
 0xe30   :  { %v5504_v45 = vsel %vm5478_vm8, %v10975_v63, %v5503_v4  ;;  %v5662_v63 = vsel %vm2417_vm9, %v5528_v7, 0.0  ;;  %v6010_v11 = vsel %vm2417_vm9, %v12066_v61, 0.0  ;;  %v5818_v4 = vsel %vm2417_vm9, %v12068_v0, 0.0  ;;  %v8054_v7 = vld [vmem:[#allocation3 + $0x3d8] sm:$0xff]  ;;  %v12074_v47 = vld [vmem:[#allocation49_spill] sm:$0xff] }
 0xe31   :  { %v5430_v27 = vsel %vm4876_vm13, %v5429_v28, %v10626_v52  ;;  %5759 = vadd.xlane.f32.xlu1 %v5758_v18  ;;  %5975 = vadd.xlane.f32.xlu0 %v5974_v10  ;;  %v5505_v38 = vsel %vm5480_vm10, %v5416_v49, %v5504_v45  ;;  %v5854_v52 = vsel %vm2417_vm9, %v12061_v62, 0.0  ;;  %v5536_v49 = vmul.f32 %v8052_v30, %v12059_v29  ;;  %v12069_v28 = vld [vmem:[#allocation44_spill] sm:$0xff]  ;;  %v12070_v10 = vld [vmem:[#allocation45_spill] sm:$0xff] }
 0xe32   :  { %v5435_v6 = vsel %vm4883_vm2, %v5434_v17, %v5430_v27  ;;  %v11054_v50 = vpop.xlane.xlu1 %5873  ;;  %v4716_v24 = vpop.xlane.xlu0 %4715  ;;  %v5698_v35 = vsel %vm2417_vm9, %v5540_v41, 0.0  ;;  %v5902_v3 = vsel %vm2417_vm9, %v12069_v28, 0.0  ;;  %v5648_v17 = vmul.f32 %v8054_v7, %v12059_v29  ;;  %v12075_v28 = vld [vmem:[#allocation50_spill] sm:$0xff] }
 0xe33   :  { %v5448_v51 = vrot.slane %v4716_v24, %v10667_v31  ;;  %v5506_v8 = vsel %vm5482_vm11, %v5435_v6, %v5505_v38  ;;  %v5686_v5 = vsel %vm2417_vm9, %v5536_v49, 0.0  ;;  %v5938_v45 = vsel %vm2417_vm9, %v12070_v10, 0.0  ;;  %v8055_v38 = vld [vmem:[#allocation3 + $0xd8] sm:$0xff]  ;;  %v12076_v10 = vld [vmem:[#allocation37_spill] sm:$0xff] }
 0xe34   :  { %v6022_v27 = vsel %vm2417_vm9, %v5648_v17, 0.0  ;;  %v5552_v6 = vmul.f32 %v8055_v38, %v12059_v29  ;;  %v8056_v24 = vld [vmem:[#allocation3 + $0x38] sm:$0xff]  ;;  %v5863_v41 = vsel %vm2417_vm9, %v12074_v47, 0.0  ;;  %v8060_v17 = vld [vmem:[#allocation3 + $0x110] sm:$0xff] }
 0xe35   :  { %v5449_v42 = vsel %vm4876_vm13, %v5448_v51, %v10607_v12  ;;  %5663 = vadd.xlane.f32.xlu1 %v5662_v63  ;;  %5855 = vadd.xlane.f32.xlu0 %v5854_v52  ;;  %v5532_v51 = vmul.f32 %v8056_v24, %v12059_v29  ;;  %v8057_v52 = vld [vmem:[#allocation3 + $0x178] sm:$0xff] }
 0xe36   :  { %v11066_v23 = vpop.xlane.xlu1 %5993  ;;  %v11068_v40 = vpop.xlane.xlu0 %5969  ;;  %v5454_v21 = vsel %vm4883_vm2, %v5453_v19, %v5449_v42  ;;  %v5734_v63 = vsel %vm2417_vm9, %v5552_v6, 0.0  ;;  %v5572_v30 = vmul.f32 %v8057_v52, %v12059_v29  ;;  %v12079_v47 = vld [vmem:[#allocation51_spill] sm:$0xff] }
 0xe37   :  { %v5507_v26 = vsel %vm5484_vm12, %v5454_v21, %v5506_v8  ;;  %v5674_v62 = vsel %vm2417_vm9, %v5532_v51, 0.0  ;;  %v12071_v21 = vld [vmem:[#allocation46_spill] sm:$0xff] }
 0xe38   :  { %v11076_v46 = vsel %vm5486_vm5, %v5473_v48, %v5507_v26  ;;  %v12065_v48 = vld [vmem:[#allocation40_spill] sm:$0xff]  ;;  %v5947_v26 = vsel %vm2417_vm9, %v12071_v21, 0.0 }
 0xe39   :  { %5687 = vadd.xlane.f32.xlu1 %v5686_v5  ;;  %5771 = vadd.xlane.f32.xlu0 %v5770_v9  ;;  %v5926_v53 = vsel %vm2417_vm9, %v12065_v48, 0.0  ;;  %v5794_v5 = vsel %vm2417_vm9, %v5572_v30, 0.0  ;;  %v8058_v48 = vld [vmem:[#allocation3 + $0x3f8] sm:$0xff] }
 0xe3a   :  { %v11078_v12 = vpop.xlane.xlu1 %5753  ;;  %v11080_v13 = vpop.xlane.xlu0 %5849  ;;  %v8063_v30 = vld [vmem:[#allocation3 + $0xb8] sm:$0xff] }
 0xe3b   :  { %v5548_v21 = vmul.f32 %v8063_v30, %v12059_v29 }
 0xe3d   :  { %5807 = vadd.xlane.f32.xlu1 %v5806_v36  ;;  %5891 = vadd.xlane.f32.xlu0 %v5890_v37  ;;  %v5971_v36 = vsel %vm2417_vm9, %v12072_v22, 0.0  ;;  %v5914_v37 = vsel %vm2417_vm9, %v12073_v39, 0.0  ;;  %v8064_v39 = vld [vmem:[#allocation3 + $0x1f8] sm:$0xff] }
 0xe3e   :  { %v11086_v15 = vpop.xlane.xlu1 %5765  ;;  %v11088_v33 = vpop.xlane.xlu0 %5861 }
 0xe41   :  { %5927 = vadd.xlane.f32.xlu1 %v5926_v53  ;;  %6011 = vadd.xlane.f32.xlu0 %v6010_v11  ;;  %v5652_v53 = vmul.f32 %v8058_v48, %v12059_v29 }
 0xe42   :  { %v11095_v59 = vpop.xlane.xlu1 %5789  ;;  %v11097_v20 = vpop.xlane.xlu0 %5885 }
 0xe45   :  { %5699 = vadd.xlane.f32.xlu1 %v5698_v35  ;;  %5783 = vadd.xlane.f32.xlu0 %v5782_v32  ;;  %v6034_v35 = vsel %vm2417_vm9, %v5652_v53, 0.0  ;;  %v5544_v32 = vmul.f32 %v8059_v34, %v12059_v29 }
 0xe46   :  { %v11102_v55 = vpop.xlane.xlu1 %5909  ;;  %v11104_v60 = vpop.xlane.xlu0 %6005 }
 0xe47   :  { %v5710_v7 = vsel %vm2417_vm9, %v5544_v32, 0.0 }
 0xe49   :  { %5819 = vadd.xlane.f32.xlu1 %v5818_v4  ;;  %5903 = vadd.xlane.f32.xlu0 %v5902_v3  ;;  %v5983_v3 = vsel %vm2417_vm9, %v12075_v28, 0.0  ;;  %v6628_v28 = vrot.slane %v11012_v16, %v10297_v43  ;;  %v6647_v16 = vrot.slane %v11024_v1, %v10297_v43  ;;  %v6685_v1 = vrot.slane %v11038_v57, %v10297_v43 }
 0xe4a   :  { %v11111_v14 = vpop.xlane.xlu1 %6029  ;;  %v11113_v18 = vpop.xlane.xlu0 %5777 }
 0xe4d   :  { %5939 = vadd.xlane.f32.xlu1 %v5938_v45  ;;  %6023 = vadd.xlane.f32.xlu0 %v6022_v27  ;;  %v5559_v45 = vmul.f32 %v8060_v17, %v12076_v10  ;;  %v8061_v27 = vld [vmem:[#allocation3 + $0x1d8] sm:$0xff] }
 0xe4e   :  { %v11120_v8 = vpop.xlane.xlu1 %5681  ;;  %v11122_v19 = vpop.xlane.xlu0 %5897  ;;  %v5584_v38 = vmul.f32 %v8061_v27, %v12059_v29 }
 0xe4f   :  { %v5755_v51 = vsel %vm2417_vm9, %v5559_v45, 0.0  ;;  %v12081_v45 = vld [vmem:[#allocation53_spill] sm:$0xff] }
 0xe50   :  { %v5959_v27 = vsel %vm2417_vm9, %v12081_v45, 0.0 }
 0xe51   :  { %5735 = vadd.xlane.f32.xlu1 %v5734_v63  ;;  %5675 = vadd.xlane.f32.xlu0 %v5674_v62  ;;  %v5830_v63 = vsel %vm2417_vm9, %v5584_v38, 0.0  ;;  %v8062_v62 = vld [vmem:[#allocation3 + $0x150] sm:$0xff] }
 0xe52   :  { %v11127_v49 = vpop.xlane.xlu1 %5801  ;;  %v11129_v42 = vpop.xlane.xlu0 %6017  ;;  %v5567_v52 = vmul.f32 %v8062_v62, %v12076_v10  ;;  %v8065_v38 = vld [vmem:[#allocation3 + $0x30] sm:$0xff] }
 0xe54   :  { %v5779_v22 = vsel %vm2417_vm9, %v5567_v52, 0.0 }
 0xe55   :  { %5948 = vadd.xlane.f32.xlu1 %v5947_v26  ;;  %5795 = vadd.xlane.f32.xlu0 %v5794_v5 }
 0xe56   :  { %v11134_v58 = vpop.xlane.xlu1 %5921  ;;  %v11136_v9 = vpop.xlane.xlu0 %5657 }
 0xe59   :  { %5972 = vadd.xlane.f32.xlu1 %v5971_v36  ;;  %5915 = vadd.xlane.f32.xlu0 %v5914_v37  ;;  %v5722_v36 = vsel %vm2417_vm9, %v5548_v21, 0.0  ;;  %v5588_v37 = vmul.f32 %v8064_v39, %v12059_v29  ;;  %v8066_v39 = vld [vmem:[#allocation3 + $0x170] sm:$0xff] }
 0xe5a   :  { %v11143_v61 = vpop.xlane.xlu1 %5693  ;;  %v11145_v11 = vpop.xlane.xlu0 %5669 }
 0xe5d   :  { %5864 = vadd.xlane.f32.xlu1 %v5863_v41  ;;  %6035 = vadd.xlane.f32.xlu0 %v6034_v35  ;;  %v5899_v41 = vsel %vm2417_vm9, %v12079_v47, 0.0  ;;  %v5842_v35 = vsel %vm2417_vm9, %v5588_v37, 0.0  ;;  %v5571_v37 = vmul.f32 %v8066_v39, %v12076_v10 }
 0xe5e   :  { %v11151_v0 = vpop.xlane.xlu1 %5813  ;;  %v11153_v4 = vpop.xlane.xlu0 %5705 }
 0xe61   :  { %5984 = vadd.xlane.f32.xlu1 %v5983_v3  ;;  %5711 = vadd.xlane.f32.xlu0 %v5710_v7  ;;  %v12080_v7 = vld [vmem:[#allocation52_spill] sm:$0xff] }
 0xe62   :  { %v11160_v6 = vpop.xlane.xlu1 %5933  ;;  %v11162_v24 = vpop.xlane.xlu0 %5825  ;;  %v6019_v17 = vsel %vm2417_vm9, %v12080_v7, 0.0 }
 0xe65   :  { %5756 = vadd.xlane.f32.xlu1 %v5755_v51  ;;  %5831 = vadd.xlane.f32.xlu0 %v5830_v63  ;;  %v5531_v51 = vmul.f32 %v8065_v38, %v12076_v10  ;;  %v6514_v38 = vrot.slane %v11054_v50, %v10297_v43  ;;  %v12086_v50 = vld [vmem:[#allocation58_spill] sm:$0xff] }
 0xe66   :  { %v11168_v26 = vpop.xlane.xlu1 %5729  ;;  %v11170_v5 = vpop.xlane.xlu0 %5717 }
 0xe67   :  { %12077 = vst [vmem:[#allocation11_spill] sm:$0xff] %v11168_v26  ;;  %v5671_v21 = vsel %vm2417_vm9, %v5531_v51, 0.0  ;;  %v12084_v51 = vld [vmem:[#allocation56_spill] sm:$0xff] }
 0xe69   :  { %5780 = vadd.xlane.f32.xlu1 %v5779_v22  ;;  %5723 = vadd.xlane.f32.xlu0 %v5722_v36  ;;  %v12082_v22 = vld [vmem:[#allocation54_spill] sm:$0xff] }
 0xe6a   :  { %v11175_v48 = vpop.xlane.xlu1 %5741  ;;  %v11177_v53 = vpop.xlane.xlu0 %5837  ;;  %v5851_v36 = vsel %vm2417_vm9, %v12082_v22, 0.0 }
 0xe6b   :  { %12078 = vst [vmem:[#allocation9_spill] sm:$0xff] %v11175_v48 }
 0xe6d   :  { %5900 = vadd.xlane.f32.xlu1 %v5899_v41  ;;  %5843 = vadd.xlane.f32.xlu0 %v5842_v35 }
 0xe6e   :  { %v11182_v34 = vpop.xlane.xlu1 %5966  ;;  %v5943_v32 = vpop.xlane.xlu0 %5942 }
 0xe6f   :  { %v6624_v3 = vrot.slane %v5943_v32, %v10294_v54 }
 0xe71   :  { %v11193_v63 = vsel %vm4869_vm14, %v6628_v28, %v6624_v3  ;;  %6020 = vadd.xlane.f32.xlu1 %v6019_v17  ;;  %5960 = vadd.xlane.f32.xlu0 %v5959_v27  ;;  %v5791_v28 = vsel %vm2417_vm9, %v5571_v37, 0.0  ;;  %v12083_v3 = vld [vmem:[#allocation55_spill] sm:$0xff] }
 0xe72   :  { %v11195_v62 = vpop.xlane.xlu1 %5846  ;;  %v5955_v52 = vpop.xlane.xlu0 %5954  ;;  %v5875_v7 = vsel %vm2417_vm9, %v12083_v3, 0.0 }
 0xe73   :  { %v6643_v30 = vrot.slane %v5955_v52, %v10294_v54  ;;  %v5911_v52 = vsel %vm2417_vm9, %v12084_v51, 0.0  ;;  %v12087_v51 = vld [vmem:[#allocation59_spill] sm:$0xff] }
 0xe75   :  { %v11205_v47 = vsel %vm4869_vm14, %v6647_v16, %v6643_v30  ;;  %5672 = vadd.xlane.f32.xlu1 %v5671_v21  ;;  %5852 = vadd.xlane.f32.xlu0 %v5851_v36  ;;  %v12085_v16 = vld [vmem:[#allocation57_spill] sm:$0xff]  ;;  %v8067_v21 = vld [vmem:[#allocation3 + $0x130] sm:$0xff] }
 0xe76   :  { %v11207_v41 = vpop.xlane.xlu1 %5858  ;;  %v5979_v35 = vpop.xlane.xlu0 %5978  ;;  %v5995_v30 = vsel %vm2417_vm9, %v12085_v16, 0.0  ;;  %v5563_v22 = vmul.f32 %v8067_v21, %v12076_v10  ;;  %v8069_v16 = vld [vmem:[#allocation3 + $0x190] sm:$0xff] }
 0xe77   :  { %v6681_v32 = vrot.slane %v5979_v35, %v10294_v54  ;;  %v6031_v35 = vsel %vm2417_vm9, %v12086_v50, 0.0 }
 0xe79   :  { %v11216_v17 = vsel %vm4869_vm14, %v6685_v1, %v6681_v32  ;;  %5792 = vadd.xlane.f32.xlu1 %v5791_v28  ;;  %5876 = vadd.xlane.f32.xlu0 %v5875_v7  ;;  %v5767_v1 = vsel %vm2417_vm9, %v5563_v22, 0.0  ;;  %v8068_v32 = vld [vmem:[#allocation3 + $0x50] sm:$0xff] }
 0xe7a   :  { %v11218_v45 = vpop.xlane.xlu1 %5882  ;;  %v5871_v27 = vpop.xlane.xlu0 %5870  ;;  %v5535_v28 = vmul.f32 %v8068_v32, %v12076_v10 }
 0xe7b   :  { %v6510_v57 = vrot.slane %v5871_v27, %v10294_v54  ;;  %v6362_v27 = vrot.slane %v11113_v18, %v10297_v43  ;;  %v6343_v18 = vrot.slane %v11086_v15, %v10297_v43 }
 0xe7d   :  { %v11229_v36 = vsel %vm4869_vm14, %v6514_v38, %v6510_v57  ;;  %5912 = vadd.xlane.f32.xlu1 %v5911_v52  ;;  %5996 = vadd.xlane.f32.xlu0 %v5995_v30  ;;  %v5683_v57 = vsel %vm2417_vm9, %v5535_v28, 0.0  ;;  %v5887_v52 = vsel %vm2417_vm9, %v12087_v51, 0.0  ;;  %v5575_v30 = vmul.f32 %v8069_v16, %v12076_v10 }
 0xe7e   :  { %v11231_v39 = vpop.xlane.xlu1 %6002  ;;  %v11233_v37 = vpop.xlane.xlu0 %5990  ;;  %v6381_v16 = vrot.slane %v11095_v59, %v10297_v43 }
 0xe7f   :  { %v5803_v28 = vsel %vm2417_vm9, %v5575_v30, 0.0  ;;  %v6742_v30 = vrot.slane %v11129_v42, %v10297_v43 }
 0xe81   :  { %6032 = vadd.xlane.f32.xlu1 %v6031_v35  ;;  %5768 = vadd.xlane.f32.xlu0 %v5767_v1  ;;  %v6552_v35 = vrot.slane %v11122_v19, %v10297_v43 }
 0xe82   :  { %v5775_v3 = vpop.xlane.xlu1 %5774  ;;  %v11239_v7 = vpop.xlane.xlu0 %5750 }
 0xe83   :  { %v6358_v38 = vrot.slane %v5775_v3, %v10294_v54  ;;  %v12088_v3 = vld [vmem:[#allocation60_spill] sm:$0xff] }
 0xe85   :  { %v11249_v21 = vsel %vm4869_vm14, %v6362_v27, %v6358_v38  ;;  %5684 = vadd.xlane.f32.xlu1 %v5683_v57  ;;  %5888 = vadd.xlane.f32.xlu0 %v5887_v52  ;;  %v6007_v27 = vsel %vm2417_vm9, %v12088_v3, 0.0  ;;  %v8070_v38 = vld [vmem:[#allocation3 + $0x10] sm:$0xff]  ;;  %v12089_v3 = vld [vmem:[#allocation61_spill] sm:$0xff] }
 0xe86   :  { %v5895_v22 = vpop.xlane.xlu1 %5894  ;;  %v5763_v50 = vpop.xlane.xlu0 %5762  ;;  %v5527_v57 = vmul.f32 %v8070_v38, %v12076_v10 }
 0xe87   :  { %v6548_v1 = vrot.slane %v5895_v22, %v10294_v54  ;;  %v6339_v32 = vrot.slane %v5763_v50, %v10294_v54 }
 0xe89   :  { %v11262_v51 = vsel %vm4869_vm14, %v6552_v35, %v6548_v1  ;;  %v11265_v15 = vsel %vm4869_vm14, %v6343_v18, %v6339_v32  ;;  %5804 = vadd.xlane.f32.xlu1 %v5803_v28  ;;  %6008 = vadd.xlane.f32.xlu0 %v6007_v27  ;;  %v5923_v35 = vsel %vm2417_vm9, %v12089_v3, 0.0  ;;  %v5659_v18 = vsel %vm2417_vm9, %v5527_v57, 0.0  ;;  %v8071_v1 = vld [vmem:[#allocation3 + $0xb0] sm:$0xff] }
 0xe8a   :  { %v6015_v19 = vpop.xlane.xlu1 %6014  ;;  %v5787_v52 = vpop.xlane.xlu0 %5786  ;;  %v5547_v32 = vmul.f32 %v8071_v1, %v12076_v10  ;;  %v8072_v28 = vld [vmem:[#allocation3 + $0x70] sm:$0xff]  ;;  %v6172_v57 = vrot.slane %v11136_v9, %v10297_v43 }
 0xe8b   :  { %v6738_v22 = vrot.slane %v6015_v19, %v10294_v54  ;;  %v6377_v50 = vrot.slane %v5787_v52, %v10294_v54  ;;  %v5539_v27 = vmul.f32 %v8072_v28, %v12076_v10  ;;  %v6571_v52 = vrot.slane %v11102_v55, %v10297_v43 }
 0xe8d   :  { %v11279_v59 = vsel %vm4869_vm14, %v6742_v30, %v6738_v22  ;;  %v11282_v42 = vsel %vm4869_vm14, %v6381_v16, %v6377_v50  ;;  %5924 = vadd.xlane.f32.xlu1 %v5923_v35  ;;  %5660 = vadd.xlane.f32.xlu0 %v5659_v18  ;;  %v5719_v30 = vsel %vm2417_vm9, %v5547_v32, 0.0  ;;  %v5695_v22 = vsel %vm2417_vm9, %v5539_v27, 0.0  ;;  %v8073_v16 = vld [vmem:[#allocation3 + $0x1f0] sm:$0xff] }
 0xe8e   :  { %v5655_v38 = vpop.xlane.xlu1 %5654  ;;  %v5907_v19 = vpop.xlane.xlu0 %5906  ;;  %v5587_v50 = vmul.f32 %v8073_v16, %v12076_v10  ;;  %v8074_v35 = vld [vmem:[#allocation3 + $0x1b0] sm:$0xff]  ;;  %v6761_v32 = vrot.slane %v11111_v14, %v10297_v43  ;;  %v6191_v27 = vrot.slane %v11145_v11, %v10297_v43 }
 0xe8f   :  { %v6168_v3 = vrot.slane %v5655_v38, %v10294_v54  ;;  %v6567_v1 = vrot.slane %v5907_v19, %v10294_v54  ;;  %v5579_v18 = vmul.f32 %v8074_v35, %v12076_v10 }
 0xe91   :  { %v11295_v28 = vsel %vm4869_vm14, %v6172_v57, %v6168_v3  ;;  %v11298_v55 = vsel %vm4869_vm14, %v6571_v52, %v6567_v1  ;;  %5720 = vadd.xlane.f32.xlu1 %v5719_v30  ;;  %5696 = vadd.xlane.f32.xlu0 %v5695_v22  ;;  %v5839_v57 = vsel %vm2417_vm9, %v5587_v50, 0.0  ;;  %v5815_v3 = vsel %vm2417_vm9, %v5579_v18, 0.0  ;;  %v8075_v52 = vld [vmem:[#allocation3 + $0xd0] sm:$0xff] }
 0xe92   :  { %12090 = vst [vmem:[#allocation62_spill] sm:$0xff] %v11295_v28  ;;  %v5667_v9 = vpop.xlane.xlu1 %5666  ;;  %v6027_v38 = vpop.xlane.xlu0 %6026  ;;  %v5551_v1 = vmul.f32 %v8075_v52, %v12076_v10  ;;  %v8076_v30 = vld [vmem:[#allocation3 + $0x2f0] sm:$0xff]  ;;  %v6210_v50 = vrot.slane %v11120_v8, %v10297_v43  ;;  %v6248_v18 = vrot.slane %v11153_v4, %v10297_v43 }
 0xe93   :  { %v6187_v19 = vrot.slane %v5667_v9, %v10294_v54  ;;  %v6757_v16 = vrot.slane %v6027_v38, %v10294_v54  ;;  %v5619_v22 = vmul.f32 %v8076_v30, %v12076_v10 }
 0xe95   :  { %v11311_v35 = vsel %vm4869_vm14, %v6191_v27, %v6187_v19  ;;  %v11314_v14 = vsel %vm4869_vm14, %v6761_v32, %v6757_v16  ;;  %5840 = vadd.xlane.f32.xlu1 %v5839_v57  ;;  %5816 = vadd.xlane.f32.xlu0 %v5815_v3  ;;  %v5731_v27 = vsel %vm2417_vm9, %v5551_v1, 0.0  ;;  %v5935_v19 = vsel %vm2417_vm9, %v5619_v22, 0.0  ;;  %v8077_v32 = vld [vmem:[#allocation3 + $0xf8] sm:$0xff]  ;;  %v8078_v57 = vld [vmem:[#allocation3 + $0x90] sm:$0xff] }
 0xe96   :  { %v5703_v11 = vpop.xlane.xlu1 %5702  ;;  %v5679_v9 = vpop.xlane.xlu0 %5678  ;;  %v5556_v16 = vmul.f32 %v8077_v32, %v12059_v29  ;;  %v5543_v3 = vmul.f32 %v8078_v57, %v12076_v10  ;;  %v6400_v1 = vrot.slane %v11127_v49, %v10297_v43  ;;  %v6438_v22 = vrot.slane %v11162_v24, %v10297_v43 }
 0xe97   :  { %v6244_v38 = vrot.slane %v5703_v11, %v10294_v54  ;;  %v6206_v52 = vrot.slane %v5679_v9, %v10294_v54  ;;  %v6590_v32 = vrot.slane %v11134_v58, %v10297_v43 }
 0xe99   :  { %v11327_v30 = vsel %vm4869_vm14, %v6248_v18, %v6244_v38  ;;  %v11330_v8 = vsel %vm4869_vm14, %v6210_v50, %v6206_v52  ;;  %5732 = vadd.xlane.f32.xlu1 %v5731_v27  ;;  %5936 = vadd.xlane.f32.xlu0 %v5935_v19  ;;  %v5746_v18 = vsel %vm2417_vm9, %v5556_v16, 0.0  ;;  %v5707_v38 = vsel %vm2417_vm9, %v5543_v3, 0.0  ;;  %v8079_v50 = vld [vmem:[#allocation3 + $0x1d0] sm:$0xff] }
 0xe9a   :  { %12091 = vst [vmem:[#allocation63_spill] sm:$0xff] %v11327_v30  ;;  %v5823_v4 = vpop.xlane.xlu1 %5822  ;;  %v5799_v11 = vpop.xlane.xlu0 %5798  ;;  %v5583_v52 = vmul.f32 %v8079_v50, %v12076_v10  ;;  %v6267_v16 = vrot.slane %v11170_v5, %v10297_v43  ;;  %v6229_v5 = vrot.slane %v11143_v61, %v10297_v43  ;;  %v6419_v61 = vrot.slane %v11151_v0, %v10297_v43  ;;  %v4218_v0 = vld [vmem:[%s11762_s16 + $0x10] sm:$0xff] }
 0xe9b   :  { %v6434_v29 = vrot.slane %v5823_v4, %v10294_v54  ;;  %v6396_v9 = vrot.slane %v5799_v11, %v10294_v54  ;;  %v8080_v11 = vld [vmem:[#allocation3 + $0xf0] sm:$0xff] }
 0xe9c   :  { %v5827_v4 = vsel %vm2417_vm9, %v5583_v52, 0.0 }
 0xe9d   :  { %v11342_v27 = vsel %vm4869_vm14, %v6438_v22, %v6434_v29  ;;  %v11345_v19 = vsel %vm4869_vm14, %v6400_v1, %v6396_v9  ;;  %5747 = vadd.xlane.f32.xlu1 %v5746_v18  ;;  %5708 = vadd.xlane.f32.xlu0 %v5707_v38  ;;  %v5555_v1 = vmul.f32 %v8080_v11, %v12076_v10 }
 0xe9e   :  { %12092 = vst [vmem:[#allocation64_spill] sm:$0xff] %v11342_v27  ;;  %v5715_v49 = vpop.xlane.xlu1 %5714  ;;  %v5919_v24 = vpop.xlane.xlu0 %5918  ;;  %v6457_v18 = vrot.slane %v11177_v53, %v10297_v43  ;;  %v6609_v11 = vrot.slane %v11160_v6, %v10297_v43  ;;  %v4217_v6 = vld [vmem:[%s11762_s16 + $0x8] sm:$0xff] }
 0xe9f   :  { %v6263_v57 = vrot.slane %v5715_v49, %v10294_v54  ;;  %v6586_v3 = vrot.slane %v5919_v24, %v10294_v54  ;;  %v5743_v10 = vsel %vm2417_vm9, %v5555_v1, 0.0 }
 0xea1   :  { %v11356_v22 = vsel %vm4869_vm14, %v6267_v16, %v6263_v57  ;;  %v11359_v29 = vsel %vm4869_vm14, %v6590_v32, %v6586_v3  ;;  %5828 = vadd.xlane.f32.xlu0 %v5827_v4  ;;  %v5522_v16 = vsel %vm2417_vm9, %v11076_v46, 0.0 }
 0xea2   :  { %12093 = vst [vmem:[#allocation13_spill] sm:$0xff] %v11356_v22  ;;  %12094 = vst [vmem:[#allocation14_spill] sm:$0xff] %v11359_v29  ;;  %v5835_v58 = vpop.xlane.xlu1 %5834  ;;  %v5691_v9 = vpop.xlane.xlu0 %5690 }
 0xea3   :  { %v6453_v38 = vrot.slane %v5835_v58, %v10294_v54  ;;  %v6225_v50 = vrot.slane %v5691_v9, %v10294_v54  ;;  %v5519_v58 = vsel %vm2417_vm9, %v10999_v56, 0.0 }
 0xea5   :  { %v11369_v52 = vsel %vm4869_vm14, %v6457_v18, %v6453_v38  ;;  %v11372_v49 = vsel %vm4869_vm14, %v6229_v5, %v6225_v50  ;;  %5744 = vadd.xlane.f32.xlu0 %v5743_v10  ;;  %v5516_v18 = vsel %vm2417_vm9, %v10887_v44, 0.0  ;;  %v5513_v50 = vsel %vm2417_vm9, %v10780_v2, 0.0  ;;  %v4219_v2 = vld [vmem:[%s11762_s16 + $0x18] sm:$0xff] }
 0xea6   :  { %12095 = vst [vmem:[#allocation15_spill] sm:$0xff] %v11369_v52  ;;  %12096 = vst [vmem:[#allocation16_spill] sm:$0xff] %v11372_v49  ;;  %v5952_v24 = vpop.xlane.xlu1 %5951  ;;  %v5811_v32 = vpop.xlane.xlu0 %5810 }
 0xea7   :  { %v6415_v53 = vrot.slane %v5811_v32, %v10294_v54 }
 0xea9   :  { %v11380_v57 = vsel %vm4869_vm14, %v6419_v61, %v6415_v53  ;;  %5523 = vadd.xlane.f32.xlu0 %v5522_v16 }
 0xeaa   :  { %12097 = vst [vmem:[#allocation17_spill] sm:$0xff] %v11380_v57  ;;  %v11382_v3 = vpop.xlane.xlu1 %5867  ;;  %v5931_v4 = vpop.xlane.xlu0 %5930 }
 0xeab   :  { %v6605_v1 = vrot.slane %v5931_v4, %v10294_v54 }
 0xead   :  { %v11393_v46 = vsel %vm4869_vm14, %v6609_v11, %v6605_v1  ;;  %5520 = vadd.xlane.f32.xlu0 %v5519_v58 }
 0xeae   :  { %12098 = vst [vmem:[#allocation18_spill] sm:$0xff] %v11393_v46  ;;  %6833 = vperm.xlu1 %7993, %v4218_v0   ;;  %v11395_v9 = vpop.xlane.xlu1 %5987  ;;  %v11397_v5 = vpop.xlane.xlu0 %5726 }
 0xeaf   :  { %12099 = vst [vmem:[#allocation19_spill] sm:$0xff] %v11397_v5  ;;  %v6662_v5 = vrot.slane %v11182_v34, %v10294_v54  ;;  %v6491_v34 = vrot.slane %v11207_v41, %v10294_v54 }
 0xeb1   :  { %5517 = vadd.xlane.f32.xlu0 %v5516_v18  ;;  %v6854_v18 = vld [vmem:[#allocation2] sm:$0x1] }
 0xeb2   :  { %6828 = vperm.xlu1 %7993, %v4217_v6   ;;  %v11404_v38 = vpop.xlane.xlu1 %5879  ;;  %v11406_v56 = vpop.xlane.xlu0 %5738 }
 0xeb3   :  { %12100 = vst [vmem:[#allocation20_spill] sm:$0xff] %v11406_v56 }
 0xeb5   :  { %5514 = vadd.xlane.f32.xlu0 %v5513_v50 }
 0xeb6   :  { %v11410_v10 = vpop.xlane.xlu1 %5999  ;;  %v11412_v32 = vpop.xlane.xlu0 %5963 }
 0xeba   :  { %v5760_v61 = vpop.xlane.xlu1 %5759  ;;  %v5976_v53 = vpop.xlane.xlu0 %5975 }
 0xebe   :  { %v11414_v16 = vpop.xlane.xlu1 %5663  ;;  %v11416_v4 = vpop.xlane.xlu0 %5855 }
 0xec2   :  { %v11418_v44 = vpop.xlane.xlu1 %5687  ;;  %v11420_v11 = vpop.xlane.xlu0 %5771 }
 0xec6   :  { %v11422_v1 = vpop.xlane.xlu1 %5807  ;;  %v11424_v0 = vpop.xlane.xlu0 %5891 }
 0xeca   :  { %v11429_v58 = vpop.xlane.xlu1 %5927  ;;  %v11431_v6 = vpop.xlane.xlu0 %6011 }
 0xecb   :  { %6838 = vperm.xlu0 %7992, %v4219_v2  }
 0xece   :  { %v11433_v50 = vpop.xlane.xlu1 %5699  ;;  %v5784_v48 = vpop.xlane.xlu0 %5783 }
 0xecf   :  { %12101 = vst [vmem:[#allocation12_spill] sm:$0xff] %v11433_v50  ;;  %6857 = vperm.xlu0 %7992, %v6854_v18   ;;  %v6638_v18 = vrot.slane %v5952_v24, %v10670_v25  ;;  %v6676_v24 = vrot.slane %v5976_v53, %v10670_v25 }
 0xed2   :  { %v11435_v27 = vpop.xlane.xlu1 %5819  ;;  %v5904_v52 = vpop.xlane.xlu0 %5903 }
 0xed3   :  { %12102 = vst [vmem:[#allocation21_spill] sm:$0xff] %v11435_v27 }
 0xed6   :  { %v11437_v56 = vpop.xlane.xlu1 %5939  ;;  %v11439_v30 = vpop.xlane.xlu0 %6023 }
 0xed7   :  { %12103 = vst [vmem:[#allocation22_spill] sm:$0xff] %v11437_v56  ;;  %v6666_v56 = vrot.slane %v11068_v40, %v10297_v43 }
 0xeda   :  { %v11441_v22 = vpop.xlane.xlu1 %5735  ;;  %v11443_v46 = vpop.xlane.xlu0 %5675 }
 0xedb   :  { %12104 = vst [vmem:[#allocation23_spill] sm:$0xff] %v11441_v22 }
 0xede   :  { %v5949_v26 = vpop.xlane.xlu1 %5948  ;;  %v11445_v57 = vpop.xlane.xlu0 %5795 }
 0xedf   :  { %v6633_v2 = vrot.slane %v5949_v26, %v10667_v31  ;;  %v6667_v26 = vsel %vm4869_vm14, %v6666_v56, %v6662_v5  ;;  %v6505_v5 = vrot.slane %v11382_v3, %v10670_v25  ;;  %v6324_v3 = vrot.slane %v11078_v12, %v10297_v43 }
 0xee1   :  { %v6634_v27 = vsel %vm4876_vm13, %v6633_v2, %v11193_v63  ;;  %v6495_v63 = vrot.slane %v11088_v33, %v10297_v43 }
 0xee2   :  { %v6639_v22 = vsel %vm4883_vm2, %v6638_v18, %v6634_v27  ;;  %v5973_v49 = vpop.xlane.xlu1 %5972  ;;  %v11456_v50 = vpop.xlane.xlu0 %5915 }
 0xee3   :  { %v6671_v28 = vrot.slane %v5973_v49, %v10667_v31  ;;  %v6496_v49 = vsel %vm4869_vm14, %v6495_v63, %v6491_v34 }
 0xee5   :  { %v6672_v29 = vsel %vm4876_vm13, %v6671_v28, %v6667_v26  ;;  %v6695_v26 = vrot.slane %v11395_v9, %v10670_v25 }
 0xee6   :  { %v6677_v40 = vsel %vm4883_vm2, %v6676_v24, %v6672_v29  ;;  %v5865_v27 = vpop.xlane.xlu1 %5864  ;;  %v11467_v2 = vpop.xlane.xlu0 %6035  ;;  %v6320_v29 = vrot.slane %v11239_v7, %v10294_v54  ;;  %v6334_v7 = vrot.slane %v5760_v61, %v10670_v25 }
 0xee7   :  { %v6500_v18 = vrot.slane %v5865_v27, %v10667_v31 }
 0xee9   :  { %v6501_v41 = vsel %vm4876_vm13, %v6500_v18, %v6496_v49  ;;  %v6325_v49 = vsel %vm4869_vm14, %v6324_v3, %v6320_v29  ;;  %v6562_v3 = vrot.slane %v5904_v52, %v10670_v25 }
 0xeea   :  { %v6506_v56 = vsel %vm4883_vm2, %v6505_v5, %v6501_v41  ;;  %v5985_v28 = vpop.xlane.xlu1 %5984  ;;  %v11475_v53 = vpop.xlane.xlu0 %5711 }
 0xeeb   :  { %v6690_v33 = vrot.slane %v5985_v28, %v10667_v31  ;;  %v6372_v28 = vrot.slane %v5784_v48, %v10670_v25 }
 0xeed   :  { %v6691_v34 = vsel %vm4876_vm13, %v6690_v33, %v11216_v17 }
 0xeee   :  { %v6696_v24 = vsel %vm4883_vm2, %v6695_v26, %v6691_v34  ;;  %v5757_v63 = vpop.xlane.xlu1 %5756  ;;  %v11487_v27 = vpop.xlane.xlu0 %5831 }
 0xeef   :  { %v6329_v18 = vrot.slane %v5757_v63, %v10667_v31 }
 0xef1   :  { %v6330_v5 = vsel %vm4876_vm13, %v6329_v18, %v6325_v49 }
 0xef2   :  { %v11494_v9 = vsel %vm4883_vm2, %v6334_v7, %v6330_v5  ;;  %v5781_v17 = vpop.xlane.xlu1 %5780  ;;  %v11496_v41 = vpop.xlane.xlu0 %5723  ;;  %v6472_v7 = vrot.slane %v11195_v62, %v10294_v54  ;;  %v6657_v5 = vrot.slane %v11412_v32, %v10670_v25  ;;  %v6486_v32 = vrot.slane %v11416_v4, %v10670_v25 }
 0xef3   :  { %v6367_v12 = vrot.slane %v5781_v17, %v10667_v31 }
 0xef5   :  { %v6368_v33 = vsel %vm4876_vm13, %v6367_v12, %v11249_v21 }
 0xef6   :  { %v11503_v26 = vsel %vm4883_vm2, %v6372_v28, %v6368_v33  ;;  %v5901_v29 = vpop.xlane.xlu1 %5900  ;;  %v11505_v61 = vpop.xlane.xlu0 %5843 }
 0xef7   :  { %v6557_v34 = vrot.slane %v5901_v29, %v10667_v31 }
 0xef9   :  { %v6558_v63 = vsel %vm4876_vm13, %v6557_v34, %v11262_v51  ;;  %v6476_v51 = vrot.slane %v11080_v13, %v10297_v43 }
 0xefa   :  { %v11512_v18 = vsel %vm4883_vm2, %v6562_v3, %v6558_v63  ;;  %v11514_v48 = vpop.xlane.xlu1 %6020  ;;  %v5961_v49 = vpop.xlane.xlu0 %5960 }
 0xefb   :  { %v6652_v21 = vrot.slane %v5961_v49, %v10667_v31  ;;  %v6477_v62 = vsel %vm4869_vm14, %v6476_v51, %v6472_v7 }
 0xefd   :  { %v6653_v52 = vsel %vm4876_vm13, %v6652_v21, %v11205_v47  ;;  %v6201_v47 = vrot.slane %v11443_v46, %v10670_v25 }
 0xefe   :  { %v6658_v17 = vsel %vm4883_vm2, %v6657_v5, %v6653_v52  ;;  %v5673_v12 = vpop.xlane.xlu1 %5672  ;;  %v5853_v28 = vpop.xlane.xlu0 %5852  ;;  %v6524_v52 = vrot.slane %v11404_v38, %v10670_v25 }
 0xeff   :  { %v6794_v33 = vsel %vm5474_vm15, %v6658_v17, %v6639_v22  ;;  %v6196_v29 = vrot.slane %v5673_v12, %v10667_v31  ;;  %v6481_v34 = vrot.slane %v5853_v28, %v10667_v31 }
 0xf00   :  { %v6795_v13 = vsel %vm5476_vm7, %v6677_v40, %v6794_v33 }
 0xf01   :  { %v6197_v3 = vsel %vm4876_vm13, %v6196_v29, %v11311_v35  ;;  %v6482_v63 = vsel %vm4876_vm13, %v6481_v34, %v6477_v62  ;;  %v6796_v22 = vsel %vm5478_vm8, %v6696_v24, %v6795_v13  ;;  %v6700_v35 = vrot.slane %v11233_v37, %v10294_v54 }
 0xf02   :  { %v11540_v49 = vsel %vm4883_vm2, %v6201_v47, %v6197_v3  ;;  %v6487_v21 = vsel %vm4883_vm2, %v6486_v32, %v6482_v63  ;;  %v5793_v7 = vpop.xlane.xlu1 %5792  ;;  %v5877_v5 = vpop.xlane.xlu0 %5876  ;;  %v6391_v24 = vrot.slane %v11445_v57, %v10670_v25  ;;  %v6719_v34 = vrot.slane %v11231_v39, %v10294_v54 }
 0xf03   :  { %v6787_v4 = vsel %vm5474_vm15, %v6506_v56, %v6487_v21  ;;  %v6386_v46 = vrot.slane %v5793_v7, %v10667_v31  ;;  %v6519_v40 = vrot.slane %v5877_v5, %v10667_v31  ;;  %v6704_v56 = vrot.slane %v11066_v23, %v10297_v43 }
 0xf04   :  { %v6529_v23 = vrot.slane %v11218_v45, %v10294_v54  ;;  %v6533_v63 = vrot.slane %v11097_v20, %v10297_v43  ;;  %v6353_v45 = vrot.slane %v11420_v11, %v10670_v25  ;;  %v6747_v20 = vrot.slane %v11514_v48, %v10667_v31 }
 0xf05   :  { %v6387_v51 = vsel %vm4876_vm13, %v6386_v46, %v11282_v42  ;;  %v6520_v17 = vsel %vm4876_vm13, %v6519_v40, %v11229_v36  ;;  %v6705_v57 = vsel %vm4869_vm14, %v6704_v56, %v6700_v35  ;;  %v6714_v42 = vrot.slane %v11410_v10, %v10670_v25 }
 0xf06   :  { %v6392_v12 = vsel %vm4883_vm2, %v6391_v24, %v6387_v51  ;;  %v6525_v28 = vsel %vm4883_vm2, %v6524_v52, %v6520_v17  ;;  %v5913_v37 = vpop.xlane.xlu1 %5912  ;;  %v5997_v33 = vpop.xlane.xlu0 %5996  ;;  %v6723_v10 = vrot.slane %v11104_v60, %v10297_v43  ;;  %v6534_v7 = vsel %vm4869_vm14, %v6533_v63, %v6529_v23 }
 0xf07   :  { %v6788_v38 = vsel %vm5476_vm7, %v6525_v28, %v6787_v4  ;;  %v6709_v29 = vrot.slane %v5997_v33, %v10667_v31  ;;  %v6576_v21 = vrot.slane %v5913_v37, %v10667_v31  ;;  %v6543_v35 = vrot.slane %v11424_v0, %v10670_v25 }
 0xf08   :  { %v6724_v5 = vsel %vm4869_vm14, %v6723_v10, %v6719_v34  ;;  %v6581_v0 = vrot.slane %v11456_v50, %v10670_v25  ;;  %v6748_v37 = vsel %vm4876_vm13, %v6747_v20, %v11279_v59  ;;  %v6752_v50 = vrot.slane %v11439_v30, %v10670_v25 }
 0xf09   :  { %v6710_v36 = vsel %vm4876_vm13, %v6709_v29, %v6705_v57  ;;  %v6577_v52 = vsel %vm4876_vm13, %v6576_v21, %v11298_v55 }
 0xf0a   :  { %v6715_v62 = vsel %vm4883_vm2, %v6714_v42, %v6710_v36  ;;  %v6033_v32 = vpop.xlane.xlu1 %6032  ;;  %v5769_v47 = vpop.xlane.xlu0 %5768  ;;  %v6582_v29 = vsel %vm4883_vm2, %v6581_v0, %v6577_v52  ;;  %v12110_v0 = vld [vmem:[#allocation21_spill] sm:$0xff] }
 0xf0b   :  { %v6348_v13 = vrot.slane %v5769_v47, %v10667_v31  ;;  %v6797_v3 = vsel %vm5480_vm10, %v6715_v62, %v6796_v22  ;;  %v6766_v48 = vrot.slane %v6033_v32, %v10667_v31 }
 0xf0d   :  { %v6349_v39 = vsel %vm4876_vm13, %v6348_v13, %v11265_v15  ;;  %v6220_v15 = vrot.slane %v11418_v44, %v10670_v25  ;;  %v6410_v44 = vrot.slane %v11422_v1, %v10670_v25  ;;  %v6733_v1 = vrot.slane %v11431_v6, %v10670_v25 }
 0xf0e   :  { %v6354_v22 = vsel %vm4883_vm2, %v6353_v45, %v6349_v39  ;;  %v5685_v4 = vpop.xlane.xlu1 %5684  ;;  %v5889_v46 = vpop.xlane.xlu0 %5888  ;;  %v6767_v59 = vsel %vm4876_vm13, %v6766_v48, %v11314_v14  ;;  %v6771_v6 = vrot.slane %v11467_v2, %v10670_v25  ;;  %v6182_v13 = vrot.slane %v11414_v16, %v10670_v25  ;;  %v12105_v45 = vld [vmem:[#allocation14_spill] sm:$0xff] }
 0xf0f   :  { %v6780_v60 = vsel %vm5474_vm15, %v6354_v22, %v11494_v9  ;;  %v6215_v11 = vrot.slane %v5685_v4, %v10667_v31  ;;  %v6538_v40 = vrot.slane %v5889_v46, %v10667_v31  ;;  %v6600_v2 = vrot.slane %v11429_v58, %v10670_v25  ;;  %v12106_v39 = vld [vmem:[#allocation62_spill] sm:$0xff] }
 0xf10   :  { %v6781_v24 = vsel %vm5476_vm7, %v11503_v26, %v6780_v60  ;;  %v6772_v63 = vsel %vm4883_vm2, %v6771_v6, %v6767_v59  ;;  %v12113_v59 = vld [vmem:[#allocation22_spill] sm:$0xff] }
 0xf11   :  { %v6216_v9 = vsel %vm4876_vm13, %v6215_v11, %v11330_v8  ;;  %v6539_v51 = vsel %vm4876_vm13, %v6538_v40, %v6534_v7  ;;  %v6782_v17 = vsel %vm5478_vm8, %v6392_v12, %v6781_v24  ;;  %v12107_v11 = vld [vmem:[#allocation12_spill] sm:$0xff] }
 0xf12   :  { %v6221_v55 = vsel %vm4883_vm2, %v6220_v15, %v6216_v9  ;;  %v6544_v56 = vsel %vm4883_vm2, %v6543_v35, %v6539_v51  ;;  %v5805_v26 = vpop.xlane.xlu1 %5804  ;;  %v6009_v28 = vpop.xlane.xlu0 %6008  ;;  %v6239_v40 = vrot.slane %v12107_v11, %v10670_v25  ;;  %v12108_v35 = vld [vmem:[#allocation16_spill] sm:$0xff] }
 0xf13   :  { %v6789_v8 = vsel %vm5478_vm8, %v6544_v56, %v6788_v38  ;;  %v6405_v33 = vrot.slane %v5805_v26, %v10667_v31  ;;  %v6728_v12 = vrot.slane %v6009_v28, %v10667_v31  ;;  %v6429_v56 = vrot.slane %v12110_v0, %v10670_v25  ;;  %v12111_v26 = vld [vmem:[#allocation17_spill] sm:$0xff]  ;;  %v12112_v28 = vld [vmem:[#allocation11_spill] sm:$0xff] }
 0xf14   :  { %v6790_v57 = vsel %vm5480_vm10, %v11512_v18, %v6789_v8  ;;  %v6753_v18 = vsel %vm4883_vm2, %v6752_v50, %v6748_v37  ;;  %v6286_v37 = vrot.slane %v12112_v28, %v10297_v43 }
 0xf15   :  { %v6406_v38 = vsel %vm4876_vm13, %v6405_v33, %v11345_v19  ;;  %v6729_v42 = vsel %vm4876_vm13, %v6728_v12, %v6724_v5  ;;  %v6791_v36 = vsel %vm5482_vm11, %v6582_v29, %v6790_v57 }
 0xf16   :  { %v6411_v30 = vsel %vm4883_vm2, %v6410_v44, %v6406_v38  ;;  %v6734_v23 = vsel %vm4883_vm2, %v6733_v1, %v6729_v42  ;;  %v5925_v34 = vpop.xlane.xlu1 %5924  ;;  %v5661_v62 = vpop.xlane.xlu0 %5660  ;;  %v6619_v38 = vrot.slane %v12113_v59, %v10670_v25  ;;  %v12114_v42 = vld [vmem:[#allocation23_spill] sm:$0xff] }
 0xf17   :  { %v6595_v14 = vrot.slane %v5925_v34, %v10667_v31  ;;  %v6177_v32 = vrot.slane %v5661_v62, %v10667_v31  ;;  %v6798_v19 = vsel %vm5482_vm11, %v6734_v23, %v6797_v3  ;;  %v6783_v47 = vsel %vm5480_vm10, %v6411_v30, %v6782_v17  ;;  %v12109_v17 = vld [vmem:[#allocation19_spill] sm:$0xff]  ;;  %v12115_v23 = vld [vmem:[#allocation18_spill] sm:$0xff] }
 0xf18   :  { %v6799_v10 = vsel %vm5484_vm12, %v6753_v18, %v6798_v19  ;;  %v6282_v44 = vrot.slane %v12109_v17, %v10294_v54 }
 0xf19   :  { %v6596_v21 = vsel %vm4876_vm13, %v6595_v14, %v12105_v45  ;;  %v6178_v7 = vsel %vm4876_vm13, %v6177_v32, %v12106_v39  ;;  %v6800_v3 = vsel %vm5486_vm5, %v6772_v63, %v6799_v10  ;;  %v6277_v45 = vrot.slane %v11496_v41, %v10670_v25  ;;  %v12119_v41 = vld [vmem:[#allocation15_spill] sm:$0xff] }
 0xf1a   :  { %v6183_v5 = vsel %vm4883_vm2, %v6182_v13, %v6178_v7  ;;  %v5721_v22 = vpop.xlane.xlu1 %5720  ;;  %v5697_v4 = vpop.xlane.xlu0 %5696  ;;  %v6814_v16 = vsel %vm2417_vm9, %v6800_v3, 0.0  ;;  %v6601_v58 = vsel %vm4883_vm2, %v6600_v2, %v6596_v21  ;;  %v6287_v57 = vsel %vm4869_vm14, %v6286_v37, %v6282_v44  ;;  %v12116_v13 = vld [vmem:[#allocation13_spill] sm:$0xff]  ;;  %v12117_v21 = vld [vmem:[#allocation63_spill] sm:$0xff] }
 0xf1b   :  { %v6773_v46 = vsel %vm5474_vm15, %v11540_v49, %v6183_v5  ;;  %v6234_v20 = vrot.slane %v5697_v4, %v10667_v31  ;;  %6815 = vadd.xlane.f32.xlu1 %v6814_v16  ;;  %v6792_v60 = vsel %vm5484_vm12, %v6601_v58, %v6791_v36  ;;  %v6296_v36 = vrot.slane %v12114_v42, %v10670_v25  ;;  %v12118_v4 = vld [vmem:[#allocation20_spill] sm:$0xff] }
 0xf1c   :  { %v6774_v15 = vsel %vm5476_vm7, %v6221_v55, %v6773_v46  ;;  %v6272_v6 = vrot.slane %v5721_v22, %v10667_v31  ;;  %v6301_v16 = vrot.slane %v12118_v4, %v10294_v54  ;;  %v6448_v58 = vrot.slane %v11487_v27, %v10670_v25 }
 0xf1d   :  { %v6235_v52 = vsel %vm4876_vm13, %v6234_v20, %v12108_v35 }
 0xf1e   :  { %v6240_v24 = vsel %vm4883_vm2, %v6239_v40, %v6235_v52  ;;  %v5841_v48 = vpop.xlane.xlu1 %5840  ;;  %v5817_v9 = vpop.xlane.xlu0 %5816  ;;  %v6273_v2 = vsel %vm4876_vm13, %v6272_v6, %v12116_v13  ;;  %v12120_v40 = vld [vmem:[#allocation64_spill] sm:$0xff]  ;;  %v12121_v52 = vld [vmem:[#allocation9_spill] sm:$0xff] }
 0xf1f   :  { %v6775_v51 = vsel %vm5478_vm8, %v6240_v24, %v6774_v15  ;;  %v6424_v49 = vrot.slane %v5817_v9, %v10667_v31  ;;  %v6462_v63 = vrot.slane %v5841_v48, %v10667_v31  ;;  %v6278_v5 = vsel %vm4883_vm2, %v6277_v45, %v6273_v2  ;;  %v6853_v45 = vld [vmem:[%s11763_s17] sm:$0x1] }
 0xf20   :  { %v6305_v54 = vrot.slane %v12121_v52, %v10297_v43 }
 0xf21   :  { %v6425_v55 = vsel %vm4876_vm13, %v6424_v49, %v12111_v26  ;;  %v6463_v46 = vsel %vm4876_vm13, %v6462_v63, %v12119_v41  ;;  %v4216_v26 = vld [vmem:[%s11762_s16] sm:$0xff] }
 0xf22   :  { %v6430_v8 = vsel %vm4883_vm2, %v6429_v56, %v6425_v55  ;;  %v5733_v33 = vpop.xlane.xlu1 %5732  ;;  %v5937_v12 = vpop.xlane.xlu0 %5936 }
 0xf23   :  { %v6291_v1 = vrot.slane %v5733_v33, %v10667_v31  ;;  %v6614_v50 = vrot.slane %v5937_v12, %v10667_v31  ;;  %v6784_v29 = vsel %vm5482_vm11, %v6430_v8, %v6783_v47  ;;  %v6258_v47 = vrot.slane %v11475_v53, %v10670_v25 }
 0xf25   :  { %v6292_v30 = vsel %vm4876_vm13, %v6291_v1, %v6287_v57  ;;  %v6615_v34 = vsel %vm4876_vm13, %v6614_v50, %v12115_v23 }
 0xf26   :  { %v5709_v62 = vpop.xlane.xlu0 %5708  ;;  %v6620_v18 = vsel %vm4883_vm2, %v6619_v38, %v6615_v34  ;;  %v6297_v14 = vsel %vm4883_vm2, %v6296_v36, %v6292_v30  ;;  %v5748_v11 = vpop.xlane.xlu1 %5747  ;;  %v12123_v38 = vmov 0.0  }
 0xf27   :  { %v6253_v32 = vrot.slane %v5709_v62, %v10667_v31  ;;  %v6793_v19 = vsel %vm5486_vm5, %v6620_v18, %v6792_v60  ;;  %v6467_v60 = vrot.slane %v11505_v61, %v10670_v25  ;;  %v6306_v61 = vsel %vm4869_vm14, %v6305_v54, %v6301_v16 }
 0xf28   :  { %v6811_v10 = vsel %vm2417_vm9, %v6793_v19, 0.0  ;;  %v6315_v49 = vrot.slane %v5748_v11, %v10670_v25 }
 0xf29   :  { %v6254_v39 = vsel %vm4876_vm13, %v6253_v32, %v12117_v21  ;;  %6812 = vadd.xlane.f32.xlu1 %v6811_v10  ;;  %v6468_v9 = vsel %vm4883_vm2, %v6467_v60, %v6463_v46 }
 0xf2a   :  { %v6259_v7 = vsel %vm4883_vm2, %v6258_v47, %v6254_v39  ;;  %v5829_v3 = vpop.xlane.xlu0 %5828  ;;  %v6834_v28 = vpop.permute.xlu1 %6833  ;;  %v12126_v39 = vld [vmem:[#allocation10_spill] sm:$0xff] }
 0xf2b   :  { %v6443_v53 = vrot.slane %v5829_v3, %v10667_v31  ;;  %v6776_v22 = vsel %vm5480_vm10, %v6259_v7, %v6775_v51 }
 0xf2c   :  { %v6777_v20 = vsel %vm5482_vm11, %v6278_v5, %v6776_v22 }
 0xf2d   :  { %v6444_v15 = vsel %vm4876_vm13, %v6443_v53, %v12120_v40  ;;  %v6778_v35 = vsel %vm5484_vm12, %v6297_v14, %v6777_v20 }
 0xf2e   :  { %v5745_v24 = vpop.xlane.xlu0 %5744  ;;  %v6449_v27 = vsel %vm4883_vm2, %v6448_v58, %v6444_v15  ;;  %v6829_v8 = vpop.permute.xlu1 %6828 }
 0xf2f   :  { %v6310_v48 = vrot.slane %v5745_v24, %v10667_v31  ;;  %v6785_v51 = vsel %vm5484_vm12, %v6449_v27, %v6784_v29 }
 0xf30   :  { %v6786_v17 = vsel %vm5486_vm5, %v6468_v9, %v6785_v51 }
 0xf31   :  { %v6311_v44 = vsel %vm4876_vm13, %v6310_v48, %v6306_v61  ;;  %v6808_v0 = vsel %vm2417_vm9, %v6786_v17, 0.0 }
 0xf32   :  { %6809 = vadd.xlane.f32.xlu1 %v6808_v0  ;;  %v6316_v43 = vsel %vm4883_vm2, %v6315_v49, %v6311_v44  ;;  %v5524_v25 = vpop.xlane.xlu0 %5523 }
 0xf33   :  { %v6779_v56 = vsel %vm5486_vm5, %v6316_v43, %v6778_v35 }
 0xf34   :  { %v6805_v31 = vsel %vm2417_vm9, %v6779_v56, 0.0 }
 0xf36   :  { %6806 = vadd.xlane.f32.xlu1 %v6805_v31  ;;  %v5521_v55 = vpop.xlane.xlu0 %5520 }
 0xf3a   :  { %v5518_v37 = vpop.xlane.xlu0 %5517 }
 0xf3e   :  { %v5515_v33 = vpop.xlane.xlu0 %5514 }
 0xf46   :  { %v6839_v1 = vpop.permute.xlu0 %6838 }
 0xf47   :  { %6823 = vperm.xlu1 %7993, %v4216_v26  }
 0xf4a   :  { %v6858_v21 = vpop.permute.xlu0 %6857 }
 0xf4b   :  { %v6863_v7 = vrot.slane %v6858_v21, %v12126_v39 }
 0xfa4   :  { %v6816_v12 = vpop.xlane.xlu1 %6815 }
 0xfa5   :  { %v6820_v50 = vsel %vm12122_vm4, %v5524_v25, %v6816_v12 }
 0xfa6   :  { %v6844_v29 = vadd.f32 %v6839_v1, %v6820_v50 }
 0xfa8   :  { %v6848_v57 = vmul.f32 0.2, %v6844_v29 }
 0xfaa   :  { %v6852_v59 = vmax.f32 %v6844_v29, %v6848_v57 }
 0xfac   :  { %7970 = vmatpush3.msra.mxu0 %v6852_v59 }
 0xfad   :  { %7971 = vmatprep.subr.mxu0 %v12123_v38 }
 0xfb2   :  { %v6813_v42 = vpop.xlane.xlu1 %6812 }
 0xfb3   :  { %v6819_v36 = vsel %vm11962_vm0, %v5521_v55, %v6813_v42 }
 0xfb4   :  { %v6843_v6 = vadd.f32 %v6834_v28, %v6819_v36 }
 0xfb6   :  { %v6847_v30 = vmul.f32 0.2, %v6843_v6 }
 0xfb8   :  { %v6851_v23 = vmax.f32 %v6843_v6, %v6847_v30 }
 0xfba   :  { %7972 = vmatpush3.msra.mxu0 %v6851_v23 }
 0xfbb   :  { %v6810_v34 = vpop.xlane.xlu1 %6809  ;;  %7973 = vmatprep.subr.mxu0 %v12123_v38 }
 0xfbc   :  { %v6818_v62 = vsel %vm12124_vm3, %v5518_v37, %v6810_v34 }
 0xfbd   :  { %v6842_v18 = vadd.f32 %v6829_v8, %v6818_v62 }
 0xfbf   :  { %v6846_v14 = vmul.f32 0.2, %v6842_v18  ;;  %v6807_v32 = vpop.xlane.xlu1 %6806 }
 0xfc0   :  { %v6817_v13 = vsel %vm12125_vm6, %v5515_v33, %v6807_v32 }
 0xfc1   :  { %v6850_v19 = vmax.f32 %v6842_v18, %v6846_v14 }
 0xfc3   :  { %v6824_v47 = vpop.permute.xlu1 %6823  ;;  %7974 = vmatpush3.msra.mxu0 %v6850_v19 }
 0xfc4   :  { %v6841_v2 = vadd.f32 %v6824_v47, %v6817_v13  ;;  %7975 = vmatprep.subr.mxu0 %v12123_v38 }
 0xfc6   :  { %v6845_v63 = vmul.f32 0.2, %v6841_v2 }
 0xfc8   :  { %v6849_v10 = vmax.f32 %v6841_v2, %v6845_v63 }
 0xfca   :  { %7976 = vmatpush3.msra.mxu0 %v6849_v10 }
 0xfcb   :  { %7978 = vmatmul.mubr.msk.f32.vlgmr.msra.gmra.mxu0 %vm2417_vm9, %v6853_v45 }
0x108b   :  { %v6933_v3 = vpop.f32.mrf.mxu0 }
0x108c   :  { %v6934_v5 = vadd.f32 %v6933_v3, %v6863_v7 }
0x108d   :  { %v7979_v53 = vpop.f32.mrf.mxu0 }
0x108e   :  { %6938 = vst.msk [vmem:[#allocation6] sm:$0x1] %vm6937_vm1, %v6934_v5 }
0x108f   :  { %8112 = shalt.err (!%p8109_p9)
}
0x1090   :  { %6948 = dma.vmem_to_hbm [thread:$0]  %s6946_s9, 16, %s11765_s19, [#allocation5]  }
0x1091   :  { %8123 = dma.done.wait [#allocation5], 16  }
0x1092   :  { %8124 = vsyncadd [#allocation5], 4294967280 }
0x1093   :  { %6952 = vsyncpa [#allocation4], 1 }
0x1094   :  { %6953 = vsyncpa [#allocation5], 1 }

</bundles_post_ra>
